<compile_context>
chip_gen: v6e
topology: v6e:2x2x1
jax: 0.10.0
libtpu: 0.0.40
codegen_flags: <defaults>
</compile_context>

<pallas_src>
import math

import jax
import jax.numpy as jnp
from jax import lax
from jax.experimental import pallas as pl
from jax.experimental.pallas import tpu as pltpu

# ----------------------------- config ---------------------------------------
N_CLASSES = 10          # arch.n_classes
N_CHANNELS = 3          # arch.n_channels  -> x_dim = 32
X_DIM = 32
MEMORY_SIZE = 20        # ETPHyperParams.memory_size
MEMO_SCALE = 0.1        # ETPHyperParams.memo_variance (Normal scale in torch code)
D_IN = N_CHANNELS * X_DIM * X_DIM

BATCH = 256             # batch work per pallas_call (amortizes launch overhead)
B_TILE = 128            # rows per grid step


# ----------------------------- kernel ---------------------------------------
def etp_forward_kernel(x_ref, wenc_ref, benc_ref, mem_ref,
                       wk_ref, bk_ref, wp_x_ref, wp_a_ref, bp_ref, out_ref):
    # x_embed = arch(x): Linear(D_IN -> C).  bf16 operands, f32 accumulation.
    x_embed = (
        jnp.dot(x_ref[...], wenc_ref[...], preferred_element_type=jnp.float32)
        + benc_ref[...]
    )

    # get_attention:
    #   keys = fc1_key(mem_sample)        (M, C); 1/sqrt(C) folded into wk/bk.
    keys = (
        jnp.dot(mem_ref[...], wk_ref[...], preferred_element_type=jnp.float32)
        + bk_ref[...]
    )
    #   kq = x_embed @ keys.T             (B_TILE, M) -- contract class dims,
    #   no transpose / relayout of keys materialized.
    kq = lax.dot_general(x_embed, keys, (((1,), (1,)), ((), ())),
                         preferred_element_type=jnp.float32)
    #   weights = softmax(kq, dim=1)      (divide moved to EUP reciprocal)
    kq_max = jnp.max(kq, axis=-1, keepdims=True)
    p = jnp.exp(kq - kq_max)
    denom = jnp.sum(p, axis=-1, keepdims=True)
    weights = p * pl.reciprocal(denom, approx=True)
    #   attention = weights @ mem_sample  (B_TILE, C)
    attention = jnp.dot(weights, mem_ref[...], preferred_element_type=jnp.float32)

    # logit = fc1_enc_to_pred(cat(x_embed, attention))
    # (concat folded into a split weight: W = [W_x ; W_a])
    logit = (
        jnp.dot(x_embed, wp_x_ref[...], preferred_element_type=jnp.float32)
        + jnp.dot(attention, wp_a_ref[...], preferred_element_type=jnp.float32)
        + bp_ref[...]
    )

    # return logit.clamp(max=15)
    out_ref[...] = jnp.minimum(logit, 15.0)


# ----------------------------- wrapper ---------------------------------------
def etp_forward(x_nchw, params, mem_sample, *, b_tile=B_TILE):
    b = x_nchw.shape[0]
    assert b % b_tile == 0, "batch must be a multiple of the B tile"
    # Flatten NCHW row-major (matches torch .view(B, -1)); bf16 activations.
    x_flat = x_nchw.reshape(b, -1).astype(jnp.bfloat16)

    c = N_CLASSES
    m = MEMORY_SIZE

    def fixed(shape):
        # Weight / bias / memory blocks: same block every grid step -> stay
        # VMEM-resident across the batch grid (no re-DMA).
        return pl.BlockSpec(shape, lambda i, _n=len(shape): (0,) * _n)

    grid_spec = pltpu.PrefetchScalarGridSpec(
        num_scalar_prefetch=0,
        grid=(b // b_tile,),
        in_specs=[
            pl.BlockSpec((b_tile, D_IN), lambda i: (i, 0)),   # x (streams, bf16)
            fixed((D_IN, c)),                                 # w_enc^T (bf16)
            fixed((1, c)),                                    # b_enc
            fixed((m, c)),                                    # mem_sample
            fixed((c, c)),                                    # wk^T (pre-scaled)
            fixed((1, c)),                                    # bk   (pre-scaled)
            fixed((c, c)),                                    # wp_x^T
            fixed((c, c)),                                    # wp_a^T
            fixed((1, c)),                                    # bp
        ],
        out_specs=pl.BlockSpec((b_tile, c), lambda i: (i, 0)),
    )

    return pl.pallas_call(
        etp_forward_kernel,
        out_shape=jax.ShapeDtypeStruct((b, c), jnp.float32),
        grid_spec=grid_spec,
        compiler_params=pltpu.CompilerParams(
            dimension_semantics=("parallel",)),
    )(
        x_flat,
        params["w_enc_t_bf16"], params["b_enc"],
        mem_sample.astype(jnp.float32),
        params["wk_t_scaled"], params["bk_scaled"],
        params["wp_x_t"], params["wp_a_t"], params["bp"],
    )


# ----------------------------- reference (pure JAX, f32) ----------------------
def etp_forward_ref(x_nchw, params, mem_sample):
    b = x_nchw.shape[0]
    x_flat = x_nchw.reshape(b, -1).astype(jnp.float32)
    x_embed = x_flat @ params["w_enc_t"] + params["b_enc"]
    keys = mem_sample @ params["wk_t"] + params["bk"]
    kq = x_embed @ keys.T / math.sqrt(N_CLASSES)
    weights = jax.nn.softmax(kq, axis=1)
    attention = weights @ mem_sample
    logit = x_embed @ params["wp_x_t"] + attention @ params["wp_a_t"] + params["bp"]
    return jnp.minimum(logit, 15.0)


# ----------------------------- parameter init --------------------------------
def init_params(key):
    ks = jax.random.split(key, 8)
    c = N_CLASSES
    inv_sqrt_c = 1.0 / math.sqrt(c)
    # arch encoder: Linear(D_IN -> C)
    w_enc = jax.random.normal(ks[0], (c, D_IN), jnp.float32) * 0.02
    b_enc = jax.random.normal(ks[1], (1, c), jnp.float32) * 0.02
    # fc1_key: Linear(C -> C)
    wk = jax.random.normal(ks[2], (c, c), jnp.float32) * (1.0 / math.sqrt(c))
    bk = jax.random.normal(ks[3], (1, c), jnp.float32) * 0.02
    # fc1_enc_to_pred: Linear(2C -> C); split weight along input dim
    wp = jax.random.normal(ks[4], (c, 2 * c), jnp.float32) * (1.0 / math.sqrt(2 * c))
    bp = jax.random.normal(ks[5], (1, c), jnp.float32) * 0.02
    # memory: normal(0, 0.01) then squared (as in __init__)
    memory = (jax.random.normal(ks[6], (MEMORY_SIZE, c), jnp.float32) * 0.01) ** 2
    # mem_sample = Normal(memory, memo_variance).rsample()
    noise = jax.random.normal(ks[7], (MEMORY_SIZE, c), jnp.float32)
    mem_sample = memory + MEMO_SCALE * noise

    params = {
        # f32 originals (reference path)
        "w_enc_t": w_enc.T,                           # (D_IN, C)
        "b_enc": b_enc,                               # (1, C)
        "wk_t": wk.T,                                 # (C, C)
        "bk": bk,                                     # (1, C)
        "wp_x_t": wp[:, :c].T,                        # (C, C)  acts on x_embed
        "wp_a_t": wp[:, c:].T,                        # (C, C)  acts on attention
        "bp": bp,                                     # (1, C)
        # kernel-optimized variants
        "w_enc_t_bf16": w_enc.T.astype(jnp.bfloat16),           # bf16 encoder weight
        "wk_t_scaled": (wk.T * inv_sqrt_c).astype(jnp.float32),  # 1/sqrt(C) folded
        "bk_scaled": (bk * inv_sqrt_c).astype(jnp.float32),
    }
    return params, memory, mem_sample


# ----------------------------- main ------------------------------------------
if __name__ == "__main__":
    key = jax.random.PRNGKey(0)
    k_param, k_x = jax.random.split(key)
    params, memory, mem_sample = init_params(k_param)

    x = jax.random.normal(k_x, (BATCH, N_CHANNELS, X_DIM, X_DIM), jnp.float32)

    out = etp_forward(x, params, mem_sample)
    out = jax.block_until_ready(out)

    ref = etp_forward_ref(x, params, mem_sample)
    assert out.shape == (BATCH, N_CLASSES)
    # bf16 encoder matmul + approx reciprocal -> loosened tolerance vs f32 ref.
    assert jnp.allclose(out, ref, atol=5e-2, rtol=5e-2), "mismatch vs reference"

    print("KERNEL_OK")
</pallas_src>

<mosaic_0001>
module attributes {stable_mosaic.version = 11 : i64} {
  func.func @etp_forward_kernel(%arg0: i32, %arg1: memref<128x3072xbf16, #tpu.memory_space<vmem>>, %arg2: memref<3072x10xbf16, #tpu.memory_space<vmem>>, %arg3: memref<1x10xf32, #tpu.memory_space<vmem>>, %arg4: memref<20x10xf32, #tpu.memory_space<vmem>>, %arg5: memref<10x10xf32, #tpu.memory_space<vmem>>, %arg6: memref<1x10xf32, #tpu.memory_space<vmem>>, %arg7: memref<10x10xf32, #tpu.memory_space<vmem>>, %arg8: memref<10x10xf32, #tpu.memory_space<vmem>>, %arg9: memref<1x10xf32, #tpu.memory_space<vmem>>, %arg10: memref<128x10xf32, #tpu.memory_space<vmem>>) attributes {dimension_semantics = [#tpu.dimension_semantics<parallel>], iteration_bounds = array<i64: 2>, scalar_prefetch = 0 : i64, scratch_operands = 0 : i64, tpu.core_type = #tpu.core_type<tc>, window_params = [{transform_indices = @transform_0, window_bounds = array<i64: 128, 3072>}, {pipeline_mode = #tpu.pipeline_mode<synchronous>, transform_indices = @transform_1, window_bounds = array<i64: 3072, 10>}, {pipeline_mode = #tpu.pipeline_mode<synchronous>, transform_indices = @transform_2, window_bounds = array<i64: 1, 10>}, {pipeline_mode = #tpu.pipeline_mode<synchronous>, transform_indices = @transform_3, window_bounds = array<i64: 20, 10>}, {pipeline_mode = #tpu.pipeline_mode<synchronous>, transform_indices = @transform_4, window_bounds = array<i64: 10, 10>}, {pipeline_mode = #tpu.pipeline_mode<synchronous>, transform_indices = @transform_5, window_bounds = array<i64: 1, 10>}, {pipeline_mode = #tpu.pipeline_mode<synchronous>, transform_indices = @transform_6, window_bounds = array<i64: 10, 10>}, {pipeline_mode = #tpu.pipeline_mode<synchronous>, transform_indices = @transform_7, window_bounds = array<i64: 10, 10>}, {pipeline_mode = #tpu.pipeline_mode<synchronous>, transform_indices = @transform_8, window_bounds = array<i64: 1, 10>}, {transform_indices = @transform_9, window_bounds = array<i64: 128, 10>}]} {
    %c0 = arith.constant 0 : index
    %c0_0 = arith.constant 0 : index
    %0 = vector.load %arg1[%c0, %c0_0] : memref<128x3072xbf16, #tpu.memory_space<vmem>>, vector<128x3072xbf16>
    %c0_1 = arith.constant 0 : index
    %c0_2 = arith.constant 0 : index
    %1 = vector.load %arg2[%c0_1, %c0_2] : memref<3072x10xbf16, #tpu.memory_space<vmem>>, vector<3072x10xbf16>
    %cst = arith.constant dense<0.000000e+00> : vector<128x10xf32>
    %2 = tpu.matmul %0, %1, %cst {dimension_numbers = #tpu.dot_dimension_numbers<[1], [0], [0], [1], [0, 0, 1, 1], [], []>} : vector<128x3072xbf16>, vector<3072x10xbf16>, vector<128x10xf32> -> vector<128x10xf32>
    %c0_3 = arith.constant 0 : index
    %c0_4 = arith.constant 0 : index
    %3 = vector.load %arg3[%c0_3, %c0_4] : memref<1x10xf32, #tpu.memory_space<vmem>>, vector<1x10xf32>
    %4 = vector.broadcast %3 : vector<1x10xf32> to vector<128x10xf32>
    %5 = arith.addf %2, %4 : vector<128x10xf32>
    %c0_5 = arith.constant 0 : index
    %c0_6 = arith.constant 0 : index
    %6 = vector.load %arg4[%c0_5, %c0_6] : memref<20x10xf32, #tpu.memory_space<vmem>>, vector<20x10xf32>
    %c0_7 = arith.constant 0 : index
    %c0_8 = arith.constant 0 : index
    %7 = vector.load %arg5[%c0_7, %c0_8] : memref<10x10xf32, #tpu.memory_space<vmem>>, vector<10x10xf32>
    %cst_9 = arith.constant dense<0.000000e+00> : vector<20x10xf32>
    %8 = tpu.matmul %6, %7, %cst_9 {dimension_numbers = #tpu.dot_dimension_numbers<[1], [0], [0], [1], [0, 0, 1, 1], [], []>} : vector<20x10xf32>, vector<10x10xf32>, vector<20x10xf32> -> vector<20x10xf32>
    %c0_10 = arith.constant 0 : index
    %c0_11 = arith.constant 0 : index
    %9 = vector.load %arg6[%c0_10, %c0_11] : memref<1x10xf32, #tpu.memory_space<vmem>>, vector<1x10xf32>
    %10 = vector.broadcast %9 : vector<1x10xf32> to vector<20x10xf32>
    %11 = arith.addf %8, %10 : vector<20x10xf32>
    %cst_12 = arith.constant dense<0.000000e+00> : vector<128x20xf32>
    %12 = tpu.matmul %5, %11, %cst_12 {dimension_numbers = #tpu.dot_dimension_numbers<[1], [1], [0], [0], [0, 0, 1, 0], [], []>} : vector<128x10xf32>, vector<20x10xf32>, vector<128x20xf32> -> vector<128x20xf32>
    %cst_13 = arith.constant dense<0xFF800000> : vector<128xf32>
    %13 = vector.multi_reduction <maximumf>, %12, %cst_13 [1] : vector<128x20xf32> to vector<128xf32>
    %14 = vector.shape_cast %13 : vector<128xf32> to vector<128x1xf32>
    %15 = vector.broadcast %14 : vector<128x1xf32> to vector<128x20xf32>
    %16 = arith.subf %12, %15 : vector<128x20xf32>
    %17 = math.exp %16 : vector<128x20xf32>
    %cst_14 = arith.constant dense<0.000000e+00> : vector<128xf32>
    %18 = vector.multi_reduction <add>, %17, %cst_14 [1] : vector<128x20xf32> to vector<128xf32>
    %19 = vector.shape_cast %18 : vector<128xf32> to vector<128x1xf32>
    %20 = tpu.reciprocal %19 {approx = true} : vector<128x1xf32> -> vector<128x1xf32>
    %21 = vector.broadcast %20 : vector<128x1xf32> to vector<128x20xf32>
    %22 = arith.mulf %17, %21 : vector<128x20xf32>
    %c0_15 = arith.constant 0 : index
    %c0_16 = arith.constant 0 : index
    %23 = vector.load %arg4[%c0_15, %c0_16] : memref<20x10xf32, #tpu.memory_space<vmem>>, vector<20x10xf32>
    %cst_17 = arith.constant dense<0.000000e+00> : vector<128x10xf32>
    %24 = tpu.matmul %22, %23, %cst_17 {dimension_numbers = #tpu.dot_dimension_numbers<[1], [0], [0], [1], [0, 0, 1, 1], [], []>} : vector<128x20xf32>, vector<20x10xf32>, vector<128x10xf32> -> vector<128x10xf32>
    %c0_18 = arith.constant 0 : index
    %c0_19 = arith.constant 0 : index
    %25 = vector.load %arg7[%c0_18, %c0_19] : memref<10x10xf32, #tpu.memory_space<vmem>>, vector<10x10xf32>
    %cst_20 = arith.constant dense<0.000000e+00> : vector<128x10xf32>
    %26 = tpu.matmul %5, %25, %cst_20 {dimension_numbers = #tpu.dot_dimension_numbers<[1], [0], [0], [1], [0, 0, 1, 1], [], []>} : vector<128x10xf32>, vector<10x10xf32>, vector<128x10xf32> -> vector<128x10xf32>
    %c0_21 = arith.constant 0 : index
    %c0_22 = arith.constant 0 : index
    %27 = vector.load %arg8[%c0_21, %c0_22] : memref<10x10xf32, #tpu.memory_space<vmem>>, vector<10x10xf32>
    %cst_23 = arith.constant dense<0.000000e+00> : vector<128x10xf32>
    %28 = tpu.matmul %24, %27, %cst_23 {dimension_numbers = #tpu.dot_dimension_numbers<[1], [0], [0], [1], [0, 0, 1, 1], [], []>} : vector<128x10xf32>, vector<10x10xf32>, vector<128x10xf32> -> vector<128x10xf32>
    %29 = arith.addf %26, %28 : vector<128x10xf32>
    %c0_24 = arith.constant 0 : index
    %c0_25 = arith.constant 0 : index
    %30 = vector.load %arg9[%c0_24, %c0_25] : memref<1x10xf32, #tpu.memory_space<vmem>>, vector<1x10xf32>
    %31 = vector.broadcast %30 : vector<1x10xf32> to vector<128x10xf32>
    %32 = arith.addf %29, %31 : vector<128x10xf32>
    %cst_26 = arith.constant 1.500000e+01 : f32
    %33 = vector.broadcast %cst_26 : f32 to vector<128x10xf32>
    %34 = arith.minimumf %32, %33 : vector<128x10xf32>
    %c0_27 = arith.constant 0 : index
    %c0_28 = arith.constant 0 : index
    %35 = vector.load %arg10[%c0_27, %c0_28] : memref<128x10xf32, #tpu.memory_space<vmem>>, vector<128x10xf32>
    tpu.vector_store %arg10[%c0_27, %c0_28], %34 {strides = array<i32>} : memref<128x10xf32, #tpu.memory_space<vmem>>, vector<128x10xf32>,
    return
  }
  func.func @transform_0(%arg0: i32) -> (i32, i32) {
    %c0_i32 = arith.constant 0 : i32
    %c0_i32_0 = arith.constant 0 : i32
    return %arg0, %c0_i32 : i32, i32
  }
  func.func @transform_1(%arg0: i32) -> (i32, i32) {
    %c0_i32 = arith.constant 0 : i32
    %c0_i32_0 = arith.constant 0 : i32
    %c0_i32_1 = arith.constant 0 : i32
    return %c0_i32, %c0_i32_0 : i32, i32
  }
  func.func @transform_2(%arg0: i32) -> (i32, i32) {
    %c0_i32 = arith.constant 0 : i32
    %c0_i32_0 = arith.constant 0 : i32
    %c0_i32_1 = arith.constant 0 : i32
    return %c0_i32, %c0_i32_0 : i32, i32
  }
  func.func @transform_3(%arg0: i32) -> (i32, i32) {
    %c0_i32 = arith.constant 0 : i32
    %c0_i32_0 = arith.constant 0 : i32
    %c0_i32_1 = arith.constant 0 : i32
    return %c0_i32, %c0_i32_0 : i32, i32
  }
  func.func @transform_4(%arg0: i32) -> (i32, i32) {
    %c0_i32 = arith.constant 0 : i32
    %c0_i32_0 = arith.constant 0 : i32
    %c0_i32_1 = arith.constant 0 : i32
    return %c0_i32, %c0_i32_0 : i32, i32
  }
  func.func @transform_5(%arg0: i32) -> (i32, i32) {
    %c0_i32 = arith.constant 0 : i32
    %c0_i32_0 = arith.constant 0 : i32
    %c0_i32_1 = arith.constant 0 : i32
    return %c0_i32, %c0_i32_0 : i32, i32
  }
  func.func @transform_6(%arg0: i32) -> (i32, i32) {
    %c0_i32 = arith.constant 0 : i32
    %c0_i32_0 = arith.constant 0 : i32
    %c0_i32_1 = arith.constant 0 : i32
    return %c0_i32, %c0_i32_0 : i32, i32
  }
  func.func @transform_7(%arg0: i32) -> (i32, i32) {
    %c0_i32 = arith.constant 0 : i32
    %c0_i32_0 = arith.constant 0 : i32
    %c0_i32_1 = arith.constant 0 : i32
    return %c0_i32, %c0_i32_0 : i32, i32
  }
  func.func @transform_8(%arg0: i32) -> (i32, i32) {
    %c0_i32 = arith.constant 0 : i32
    %c0_i32_0 = arith.constant 0 : i32
    %c0_i32_1 = arith.constant 0 : i32
    return %c0_i32, %c0_i32_0 : i32, i32
  }
  func.func @transform_9(%arg0: i32) -> (i32, i32) {
    %c0_i32 = arith.constant 0 : i32
    %c0_i32_0 = arith.constant 0 : i32
    return %arg0, %c0_i32 : i32, i32
  }
}

</mosaic_0001>

<bundles_post_ra>
// kernel: tpu_custom_call.1
= control target key start
LH: loop header
LB: loop body
LE: loop exit
PB: predicated region body
PF: predicated region fallthrough
CT: control target
= control target key end

     0   :  { %14 = vsyncpa [#allocation3], 0  ;;  %s9414_s0 = inlined_call_operand.hbm [shape: bf16[256,3072], index: 0, kind: input, shape index: {}]   ;;  %s9415_s1 = inlined_call_operand.vmem [shape: bf16[3072,10], index: 1, kind: input, shape index: {}]   ;;  %s9416_s2 = inlined_call_operand.hbm [shape: f32[1,10], index: 2, kind: input, shape index: {}]   ;;  %s9417_s3 = inlined_call_operand.vmem [shape: f32[20,10], index: 3, kind: input, shape index: {}]   ;;  %s9418_s4 = inlined_call_operand.hbm [shape: f32[10,10], index: 4, kind: input, shape index: {}]   ;;  %s9419_s5 = inlined_call_operand.hbm [shape: f32[1,10], index: 5, kind: input, shape index: {}]   ;;  %s9420_s6 = inlined_call_operand.hbm [shape: f32[10,10], index: 6, kind: input, shape index: {}]   ;;  %s9421_s7 = inlined_call_operand.hbm [shape: f32[10,10], index: 7, kind: input, shape index: {}]   ;;  %s9422_s8 = inlined_call_operand.hbm [shape: f32[1,10], index: 8, kind: input, shape index: {}]   ;;  %s9423_s9 = inlined_call_operand.vmem [shape: f32[256,10], index: 9, kind: output, shape index: {}]  }
   0x1   :  { %16 = vsyncpa [#allocation3 + $0x1], 0 }
   0x2   :  { %17 = vsyncpa [#allocation5], 0 }
   0x3   :  { %18 = vsyncpa [#allocation8], 0 }
   0x4   :  { %19 = vsyncpa [#allocation11], 0  ;;  %s7635_s30 = smov 0   ;;  %s7637_s10 = smov 0  }
   0x5   :  { %s7639_s11 = smov 0   ;;  %s7641_s12 = smov 0  }
   0x6 LB: > { %s7572_s13 = smov [#allocation4]   ;;  %s9427_s15 = sadd.s32 4294967295, %s7570_s12   ;;  %s7570_s12 = sphi %s7641_s12, %s9446_s12   ;;  %s7566_s11 = sphi %s7639_s11, %s9445_s11   ;;  %s7562_s10 = sphi %s7637_s10, %s9444_s10   ;;  %s7558_s30 = sphi %s7635_s30, %s9443_s30  }
   0x7   : > { %s266_s14 = sshll.u32 %s7572_s13, 4  ;;  %p5507_p0 = scmp.ge.s32.totalorder %s7570_s12, 1  ;;  %s267_s14 = int_to_ptr.vmem [resolvable:$true] %s266_s14 }
   0x8   : > { %p7659_p1 = scmp.eq.s32.totalorder %s9427_s15, 0  ;;  %p250_p2 = scmp.lt.s32.totalorder %s7570_s12, 3 }
   0x9   : > { %s7573_s18 = smov [#allocation7]   ;;  %s7574_s21 = smov [#allocation10]  }
   0xa   : > { %s9430_s16 = scalar_select %p7659_p1, 1, 0 }
   0xb   : > { %p7664_p3 = pnand %p5507_p0, %p250_p2  ;;  %s293_s19 = sshll.u32 %s7573_s18, 4  ;;  %s294_s19 = int_to_ptr.vmem [resolvable:$true] %s293_s19 }
   0xc   : > { %s316_s22 = sshll.u32 %s7574_s21, 4  ;;  %s7351_s24 = scalar_lea.vmem %s267_s14, 16  ;;  %s7676_s22 = int_to_ptr.vmem [resolvable:$true] %s316_s22 }
   0xd   : > { %s9431_s17 = scalar_select %p7664_p3, 1, 0 }
   0xe   : > { %p7001_p4 = pneg %p7664_p3  ;;  %p7352_p7 = scmp.ne.s32.totalorder %s267_s14, %s7351_s24 }
   0xf   : > { %s7358_s25 = scalar_lea.vmem %s267_s14, 32  ;;  %p7359_p10 = scmp.lt.s32.totalorder %s267_s14, %s267_s14 }
  0x10   : > { %p7672_p5 = pnand %p7001_p4, %p7659_p1  ;;  %p7360_p11 = scmp.lt.s32.totalorder %s7358_s25, %s7351_s24 }
  0x12   : > { %p7680_p6 = pneg %p7672_p5  ;;  %p7361_p12 = por %p7360_p11, %p7359_p10 }
  0x14   : > { %p7354_p8 = pnand %p7352_p7, %p7680_p6 }
  0x16   : > { %p7355_p9 = pneg %p7354_p8 }
  0x18   : > { %p7362_p13 = pnand %p7361_p12, %p7355_p9 }
  0x1a   : > { %7365 = shalt.err (!%p7362_p13)
}
  0x1b   : > { %7004 = dma.hbm_to_vmem [thread:$0]  (!%p7672_p5), %s9416_s2, 16, %s267_s14, [#allocation5]  }
  0x1c   : > { %s7377_s28 = scalar_lea.vmem %s294_s19, 16  ;;  %s7384_s29 = scalar_lea.vmem %s294_s19, 32 }
  0x1d   : > { %p7378_p0 = scmp.ne.s32.totalorder %s294_s19, %s7377_s28  ;;  %p7385_p7 = scmp.lt.s32.totalorder %s294_s19, %s294_s19 }
  0x1e   : > { %p7386_p8 = scmp.lt.s32.totalorder %s7384_s29, %s7377_s28 }
  0x1f   : > { %p7380_p2 = pnand %p7378_p0, %p7680_p6 }
  0x20   : > { %p7387_p3 = por %p7386_p8, %p7385_p7 }
  0x21   : > { %p7381_p4 = pneg %p7380_p2 }
  0x23   : > { %p7388_p1 = pnand %p7387_p3, %p7381_p4 }
  0x25   : > { %7391 = shalt.err (!%p7388_p1)
}
  0x26   : > { %7010 = dma.hbm_to_vmem [thread:$0]  (!%p7672_p5), %s9419_s5, 16, %s294_s19, [#allocation8]  }
  0x27   : > { %s7403_s14 = scalar_lea.vmem %s7676_s22, 256  ;;  %p7411_p12 = scmp.lt.s32.totalorder %s7676_s22, %s7676_s22 }
  0x28   : > { %p7404_p9 = scmp.ne.s32.totalorder %s7676_s22, %s7403_s14  ;;  %p7412_p13 = scmp.lt.s32.totalorder %s7403_s14, %s7403_s14 }
  0x2a   : > { %p7406_p10 = pnand %p7404_p9, %p7680_p6  ;;  %p7413_p3 = por %p7412_p13, %p7411_p12 }
  0x2c   : > { %p7407_p11 = pneg %p7406_p10 }
  0x2e   : > { %p7414_p1 = pnand %p7413_p3, %p7407_p11 }
  0x30   : > { %7417 = shalt.err (!%p7414_p1)
}
  0x31   : > { %s7575_s21 = smov 128   ;;  %s7576_s24 = smov 8  }
  0x32   : > { %7016 = dma.hbm_to_vmem [thread:$0]  (!%p7672_p5), %s9421_s7, 256, %s7676_s22, [#allocation11], %s7575_s21, %s7575_s21, %s7576_s24  }
  0x33   : > { %s7577_s26 = smov [#allocation6]   ;;  %s7578_s28 = smov [#allocation9]  }
  0x34   : > { %s279_s27 = sshll.u32 %s7577_s26, 4  ;;  %s303_s29 = sshll.u32 %s7578_s28, 4  ;;  %s280_s27 = int_to_ptr.vmem [resolvable:$true] %s279_s27  ;;  %s304_s29 = int_to_ptr.vmem [resolvable:$true] %s303_s29 }
  0x35   : > { %s7429_s13 = scalar_lea.vmem %s280_s27, 256  ;;  %p7437_p7 = scmp.lt.s32.totalorder %s280_s27, %s280_s27 }
  0x36   : > { %p7430_p0 = scmp.ne.s32.totalorder %s280_s27, %s7429_s13  ;;  %p7438_p8 = scmp.lt.s32.totalorder %s7429_s13, %s7429_s13 }
  0x38   : > { %p7432_p2 = pnand %p7430_p0, %p7680_p6  ;;  %p7439_p9 = por %p7438_p8, %p7437_p7 }
  0x3a   : > { %p7433_p4 = pneg %p7432_p2 }
  0x3c   : > { %p7440_p10 = pnand %p7439_p9, %p7433_p4 }
  0x3e   : > { %7443 = shalt.err (!%p7440_p10)
}
  0x3f   : > { %7007 = dma.hbm_to_vmem [thread:$0]  (!%p7672_p5), %s9418_s4, 256, %s280_s27, [#allocation5], %s7575_s21, %s7575_s21, %s7576_s24  }
  0x40   : > { %s7455_s14 = scalar_lea.vmem %s304_s29, 256  ;;  %p7463_p3 = scmp.lt.s32.totalorder %s304_s29, %s304_s29 }
  0x41   : > { %p7456_p11 = scmp.ne.s32.totalorder %s304_s29, %s7455_s14  ;;  %p7464_p1 = scmp.lt.s32.totalorder %s7455_s14, %s7455_s14 }
  0x43   : > { %p7458_p12 = pnand %p7456_p11, %p7680_p6  ;;  %p7465_p0 = por %p7464_p1, %p7463_p3 }
  0x45   : > { %p7459_p13 = pneg %p7458_p12 }
  0x47   : > { %p7466_p2 = pnand %p7465_p0, %p7459_p13 }
  0x49   : > { %7469 = shalt.err (!%p7466_p2)
}
  0x4a   : > { %7013 = dma.hbm_to_vmem [thread:$0]  (!%p7672_p5), %s9420_s6, 256, %s304_s29, [#allocation8], %s7575_s21, %s7575_s21, %s7576_s24  }
  0x4b   : > { %s7579_s26 = smov [#allocation12]  }
  0x4c   : > { %s330_s27 = sshll.u32 %s7579_s26, 4  ;;  %s331_s27 = int_to_ptr.vmem [resolvable:$true] %s330_s27 }
  0x4d   : > { %s7481_s28 = scalar_lea.vmem %s331_s27, 16  ;;  %s7488_s13 = scalar_lea.vmem %s331_s27, 32 }
  0x4e   : > { %p7482_p4 = scmp.ne.s32.totalorder %s331_s27, %s7481_s28  ;;  %p7489_p9 = scmp.lt.s32.totalorder %s331_s27, %s331_s27 }
  0x4f   : > { %p7490_p10 = scmp.lt.s32.totalorder %s7488_s13, %s7481_s28 }
  0x50   : > { %p7484_p7 = pnand %p7482_p4, %p7680_p6 }
  0x51   : > { %p7491_p11 = por %p7490_p10, %p7489_p9 }
  0x52   : > { %p7485_p8 = pneg %p7484_p7 }
  0x54   : > { %p7492_p12 = pnand %p7491_p11, %p7485_p8 }
  0x56   : > { %7495 = shalt.err (!%p7492_p12)
}
  0x57   : > { %7019 = dma.hbm_to_vmem [thread:$0]  (!%p7672_p5), %s9422_s8, 16, %s331_s27, [#allocation11]  }
  0x58   : > { %s7741_s23 = sadd.s32 1, %s7570_s12   ;;  %s32_s20 = sadd.s32 1, %s7566_s11 }
  0x59   : > { %s29_s21 = ssub.s32 %s7570_s12, %s7741_s23  ;;  %p39_p6 = scmp.ne.s32.totalorder %s7566_s11, %s7562_s10 }
  0x5a   : > { %p30_p13 = scmp.eq.s32.totalorder %s29_s21, 0  ;;  %p40_p3 = scmp.eq.s32.totalorder %s7570_s12, 0 }
  0x5b   : > { %p45_p1 = scmp.ne.s32.totalorder %s7562_s10, %s7558_s30  ;;  %p7030_p0 = scmp.lt.s32.totalorder %s7570_s12, 2 }
  0x5c   : > { %s7753_s24 = scalar_select %p30_p13, %s7566_s11, %s32_s20  }
  0x5d   : > { %p41_p2 = por %p40_p3, %p39_p6  ;;  %p9434_p4 = scmp.ne.s32.totalorder %s9430_s16, 0 }
  0x5e   : > { %s341_s14 = sand.u32 1, %s7566_s11   ;;  %s6973_s19 = smul.u32 24576, %s7570_s12 }
  0x5f   : > { %p7757_p7 = por %p9434_p4, %p45_p1  ;;  %s6972_s25 = smul.u32 1536, %s341_s14 }
  0x60   : > { %s7766_s28 = scalar_lea.hbm %s9414_s0, %s6973_s19  ;;  %p7768_p5 = pnand %p7030_p0, %p41_p2 }
  0x61   : > { %s9435_s29 = scalar_select %p7757_p7, 1, 0 }
  0x62   : > { %s345_s13 = scalar_lea.vmem [#allocation2], %s6972_s25  ;;  %s7774_s18 = scalar_lea.sflag [#allocation3], %s341_s14 }
  0x63   : > { %s353_s22 = sshll.u32 %s345_s13, 4  ;;  %s7496_s20 = scalar_lea.hbm %s7766_s28, 24576  ;;  %s7772_s22 = int_to_ptr.vmem [resolvable:$true] %s353_s22 }
  0x64   : > { %p7497_p8 = scmp.ne.s32.totalorder %s7766_s28, %s7496_s20  ;;  %p7498_p9 = pneg %p7768_p5 }
  0x65   : > { %s7501_s26 = scalar_lea.hbm %s9414_s0, 49152  ;;  %p7502_p12 = scmp.lt.s32.totalorder %s7766_s28, %s9414_s0 }
  0x66   : > { %p7499_p10 = pnand %p7498_p9, %p7497_p8  ;;  %p7503_p6 = scmp.lt.s32.totalorder %s7501_s26, %s7496_s20 }
  0x68   : > { %p7500_p11 = pneg %p7499_p10  ;;  %p7504_p13 = por %p7503_p6, %p7502_p12 }
  0x6a   : > { %p7505_p3 = pnand %p7504_p13, %p7500_p11 }
  0x6c   : > { %7508 = shalt.err (!%p7505_p3)
}
  0x6d   : > { %s7509_s14 = scalar_lea.vmem %s7772_s22, 24576  ;;  %s7580_s25 = smov [#allocation2]  }
  0x6e   : > { %p7510_p1 = scmp.ne.s32.totalorder %s7772_s22, %s7509_s14  ;;  %s7514_s13 = sshll.u32 %s7580_s25, 4  ;;  %s7515_s13 = int_to_ptr.vmem [resolvable:$false] %s7514_s13 }
  0x6f   : > { %s7516_s21 = scalar_lea.vmem %s7515_s13, 49152  ;;  %p7517_p4 = scmp.lt.s32.totalorder %s7772_s22, %s7515_s13 }
  0x70   : > { %p7512_p0 = pnand %p7510_p1, %p7498_p9  ;;  %p7518_p8 = scmp.lt.s32.totalorder %s7516_s21, %s7509_s14 }
  0x72   : > { %p7513_p2 = pneg %p7512_p0  ;;  %p7519_p10 = por %p7518_p8, %p7517_p4 }
  0x74   : > { %p7520_p7 = pnand %p7519_p10, %p7513_p2 }
  0x76   : > { %7523 = shalt.err (!%p7520_p7)
}
  0x77   : > { %s7581_s15 = smov 1536   ;;  %s7582_s20 = smov 96  }
  0x78   : > { %7023 = dma.hbm_to_vmem [thread:$0]  (!%p7768_p5), %s7766_s28, 24576, %s7772_s22, %s7774_s18, %s7581_s15, %s7581_s15, %s7582_s20  }
  0x79   : > { %p9437_p9 = scmp.ne.s32.totalorder %s9431_s17, 0 }
  0x7b   : > { %365 = sbr.rel (%p9437_p9) target bundleno = 1709 (0x6ad), region = 56 }
  0x80   : > { %s367_s19 = sand.u32 1, %s7562_s10   ;;  %p9438_p11 = scmp.ne.s32.totalorder %s9435_s29, 0 }
  0x81   : > { %s6974_s26 = smul.u32 1536, %s367_s19  ;;  %s368_s27 = scalar_lea.sflag [#allocation3], %s367_s19 }
  0x83   : > { %s7798_s14 = scalar_lea.vmem [#allocation2], %s6974_s26 }
  0x84   : > { %7541 = dma.done.wait (%p9438_p11), %s368_s27, 24576  }
  0x85   : > { %7543 = vsyncadd (%p9438_p11), %s368_s27, 4294942720  ;;  %p9439_p7 = scmp.ne.s32.totalorder %s9430_s16, 0 }
  0x87   : > { %7545 = dma.done.wait (%p9439_p7), [#allocation5], 272  }
  0x88   : > { %7547 = vsyncadd (%p9439_p7), [#allocation5], 4294967024 }
  0x89   : > { %7549 = dma.done.wait (%p9439_p7), [#allocation8], 272  }
  0x8a   : > { %7551 = vsyncadd (%p9439_p7), [#allocation8], 4294967024 }
  0x8b   : > { %7553 = dma.done.wait (%p9439_p7), [#allocation11], 272  }
  0x8c   : > { %7555 = vsyncadd (%p9439_p7), [#allocation11], 4294967024  ;;  %v7081_v0 = vld [vmem:[%s9415_s1 + $0x78] sm:$0xff]   ;;  %v7085_v4 = vld [vmem:[%s9415_s1 + $0x70] sm:$0xff]   ;;  %vm4319_vm0 = vcmask 1041408   ;;  %vm7584_vm1 = vmmov 0  }
  0x8d   : > { %v7082_v1 = vld [vmem:[%s9415_s1 + $0x38] sm:$0xff]   ;;  %5990 = vmatprep.subr.bf16.mxu0 %v7081_v0  ;;  %v7086_v5 = vld [vmem:[%s9415_s1 + $0x30] sm:$0xff]   ;;  %v7089_v8 = vld [vmem:[%s9415_s1 + $0x68] sm:$0xff]   ;;  %vm4309_vm2 = vcmask 80896   ;;  %vm4605_vm3 = vcmask 162816   ;;  %vm4830_vm4 = vcmask 1043456  }
  0x8e   : > { %v7083_v2 = vld [vmem:[%s9415_s1 + $0xf8] sm:$0xff]   ;;  %5991 = vmatpush3.bf16.msra.mxu0 %v7082_v1  ;;  %v7087_v6 = vld [vmem:[%s9415_s1 + $0xf0] sm:$0xff]   ;;  %v7090_v9 = vld [vmem:[%s9415_s1 + $0x28] sm:$0xff]   ;;  %s9442_s18 = sadd.s32 4294967295, %s7570_s12  }
  0x8f   : > { %v7084_v3 = vld [vmem:[%s9415_s1 + $0xb8] sm:$0xff]   ;;  %6054 = vmatprep.subr.bf16.mxu1 %v7083_v2  ;;  %5992 = vmatprep.subr.bf16.mxu0 %v7085_v4  ;;  %v7088_v7 = vld [vmem:[%s9415_s1 + $0xb0] sm:$0xff]   ;;  %v7091_v10 = vld [vmem:[%s9415_s1 + $0xe8] sm:$0xff]   ;;  %s5525_s25 = sshll.u32 %s9442_s18, 4 }
  0x90   : > { %6055 = vmatpush3.bf16.msra.mxu1 %v7084_v3  ;;  %v7092_v11 = vld [vmem:[%s9415_s1 + $0xa8] sm:$0xff]   ;;  %v7093_v12 = vld [vmem:[%s9415_s1 + $0x60] sm:$0xff]   ;;  %v7097_v16 = vld [vmem:[%s9415_s1 + $0x58] sm:$0xff]   ;;  %p432_p5 = scmp.lt.s32.totalorder %s5525_s25, 31 }
  0x91   : > { %6056 = vmatprep.subr.bf16.mxu1 %v7087_v6  ;;  %v7094_v13 = vld [vmem:[%s9415_s1 + $0x20] sm:$0xff]   ;;  %v7098_v17 = vld [vmem:[%s9415_s1 + $0x18] sm:$0xff]   ;;  %v7101_v20 = vld [vmem:[%s9415_s1 + $0x50] sm:$0xff]  }
  0x92   : > { %5993 = vmatpush3.bf16.msra.mxu0 %v7086_v5  ;;  %v7095_v14 = vld [vmem:[%s9415_s1 + $0xe0] sm:$0xff]   ;;  %v7099_v18 = vld [vmem:[%s9415_s1 + $0xd8] sm:$0xff]   ;;  %v7102_v21 = vld [vmem:[%s9415_s1 + $0x10] sm:$0xff]   ;;  %s9448_s25 = smov (!%p432_p5, %s5525_s25), 31 }
  0x93   : > { %5994 = vmatprep.subr.bf16.mxu0 %v7089_v8  ;;  %v7096_v15 = vld [vmem:[%s9415_s1 + $0xa0] sm:$0xff]   ;;  %v7100_v19 = vld [vmem:[%s9415_s1 + $0x98] sm:$0xff]   ;;  %v7103_v22 = vld [vmem:[%s9415_s1 + $0xd0] sm:$0xff]   ;;  %s5526_s13 = sshll.u32 %s9448_s25, 3 }
  0x94   : > { %6057 = vmatpush3.bf16.msra.mxu1 %v7088_v7  ;;  %v7104_v23 = vld [vmem:[%s9415_s1 + $0x90] sm:$0xff]   ;;  %v7105_v24 = vld [vmem:[%s9415_s1 + $0x48] sm:$0xff]   ;;  %v7109_v28 = vld [vmem:[%s9415_s1 + $0x40] sm:$0xff]   ;;  %s9352_s21 = scalar_lea.vmem %s9423_s9, %s5526_s13 }
  0x95   : > { %6058 = vmatprep.subr.bf16.mxu1 %v7091_v10  ;;  %v7106_v25 = vld [vmem:[%s9415_s1 + $0x8] sm:$0xff]   ;;  %v7110_v29 = vld [vmem:[%s9415_s1] sm:$0xff]   ;;  %v7113_v48 = vld [vmem:[%s9415_s1 + $0x178] sm:$0xff]  }
  0x96   : > { %5995 = vmatpush3.bf16.msra.mxu0 %v7090_v9  ;;  %v7107_v26 = vld [vmem:[%s9415_s1 + $0xc8] sm:$0xff]   ;;  %v7111_v30 = vld [vmem:[%s9415_s1 + $0xc0] sm:$0xff]   ;;  %v7114_v53 = vld [vmem:[%s9415_s1 + $0x138] sm:$0xff]  }
  0x97   : > { %5996 = vmatprep.subr.bf16.mxu0 %v7093_v12  ;;  %v7108_v27 = vld [vmem:[%s9415_s1 + $0x88] sm:$0xff]   ;;  %v438_v31 = vld [vmem:[%s7798_s14] sm:$0xff]  ;;  %v7115_v55 = vld [vmem:[%s9415_s1 + $0x1f8] sm:$0xff]  }
  0x98   : > { %6059 = vmatpush3.bf16.msra.mxu1 %v7092_v11  ;;  %v450_v32 = vld [vmem:[%s7798_s14 + $0x60] sm:$0xff]  ;;  %v439_v36 = vld [vmem:[%s7798_s14 + $0x8] sm:$0xff]  ;;  %v7116_v57 = vld [vmem:[%s9415_s1 + $0x1b8] sm:$0xff]  }
  0x99   : > { %6060 = vmatprep.subr.bf16.mxu1 %v7095_v14  ;;  %v5528_v33 = vcombine.low %v438_v31, %v450_v32  ;;  %v5529_v34 = vcombine.high %v438_v31, %v450_v32  ;;  %v7112_v35 = vld [vmem:[%s9415_s1 + $0x80] sm:$0xff]   ;;  %v451_v37 = vld [vmem:[%s7798_s14 + $0x68] sm:$0xff]  ;;  %v7117_v60 = vld [vmem:[%s9415_s1 + $0x170] sm:$0xff]  }
  0x9a   : > { %5997 = vmatpush3.bf16.msra.mxu0 %v7094_v13  ;;  %v462_v38 = vld [vmem:[%s7798_s14 + $0xc0] sm:$0xff]  ;;  %v5530_v40 = vcombine.low %v439_v36, %v451_v37  ;;  %v5531_v41 = vcombine.high %v439_v36, %v451_v37  ;;  %v463_v43 = vld [vmem:[%s7798_s14 + $0xc8] sm:$0xff]  ;;  %v7118_v61 = vld [vmem:[%s9415_s1 + $0x130] sm:$0xff]  }
  0x9b   : > { %5998 = vmatprep.subr.bf16.mxu0 %v7097_v16  ;;  %v474_v39 = vld [vmem:[%s7798_s14 + $0x120] sm:$0xff]  ;;  %3165 = vmatprep.mubr.bf16.mxu0 %v5529_v34  ;;  %v475_v44 = vld [vmem:[%s7798_s14 + $0x128] sm:$0xff]  ;;  %v7119_v63 = vld [vmem:[%s9415_s1 + $0x1f0] sm:$0xff]  }
  0x9c   : > { %6061 = vmatpush3.bf16.msra.mxu1 %v7096_v15  ;;  %v5553_v42 = vcombine.high %v462_v38, %v474_v39  ;;  %v5555_v45 = vcombine.high %v463_v43, %v475_v44  ;;  %3262 = vmatprep.mubr.bf16.mxu1 %v5531_v41  ;;  %v486_v46 = vld [vmem:[%s7798_s14 + $0x180] sm:$0xff]  ;;  %v5552_v49 = vcombine.low %v462_v38, %v474_v39  ;;  %v487_v50 = vld [vmem:[%s7798_s14 + $0x188] sm:$0xff]  ;;  %v7120_v2 = vld [vmem:[%s9415_s1 + $0x1b0] sm:$0xff]  }
  0x9d   : > { %6062 = vmatprep.subr.bf16.mxu1 %v7099_v18  ;;  %v498_v47 = vld [vmem:[%s7798_s14 + $0x1e0] sm:$0xff]  ;;  %v499_v51 = vld [vmem:[%s7798_s14 + $0x1e8] sm:$0xff]  ;;  %v5554_v54 = vcombine.low %v463_v43, %v475_v44  ;;  %v7134_v32 = vld [vmem:[%s9415_s1 + $0x110] sm:$0xff]  }
  0x9e   : > { %5999 = vmatpush3.bf16.msra.mxu0 %v7098_v17  ;;  %v5577_v52 = vcombine.high %v486_v46, %v498_v47  ;;  %v5579_v56 = vcombine.high %v487_v50, %v499_v51  ;;  %v510_v58 = vld [vmem:[%s7798_s14 + $0x240] sm:$0xff]  ;;  %v511_v62 = vld [vmem:[%s7798_s14 + $0x248] sm:$0xff]  ;;  %v5576_v1 = vcombine.low %v486_v46, %v498_v47  ;;  %v5578_v5 = vcombine.low %v487_v50, %v499_v51  ;;  %v7135_v34 = vld [vmem:[%s9415_s1 + $0x1d0] sm:$0xff]  }
  0x9f   : > { %6000 = vmatprep.subr.bf16.mxu0 %v7101_v20  ;;  %v522_v59 = vld [vmem:[%s7798_s14 + $0x2a0] sm:$0xff]  ;;  %v523_v0 = vld [vmem:[%s7798_s14 + $0x2a8] sm:$0xff]  ;;  %v7136_v36 = vld [vmem:[%s9415_s1 + $0x190] sm:$0xff]  }
  0xa0   : > { %6063 = vmatpush3.bf16.msra.mxu1 %v7100_v19  ;;  %v5601_v3 = vcombine.high %v510_v58, %v522_v59  ;;  %v7121_v4 = vld [vmem:[%s9415_s1 + $0x168] sm:$0xff]   ;;  %v5603_v7 = vcombine.high %v511_v62, %v523_v0  ;;  %v534_v9 = vld [vmem:[%s7798_s14 + $0x300] sm:$0xff]  ;;  %v5600_v15 = vcombine.low %v510_v58, %v522_v59  ;;  %v5602_v20 = vcombine.low %v511_v62, %v523_v0  ;;  %v7147_v0 = vld [vmem:[%s9415_s1 + $0x2f8] sm:$0xff]  }
  0xa1   : > { %6064 = vmatprep.subr.bf16.mxu1 %v7103_v22  ;;  %v7122_v6 = vld [vmem:[%s9415_s1 + $0x128] sm:$0xff]   ;;  %v546_v10 = vld [vmem:[%s7798_s14 + $0x360] sm:$0xff] }
  0xa2   : > { %6001 = vmatpush3.bf16.msra.mxu0 %v7102_v21  ;;  %v7123_v8 = vld [vmem:[%s9415_s1 + $0x1e8] sm:$0xff]   ;;  %v7125_v12 = vld [vmem:[%s9415_s1 + $0x160] sm:$0xff]   ;;  %v5625_v18 = vcombine.high %v534_v9, %v546_v10  ;;  %v7129_v21 = vld [vmem:[%s9415_s1 + $0x158] sm:$0xff]   ;;  %v5624_v31 = vcombine.low %v534_v9, %v546_v10 }
  0xa3   : > { %6002 = vmatprep.subr.bf16.mxu0 %v7105_v24  ;;  %v7124_v11 = vld [vmem:[%s9415_s1 + $0x1a8] sm:$0xff]   ;;  %v7126_v13 = vld [vmem:[%s9415_s1 + $0x120] sm:$0xff]   ;;  %v476_v9 = vld [vmem:[%s7798_s14 + $0x130] sm:$0xff] }
  0xa4   : > { %6065 = vmatpush3.bf16.msra.mxu1 %v7104_v23  ;;  %v7127_v14 = vld [vmem:[%s9415_s1 + $0x1e0] sm:$0xff]   ;;  %v535_v16 = vld [vmem:[%s7798_s14 + $0x308] sm:$0xff]  ;;  %v465_v10 = vld [vmem:[%s7798_s14 + $0xd8] sm:$0xff] }
  0xa5   : > { %6066 = vmatprep.subr.bf16.mxu1 %v7107_v26  ;;  %v547_v17 = vld [vmem:[%s7798_s14 + $0x368] sm:$0xff]  ;;  %v7128_v19 = vld [vmem:[%s9415_s1 + $0x1a0] sm:$0xff]   ;;  %v7131_v26 = vld [vmem:[%s9415_s1 + $0x1d8] sm:$0xff]  }
  0xa6   : > { %6003 = vmatpush3.bf16.msra.mxu0 %v7106_v25  ;;  %v5627_v22 = vcombine.high %v535_v16, %v547_v17  ;;  %v558_v23 = vld [vmem:[%s7798_s14 + $0x3c0] sm:$0xff]  ;;  %v7130_v25 = vld [vmem:[%s9415_s1 + $0x118] sm:$0xff]   ;;  %v7137_v38 = vld [vmem:[%s9415_s1 + $0x148] sm:$0xff]  }
  0xa7   : > { %6004 = vmatprep.subr.bf16.mxu0 %v7109_v28  ;;  %v570_v24 = vld [vmem:[%s7798_s14 + $0x420] sm:$0xff]  ;;  %v571_v28 = vld [vmem:[%s7798_s14 + $0x428] sm:$0xff] }
  0xa8   : > { %6067 = vmatpush3.bf16.msra.mxu1 %v7108_v27  ;;  %v559_v27 = vld [vmem:[%s7798_s14 + $0x3c8] sm:$0xff]  ;;  %v582_v39 = vld [vmem:[%s7798_s14 + $0x480] sm:$0xff]  ;;  %v5648_v46 = vcombine.low %v558_v23, %v570_v24 }
  0xa9   : > { %6068 = vmatprep.subr.bf16.mxu1 %v7111_v30  ;;  %v7133_v30 = vld [vmem:[%s9415_s1 + $0x150] sm:$0xff]   ;;  %v5651_v37 = vcombine.high %v559_v27, %v571_v28  ;;  %v7138_v41 = vld [vmem:[%s9415_s1 + $0x108] sm:$0xff]   ;;  %v7141_v47 = vld [vmem:[%s9415_s1 + $0x140] sm:$0xff]   ;;  %v5650_v50 = vcombine.low %v559_v27, %v571_v28 }
  0xaa   : > { %6005 = vmatpush3.bf16.msra.mxu0 %v7110_v29  ;;  %v7132_v29 = vld [vmem:[%s9415_s1 + $0x198] sm:$0xff]   ;;  %v595_v43 = vld [vmem:[%s7798_s14 + $0x4e8] sm:$0xff]  ;;  %v7143_v51 = vld [vmem:[%s9415_s1 + $0x1c0] sm:$0xff]  }
  0xab   : > { %6118 = vmatprep.subr.bf16.mxu0 %v7113_v48  ;;  %v7139_v44 = vld [vmem:[%s9415_s1 + $0x1c8] sm:$0xff]  }
  0xac   : > { %6069 = vmatpush3.bf16.msra.mxu1 %v7112_v35  ;;  %v5626_v35 = vcombine.low %v535_v16, %v547_v17  ;;  %v619_v58 = vld [vmem:[%s7798_s14 + $0x5a8] sm:$0xff]  ;;  %v7149_v16 = vld [vmem:[%s9415_s1 + $0x270] sm:$0xff]  }
  0xad   : > { %3166 = vmatmul.mubr.bf16.vlgmr.msra.gmra.mxu0 %v5528_v33  ;;  %6182 = vmatprep.subr.bf16.mxu1 %v7115_v55  ;;  %v5649_v33 = vcombine.high %v558_v23, %v570_v24  ;;  %v618_v55 = vld [vmem:[%s7798_s14 + $0x5a0] sm:$0xff]  ;;  %v489_v23 = vld [vmem:[%s7798_s14 + $0x198] sm:$0xff]  ;;  %v7155_v28 = vld [vmem:[%s9415_s1 + $0x2e8] sm:$0xff]  }
  0xae   : > { %3173 = vmatprep.mubr.bf16.mxu0 %v5553_v42  ;;  %6119 = vmatpush3.bf16.msra.mxu0 %v7114_v53  ;;  %v583_v42 = vld [vmem:[%s7798_s14 + $0x488] sm:$0xff]  ;;  %v7144_v53 = vld [vmem:[%s9415_s1 + $0x180] sm:$0xff]   ;;  %v501_v24 = vld [vmem:[%s7798_s14 + $0x1f8] sm:$0xff] }
  0xaf   : > { %3263 = vmatmul.mubr.bf16.vlgmr.msra.gmra.mxu1 %v5530_v40  ;;  %6120 = vmatprep.subr.bf16.mxu0 %v7117_v60  ;;  %v594_v40 = vld [vmem:[%s7798_s14 + $0x4e0] sm:$0xff]  ;;  %v5674_v60 = vcombine.low %v583_v42, %v595_v43 }
  0xb0   : > { %3270 = vmatprep.mubr.bf16.mxu1 %v5555_v45  ;;  %6183 = vmatpush3.bf16.msra.mxu1 %v7116_v57  ;;  %v7140_v45 = vld [vmem:[%s9415_s1 + $0x188] sm:$0xff]   ;;  %v5673_v48 = vcombine.high %v582_v39, %v594_v40 }
  0xb1   : > { %6184 = vmatprep.subr.bf16.mxu1 %v7119_v63  ;;  %v607_v57 = vld [vmem:[%s7798_s14 + $0x548] sm:$0xff]  ;;  %v440_v63 = vld [vmem:[%s7798_s14 + $0x10] sm:$0xff] }
  0xb2   : > { %6121 = vmatpush3.bf16.msra.mxu0 %v7118_v61  ;;  %v7145_v61 = vld [vmem:[%s9415_s1 + $0x278] sm:$0xff]   ;;  %v5699_v62 = vcombine.high %v607_v57, %v619_v58 }
  0xb3   : > { %6122 = vmatprep.subr.bf16.mxu0 %v7121_v4  ;;  %v453_v4 = vld [vmem:[%s7798_s14 + $0x78] sm:$0xff] }
  0xb4   : > { %6185 = vmatpush3.bf16.msra.mxu1 %v7120_v2  ;;  %v441_v2 = vld [vmem:[%s7798_s14 + $0x18] sm:$0xff] }
  0xb5   : > { %3174 = vmatmul.mubr.bf16.gmra.mxu0 %v5552_v49  ;;  %6186 = vmatprep.subr.bf16.mxu1 %v7123_v8  ;;  %v7142_v49 = vld [vmem:[%s9415_s1 + $0x100] sm:$0xff]   ;;  %v464_v8 = vld [vmem:[%s7798_s14 + $0xd0] sm:$0xff] }
  0xb6   : > { %3181 = vmatprep.mubr.bf16.mxu0 %v5577_v52  ;;  %6123 = vmatpush3.bf16.msra.mxu0 %v7122_v6  ;;  %v5675_v52 = vcombine.high %v583_v42, %v595_v43  ;;  %v5698_v6 = vcombine.low %v607_v57, %v619_v58  ;;  %v5556_v27 = vcombine.low %v464_v8, %v476_v9  ;;  %v7160_v42 = vld [vmem:[%s9415_s1 + $0x2a0] sm:$0xff]   ;;  %v537_v58 = vld [vmem:[%s7798_s14 + $0x318] sm:$0xff] }
  0xb7   : > { %3271 = vmatmul.mubr.bf16.gmra.mxu1 %v5554_v54  ;;  %6124 = vmatprep.subr.bf16.mxu0 %v7125_v12  ;;  %v606_v54 = vld [vmem:[%s7798_s14 + $0x540] sm:$0xff]  ;;  %v477_v12 = vld [vmem:[%s7798_s14 + $0x138] sm:$0xff] }
  0xb8   : > { %3278 = vmatprep.mubr.bf16.mxu1 %v5579_v56  ;;  %6187 = vmatpush3.bf16.msra.mxu1 %v7124_v11  ;;  %v5672_v56 = vcombine.low %v582_v39, %v594_v40  ;;  %v5697_v59 = vcombine.high %v606_v54, %v618_v55  ;;  %v5559_v17 = vcombine.high %v465_v10, %v477_v12  ;;  %v513_v39 = vld [vmem:[%s7798_s14 + $0x258] sm:$0xff] }
  0xb9   : > { %6188 = vmatprep.subr.bf16.mxu1 %v7127_v14  ;;  %v7146_v14 = vld [vmem:[%s9415_s1 + $0x238] sm:$0xff]  }
  0xba   : > { %6125 = vmatpush3.bf16.msra.mxu0 %v7126_v13  ;;  %v5557_v13 = vcombine.high %v464_v8, %v476_v9  ;;  %v525_v40 = vld [vmem:[%s7798_s14 + $0x2b8] sm:$0xff] }
  0xbb   : > { %6126 = vmatprep.subr.bf16.mxu0 %v7129_v21  ;;  %v500_v21 = vld [vmem:[%s7798_s14 + $0x1f0] sm:$0xff]  ;;  %v573_v8 = vld [vmem:[%s7798_s14 + $0x438] sm:$0xff] }
  0xbc   : > { %6189 = vmatpush3.bf16.msra.mxu1 %v7128_v19  ;;  %v7151_v19 = vld [vmem:[%s9415_s1 + $0x2f0] sm:$0xff]   ;;  %v7177_v9 = vld [vmem:[%s9415_s1 + $0x378] sm:$0xff]  }
  0xbd   : > { %3182 = vmatmul.mubr.bf16.gmra.mxu0 %v5576_v1  ;;  %6190 = vmatprep.subr.bf16.mxu1 %v7131_v26  ;;  %v452_v1 = vld [vmem:[%s7798_s14 + $0x70] sm:$0xff] }
  0xbe   : > { %3189 = vmatprep.mubr.bf16.mxu0 %v5601_v3  ;;  %6127 = vmatpush3.bf16.msra.mxu0 %v7130_v25  ;;  %v5696_v3 = vcombine.low %v606_v54, %v618_v55  ;;  %v5532_v11 = vcombine.low %v440_v63, %v452_v1  ;;  %v7153_v25 = vld [vmem:[%s9415_s1 + $0x268] sm:$0xff]   ;;  %v7152_v26 = vld [vmem:[%s9415_s1 + $0x2b0] sm:$0xff]  }
  0xbf   : > { %3279 = vmatmul.mubr.bf16.gmra.mxu1 %v5578_v5  ;;  %6128 = vmatprep.subr.bf16.mxu0 %v7133_v30  ;;  %v5533_v5 = vcombine.high %v440_v63, %v452_v1  ;;  %v7154_v30 = vld [vmem:[%s9415_s1 + $0x228] sm:$0xff]   ;;  %v7166_v54 = vld [vmem:[%s9415_s1 + $0x210] sm:$0xff]   ;;  %v5606_v63 = vcombine.low %v513_v39, %v525_v40 }
  0xc0   : > { %3286 = vmatprep.mubr.bf16.mxu1 %v5603_v7  ;;  %6191 = vmatpush3.bf16.msra.mxu1 %v7132_v29  ;;  %v5535_v7 = vcombine.high %v441_v2, %v453_v4  ;;  %v7169_v55 = vld [vmem:[%s9415_s1 + $0x248] sm:$0xff]  }
  0xc1   : > { %6192 = vmatprep.subr.bf16.mxu1 %v7135_v34  ;;  %v7156_v34 = vld [vmem:[%s9415_s1 + $0x2a8] sm:$0xff]  }
  0xc2   : > { %6129 = vmatpush3.bf16.msra.mxu0 %v7134_v32  ;;  %v7157_v32 = vld [vmem:[%s9415_s1 + $0x260] sm:$0xff]  }
  0xc3   : > { %6130 = vmatprep.subr.bf16.mxu0 %v7137_v38  ;;  %v7158_v38 = vld [vmem:[%s9415_s1 + $0x220] sm:$0xff]  }
  0xc4   : > { %6193 = vmatpush3.bf16.msra.mxu1 %v7136_v36  ;;  %v524_v36 = vld [vmem:[%s7798_s14 + $0x2b0] sm:$0xff] }
  0xc5   : > { %3190 = vmatmul.mubr.bf16.gmra.mxu0 %v5600_v15  ;;  %6194 = vmatprep.subr.bf16.mxu1 %v7139_v44  ;;  %v5534_v15 = vcombine.low %v441_v2, %v453_v4  ;;  %v7163_v44 = vld [vmem:[%s9415_s1 + $0x2d8] sm:$0xff]   ;;  %v7172_v2 = vld [vmem:[%s9415_s1 + $0x288] sm:$0xff]   ;;  %v560_v4 = vld [vmem:[%s7798_s14 + $0x3d0] sm:$0xff] }
  0xc6   : > { %3197 = vmatprep.mubr.bf16.mxu0 %v5625_v18  ;;  %6131 = vmatpush3.bf16.msra.mxu0 %v7138_v41  ;;  %v7148_v18 = vld [vmem:[%s9415_s1 + $0x2b8] sm:$0xff]  }
  0xc7   : > { %3287 = vmatmul.mubr.bf16.gmra.mxu1 %v5602_v20  ;;  %6132 = vmatprep.subr.bf16.mxu0 %v7141_v47  ;;  %v488_v20 = vld [vmem:[%s7798_s14 + $0x190] sm:$0xff]  ;;  %v7161_v41 = vld [vmem:[%s9415_s1 + $0x258] sm:$0xff]   ;;  %v5582_v47 = vcombine.low %v489_v23, %v501_v24 }
  0xc8   : > { %3294 = vmatprep.mubr.bf16.mxu1 %v5627_v22  ;;  %6195 = vmatpush3.bf16.msra.mxu1 %v7140_v45  ;;  %v7150_v22 = vld [vmem:[%s9415_s1 + $0x230] sm:$0xff]   ;;  %v5581_v29 = vcombine.high %v488_v20, %v500_v21  ;;  %v5580_v43 = vcombine.low %v488_v20, %v500_v21  ;;  %v597_v20 = vld [vmem:[%s7798_s14 + $0x4f8] sm:$0xff] }
  0xc9   : > { %6196 = vmatprep.subr.bf16.mxu1 %v7143_v51  ;;  %v7167_v51 = vld [vmem:[%s9415_s1 + $0x2d0] sm:$0xff]  }
  0xca   : > { %6133 = vmatpush3.bf16.msra.mxu0 %v7142_v49  ;;  %v5607_v49 = vcombine.high %v513_v39, %v525_v40  ;;  %v466_v40 = vld [vmem:[%s7798_s14 + $0xe0] sm:$0xff] }
  0xcb   : > { %6246 = vmatprep.subr.bf16.mxu0 %v7145_v61 }
  0xcc   : > { %6197 = vmatpush3.bf16.msra.mxu1 %v7144_v53  ;;  %v548_v53 = vld [vmem:[%s7798_s14 + $0x370] sm:$0xff] }
  0xcd   : > { %3198 = vmatmul.mubr.bf16.gmra.mxu0 %v5624_v31  ;;  %6310 = vmatprep.subr.bf16.mxu1 %v7147_v0  ;;  %v5558_v31 = vcombine.low %v465_v10, %v477_v12  ;;  %v7173_v0 = vld [vmem:[%s9415_s1 + $0x240] sm:$0xff]   ;;  %v7179_v12 = vld [vmem:[%s9415_s1 + $0x3f8] sm:$0xff]  }
  0xce   : > { %3205 = vmatprep.mubr.bf16.mxu0 %v5649_v33  ;;  %v5583_v33 = vcombine.high %v489_v23, %v501_v24  ;;  %v7176_v10 = vld [vmem:[%s9415_s1 + $0x280] sm:$0xff]   ;;  %v608_v24 = vld [vmem:[%s7798_s14 + $0x550] sm:$0xff] }
  0xcf   : > { %3295 = vmatmul.mubr.bf16.gmra.mxu1 %v5626_v35  ;;  %v512_v35 = vld [vmem:[%s7798_s14 + $0x250] sm:$0xff] }
  0xd0   : > { %3302 = vmatprep.mubr.bf16.mxu1 %v5651_v37  ;;  %v7159_v37 = vld [vmem:[%s9415_s1 + $0x2e0] sm:$0xff]   ;;  %v5605_v45 = vcombine.high %v512_v35, %v524_v36  ;;  %v5604_v57 = vcombine.low %v512_v35, %v524_v36  ;;  %v455_v36 = vld [vmem:[%s7798_s14 + $0x88] sm:$0xff] }
  0xd5   : > { %3206 = vmatmul.mubr.bf16.gmra.mxu0 %v5648_v46  ;;  %v7162_v46 = vld [vmem:[%s9415_s1 + $0x218] sm:$0xff]  }
  0xd6   : > { %3213 = vmatprep.mubr.bf16.mxu0 %v5673_v48  ;;  %v7165_v48 = vld [vmem:[%s9415_s1 + $0x250] sm:$0xff]  }
  0xd7   : > { %3303 = vmatmul.mubr.bf16.gmra.mxu1 %v5650_v50  ;;  %v7164_v50 = vld [vmem:[%s9415_s1 + $0x298] sm:$0xff]  }
  0xd8   : > { %3310 = vmatprep.mubr.bf16.mxu1 %v5675_v52  ;;  %v536_v52 = vld [vmem:[%s7798_s14 + $0x310] sm:$0xff] }
  0xd9   : > { %v5629_v61 = vcombine.high %v536_v52, %v548_v53 }
  0xdd   : > { %3214 = vmatmul.mubr.bf16.gmra.mxu0 %v5672_v56  ;;  %v7168_v56 = vld [vmem:[%s9415_s1 + $0x290] sm:$0xff]  }
  0xde   : > { %3221 = vmatprep.mubr.bf16.mxu0 %v5697_v59  ;;  %v549_v59 = vld [vmem:[%s7798_s14 + $0x378] sm:$0xff] }
  0xdf   : > { %3311 = vmatmul.mubr.bf16.gmra.mxu1 %v5674_v60  ;;  %v7171_v60 = vld [vmem:[%s9415_s1 + $0x2c8] sm:$0xff]   ;;  %v5631_v1 = vcombine.high %v537_v58, %v549_v59 }
  0xe0   : > { %3318 = vmatprep.mubr.bf16.mxu1 %v5699_v62  ;;  %v7170_v62 = vld [vmem:[%s9415_s1 + $0x208] sm:$0xff]  }
  0xe5   : > { %3222 = vmatmul.mubr.bf16.gmra.mxu0 %v5696_v3  ;;  %v7175_v3 = vld [vmem:[%s9415_s1 + $0x2c0] sm:$0xff]  }
  0xe6   : > { %3359 = vmatprep.mubr.bf16.mxu0 %v5533_v5  ;;  %v572_v5 = vld [vmem:[%s7798_s14 + $0x430] sm:$0xff] }
  0xe7   : > { %3319 = vmatmul.mubr.bf16.gmra.mxu1 %v5698_v6  ;;  %v7174_v6 = vld [vmem:[%s9415_s1 + $0x200] sm:$0xff]  }
  0xe8   : > { %3456 = vmatprep.mubr.bf16.mxu1 %v5535_v7  ;;  %v561_v7 = vld [vmem:[%s7798_s14 + $0x3d8] sm:$0xff] }
  0xed   : > { %3360 = vmatmul.mubr.bf16.vlgmr.msra.gmra.mxu0 %v5532_v11  ;;  %v5628_v11 = vcombine.low %v536_v52, %v548_v53  ;;  %v7182_v52 = vld [vmem:[%s9415_s1 + $0x330] sm:$0xff]   ;;  %v490_v53 = vld [vmem:[%s7798_s14 + $0x1a0] sm:$0xff] }
  0xee   : > { %3367 = vmatprep.mubr.bf16.mxu0 %v5557_v13  ;;  %6247 = vmatpush3.bf16.msra.mxu0 %v7146_v14  ;;  %v5653_v13 = vcombine.high %v560_v4, %v572_v5  ;;  %v5630_v14 = vcombine.low %v537_v58, %v549_v59  ;;  %v491_v58 = vld [vmem:[%s7798_s14 + $0x1a8] sm:$0xff] }
  0xef   : > { %3457 = vmatmul.mubr.bf16.vlgmr.msra.gmra.mxu1 %v5534_v15  ;;  %6248 = vmatprep.subr.bf16.mxu0 %v7149_v16  ;;  %v5655_v15 = vcombine.high %v561_v7, %v573_v8  ;;  %v584_v16 = vld [vmem:[%s7798_s14 + $0x490] sm:$0xff]  ;;  %v503_v59 = vld [vmem:[%s7798_s14 + $0x208] sm:$0xff] }
  0xf0   : > { %3464 = vmatprep.mubr.bf16.mxu1 %v5559_v17  ;;  %6311 = vmatpush3.bf16.msra.mxu1 %v7148_v18  ;;  %v596_v17 = vld [vmem:[%s7798_s14 + $0x4f0] sm:$0xff]  ;;  %v585_v18 = vld [vmem:[%s7798_s14 + $0x498] sm:$0xff] }
  0xf1   : > { %6312 = vmatprep.subr.bf16.mxu1 %v7151_v19  ;;  %v5652_v19 = vcombine.low %v560_v4, %v572_v5  ;;  %v5677_v21 = vcombine.high %v584_v16, %v596_v17  ;;  %v5679_v23 = vcombine.high %v585_v18, %v597_v20  ;;  %v526_v4 = vld [vmem:[%s7798_s14 + $0x2c0] sm:$0xff] }
  0xf2   : > { %6249 = vmatpush3.bf16.msra.mxu0 %v7150_v22  ;;  %v5654_v22 = vcombine.low %v561_v7, %v573_v8  ;;  %v7191_v5 = vld [vmem:[%s9415_s1 + $0x3e0] sm:$0xff]   ;;  %v515_v7 = vld [vmem:[%s7798_s14 + $0x268] sm:$0xff]  ;;  %v7193_v8 = vld [vmem:[%s9415_s1 + $0x358] sm:$0xff]  }
  0xf3   : > { %6250 = vmatprep.subr.bf16.mxu0 %v7153_v25  ;;  %v620_v25 = vld [vmem:[%s7798_s14 + $0x5b0] sm:$0xff] }
  0xf4   : > { %6313 = vmatpush3.bf16.msra.mxu1 %v7152_v26  ;;  %v5676_v26 = vcombine.low %v584_v16, %v596_v17  ;;  %v5700_v35 = vcombine.low %v608_v24, %v620_v25  ;;  %v7197_v16 = vld [vmem:[%s9415_s1 + $0x350] sm:$0xff]  }
  0xf5   : > { %3368 = vmatmul.mubr.bf16.gmra.mxu0 %v5556_v27  ;;  %6314 = vmatprep.subr.bf16.mxu1 %v7155_v28  ;;  %v609_v27 = vld [vmem:[%s7798_s14 + $0x558] sm:$0xff] }
  0xf6   : > { %3375 = vmatprep.mubr.bf16.mxu0 %v5581_v29  ;;  %6251 = vmatpush3.bf16.msra.mxu0 %v7154_v30  ;;  %v621_v28 = vld [vmem:[%s7798_s14 + $0x5b8] sm:$0xff]  ;;  %v5701_v29 = vcombine.high %v608_v24, %v620_v25  ;;  %v5678_v30 = vcombine.low %v585_v18, %v597_v20  ;;  %v550_v20 = vld [vmem:[%s7798_s14 + $0x380] sm:$0xff]  ;;  %v7200_v24 = vld [vmem:[%s9415_s1 + $0x390] sm:$0xff]  }
  0xf7   : > { %3465 = vmatmul.mubr.bf16.gmra.mxu1 %v5558_v31  ;;  %6252 = vmatprep.subr.bf16.mxu0 %v7157_v32  ;;  %v5703_v31 = vcombine.high %v609_v27, %v621_v28  ;;  %v442_v32 = vld [vmem:[%s7798_s14 + $0x20] sm:$0xff]  ;;  %v7196_v18 = vld [vmem:[%s9415_s1 + $0x398] sm:$0xff]  }
  0xf8   : > { %3472 = vmatprep.mubr.bf16.mxu1 %v5583_v33  ;;  %6315 = vmatpush3.bf16.msra.mxu1 %v7156_v34  ;;  %v454_v33 = vld [vmem:[%s7798_s14 + $0x80] sm:$0xff]  ;;  %v443_v34 = vld [vmem:[%s7798_s14 + $0x28] sm:$0xff] }
  0xf9   : > { %6316 = vmatprep.subr.bf16.mxu1 %v7159_v37  ;;  %v5537_v37 = vcombine.high %v442_v32, %v454_v33  ;;  %v5539_v39 = vcombine.high %v443_v34, %v455_v36 }
  0xfa   : > { %6253 = vmatpush3.bf16.msra.mxu0 %v7158_v38  ;;  %v5702_v38 = vcombine.low %v609_v27, %v621_v28  ;;  %v551_v27 = vld [vmem:[%s7798_s14 + $0x388] sm:$0xff] }
  0xfb   : > { %6254 = vmatprep.subr.bf16.mxu0 %v7161_v41  ;;  %v478_v41 = vld [vmem:[%s7798_s14 + $0x140] sm:$0xff]  ;;  %v7203_v28 = vld [vmem:[%s9415_s1 + $0x3c8] sm:$0xff]  }
  0xfc   : > { %6317 = vmatpush3.bf16.msra.mxu1 %v7160_v42  ;;  %v5536_v42 = vcombine.low %v442_v32, %v454_v33  ;;  %v7205_v32 = vld [vmem:[%s9415_s1 + $0x340] sm:$0xff]  }
  0xfd   : > { %3376 = vmatmul.mubr.bf16.gmra.mxu0 %v5580_v43  ;;  %6318 = vmatprep.subr.bf16.mxu1 %v7163_v44  ;;  %v467_v43 = vld [vmem:[%s7798_s14 + $0xe8] sm:$0xff] }
  0xfe   : > { %3383 = vmatprep.mubr.bf16.mxu0 %v5605_v45  ;;  %6255 = vmatpush3.bf16.msra.mxu0 %v7162_v46  ;;  %v479_v44 = vld [vmem:[%s7798_s14 + $0x148] sm:$0xff]  ;;  %v5561_v45 = vcombine.high %v466_v40, %v478_v41  ;;  %v7178_v46 = vld [vmem:[%s9415_s1 + $0x338] sm:$0xff]  }
  0xff   : > { %3473 = vmatmul.mubr.bf16.gmra.mxu1 %v5582_v47  ;;  %6256 = vmatprep.subr.bf16.mxu0 %v7165_v48  ;;  %v5538_v47 = vcombine.low %v443_v34, %v455_v36  ;;  %v7181_v48 = vld [vmem:[%s9415_s1 + $0x370] sm:$0xff]   ;;  %v7204_v34 = vld [vmem:[%s9415_s1 + $0x388] sm:$0xff]   ;;  %v574_v36 = vld [vmem:[%s7798_s14 + $0x440] sm:$0xff] }
 0x100   : > { %3480 = vmatprep.mubr.bf16.mxu1 %v5607_v49  ;;  %6319 = vmatpush3.bf16.msra.mxu1 %v7164_v50  ;;  %v5563_v49 = vcombine.high %v467_v43, %v479_v44  ;;  %v7180_v50 = vld [vmem:[%s9415_s1 + $0x3b8] sm:$0xff]  }
 0x101   : > { %6320 = vmatprep.subr.bf16.mxu1 %v7167_v51  ;;  %v7183_v51 = vld [vmem:[%s9415_s1 + $0x3f0] sm:$0xff]  }
 0x102   : > { %6257 = vmatpush3.bf16.msra.mxu0 %v7166_v54  ;;  %v502_v54 = vld [vmem:[%s7798_s14 + $0x200] sm:$0xff] }
 0x103   : > { %6258 = vmatprep.subr.bf16.mxu0 %v7169_v55  ;;  %v7185_v55 = vld [vmem:[%s9415_s1 + $0x368] sm:$0xff]  }
 0x104   : > { %6321 = vmatpush3.bf16.msra.mxu1 %v7168_v56  ;;  %v7184_v56 = vld [vmem:[%s9415_s1 + $0x3b0] sm:$0xff]  }
 0x105   : > { %3384 = vmatmul.mubr.bf16.gmra.mxu0 %v5604_v57  ;;  %6322 = vmatprep.subr.bf16.mxu1 %v7171_v60  ;;  %v5560_v57 = vcombine.low %v466_v40, %v478_v41  ;;  %v7187_v60 = vld [vmem:[%s9415_s1 + $0x3e8] sm:$0xff]   ;;  %v7209_v41 = vld [vmem:[%s9415_s1 + $0x478] sm:$0xff]  }
 0x106   : > { %3391 = vmatprep.mubr.bf16.mxu0 %v5629_v61  ;;  %6259 = vmatpush3.bf16.msra.mxu0 %v7170_v62  ;;  %v5585_v61 = vcombine.high %v490_v53, %v502_v54  ;;  %v7186_v62 = vld [vmem:[%s9415_s1 + $0x328] sm:$0xff]  }
 0x107   : > { %3481 = vmatmul.mubr.bf16.gmra.mxu1 %v5606_v63  ;;  %6260 = vmatprep.subr.bf16.mxu0 %v7173_v0  ;;  %v5562_v63 = vcombine.low %v467_v43, %v479_v44  ;;  %v7189_v0 = vld [vmem:[%s9415_s1 + $0x360] sm:$0xff]   ;;  %v575_v40 = vld [vmem:[%s7798_s14 + $0x448] sm:$0xff]  ;;  %v7211_v44 = vld [vmem:[%s9415_s1 + $0x4f8] sm:$0xff]  }
 0x108   : > { %3488 = vmatprep.mubr.bf16.mxu1 %v5631_v1  ;;  %6323 = vmatpush3.bf16.msra.mxu1 %v7172_v2  ;;  %v5587_v1 = vcombine.high %v491_v58, %v503_v59  ;;  %v7188_v2 = vld [vmem:[%s9415_s1 + $0x3a8] sm:$0xff]  }
 0x109   : > { %6324 = vmatprep.subr.bf16.mxu1 %v7175_v3  ;;  %v514_v3 = vld [vmem:[%s7798_s14 + $0x260] sm:$0xff] }
 0x10a   : > { %6261 = vmatpush3.bf16.msra.mxu0 %v7174_v6  ;;  %v7190_v6 = vld [vmem:[%s9415_s1 + $0x320] sm:$0xff]   ;;  %v5608_v25 = vcombine.low %v514_v3, %v526_v4 }
 0x10b   : > { %6374 = vmatprep.subr.bf16.mxu0 %v7177_v9  ;;  %v527_v9 = vld [vmem:[%s7798_s14 + $0x2c8] sm:$0xff] }
 0x10c   : > { %6325 = vmatpush3.bf16.msra.mxu1 %v7176_v10  ;;  %v7192_v10 = vld [vmem:[%s9415_s1 + $0x3a0] sm:$0xff]   ;;  %v5611_v17 = vcombine.high %v515_v7, %v527_v9 }
 0x10d   : > { %3392 = vmatmul.mubr.bf16.gmra.mxu0 %v5628_v11  ;;  %6438 = vmatprep.subr.bf16.mxu1 %v7179_v12  ;;  %v5584_v11 = vcombine.low %v490_v53, %v502_v54  ;;  %v7195_v12 = vld [vmem:[%s9415_s1 + $0x3d8] sm:$0xff]  }
 0x10e   : > { %3399 = vmatprep.mubr.bf16.mxu0 %v5653_v13  ;;  %v5609_v13 = vcombine.high %v514_v3, %v526_v4  ;;  %v457_v4 = vld [vmem:[%s7798_s14 + $0x98] sm:$0xff] }
 0x10f   : > { %3489 = vmatmul.mubr.bf16.gmra.mxu1 %v5630_v14  ;;  %v7194_v14 = vld [vmem:[%s9415_s1 + $0x318] sm:$0xff]  }
 0x110   : > { %3496 = vmatprep.mubr.bf16.mxu1 %v5655_v15  ;;  %v5586_v15 = vcombine.low %v491_v58, %v503_v59  ;;  %v611_v59 = vld [vmem:[%s7798_s14 + $0x568] sm:$0xff] }
 0x115   : > { %3400 = vmatmul.mubr.bf16.gmra.mxu0 %v5652_v19  ;;  %v538_v19 = vld [vmem:[%s7798_s14 + $0x320] sm:$0xff] }
 0x116   : > { %3407 = vmatprep.mubr.bf16.mxu0 %v5677_v21  ;;  %v7199_v21 = vld [vmem:[%s9415_s1 + $0x3d0] sm:$0xff]   ;;  %v5632_v43 = vcombine.low %v538_v19, %v550_v20 }
 0x117   : > { %3497 = vmatmul.mubr.bf16.gmra.mxu1 %v5654_v22  ;;  %v7198_v22 = vld [vmem:[%s9415_s1 + $0x310] sm:$0xff]  }
 0x118   : > { %3504 = vmatprep.mubr.bf16.mxu1 %v5679_v23  ;;  %v7201_v23 = vld [vmem:[%s9415_s1 + $0x348] sm:$0xff]  }
 0x11d   : > { %3408 = vmatmul.mubr.bf16.gmra.mxu0 %v5676_v26  ;;  %v539_v26 = vld [vmem:[%s7798_s14 + $0x328] sm:$0xff] }
 0x11e   : > { %3415 = vmatprep.mubr.bf16.mxu0 %v5701_v29  ;;  %v5633_v29 = vcombine.high %v538_v19, %v550_v20  ;;  %v5635_v33 = vcombine.high %v539_v26, %v551_v27  ;;  %v8322_v20 = vld [vmem:[#allocation4] ss:$0 sm:$0xff] }
 0x11f   : > { %3505 = vmatmul.mubr.bf16.gmra.mxu1 %v5678_v30  ;;  %v7202_v30 = vld [vmem:[%s9415_s1 + $0x308] sm:$0xff]  }
 0x120   : > { %3512 = vmatprep.mubr.bf16.mxu1 %v5703_v31  ;;  %v5610_v31 = vcombine.low %v515_v7, %v527_v9  ;;  %v480_v9 = vld [vmem:[%s7798_s14 + $0x150] sm:$0xff] }
 0x125   : > { %3416 = vmatmul.mubr.bf16.gmra.mxu0 %v5700_v35  ;;  %v562_v35 = vld [vmem:[%s7798_s14 + $0x3e0] sm:$0xff] }
 0x126   : > { %3553 = vmatprep.mubr.bf16.mxu0 %v5537_v37  ;;  %v7207_v37 = vld [vmem:[%s9415_s1 + $0x3c0] sm:$0xff]  }
 0x127   : > { %3513 = vmatmul.mubr.bf16.gmra.mxu1 %v5702_v38  ;;  %v7206_v38 = vld [vmem:[%s9415_s1 + $0x300] sm:$0xff]  }
 0x128   : > { %3650 = vmatprep.mubr.bf16.mxu1 %v5539_v39  ;;  %v563_v39 = vld [vmem:[%s7798_s14 + $0x3e8] sm:$0xff] }
 0x129   : > { %v5658_v54 = vcombine.low %v563_v39, %v575_v40 }
 0x12d   : > { %3554 = vmatmul.mubr.bf16.vlgmr.msra.gmra.mxu0 %v5536_v42  ;;  %v7208_v42 = vld [vmem:[%s9415_s1 + $0x380] sm:$0xff]  }
 0x12e   : > { %3561 = vmatprep.mubr.bf16.mxu0 %v5561_v45  ;;  %6375 = vmatpush3.bf16.msra.mxu0 %v7178_v46  ;;  %v5657_v45 = vcombine.high %v562_v35, %v574_v36  ;;  %v5634_v46 = vcombine.low %v539_v26, %v551_v27  ;;  %v8337_v27 = vld [vmem:[%s7798_s14 + $0x1b8] sm:$0xff] }
 0x12f   : > { %3651 = vmatmul.mubr.bf16.vlgmr.msra.gmra.mxu1 %v5538_v47  ;;  %6376 = vmatprep.subr.bf16.mxu0 %v7181_v48  ;;  %v5659_v47 = vcombine.high %v563_v39, %v575_v40  ;;  %v586_v48 = vld [vmem:[%s7798_s14 + $0x4a0] sm:$0xff]  ;;  %v7218_v39 = vld [vmem:[%s9415_s1 + $0x428] sm:$0xff]  }
 0x130   : > { %3658 = vmatprep.mubr.bf16.mxu1 %v5563_v49  ;;  %6439 = vmatpush3.bf16.msra.mxu1 %v7180_v50  ;;  %v598_v49 = vld [vmem:[%s7798_s14 + $0x500] sm:$0xff]  ;;  %v587_v50 = vld [vmem:[%s7798_s14 + $0x4a8] sm:$0xff] }
 0x131   : > { %6440 = vmatprep.subr.bf16.mxu1 %v7183_v51  ;;  %v5656_v51 = vcombine.low %v562_v35, %v574_v36  ;;  %v5681_v53 = vcombine.high %v586_v48, %v598_v49  ;;  %v5680_v58 = vcombine.low %v586_v48, %v598_v49  ;;  %v7219_v35 = vld [vmem:[%s9415_s1 + $0x4e8] sm:$0xff]  }
 0x132   : > { %6377 = vmatpush3.bf16.msra.mxu0 %v7182_v52  ;;  %v599_v52 = vld [vmem:[%s7798_s14 + $0x508] sm:$0xff] }
 0x133   : > { %6378 = vmatprep.subr.bf16.mxu0 %v7185_v55  ;;  %v5683_v55 = vcombine.high %v587_v50, %v599_v52 }
 0x134   : > { %6441 = vmatpush3.bf16.msra.mxu1 %v7184_v56  ;;  %v610_v56 = vld [vmem:[%s7798_s14 + $0x560] sm:$0xff] }
 0x135   : > { %3562 = vmatmul.mubr.bf16.gmra.mxu0 %v5560_v57  ;;  %6442 = vmatprep.subr.bf16.mxu1 %v7187_v60  ;;  %v622_v57 = vld [vmem:[%s7798_s14 + $0x5c0] sm:$0xff]  ;;  %v623_v60 = vld [vmem:[%s7798_s14 + $0x5c8] sm:$0xff] }
 0x136   : > { %3569 = vmatprep.mubr.bf16.mxu0 %v5585_v61  ;;  %6379 = vmatpush3.bf16.msra.mxu0 %v7186_v62  ;;  %v5705_v61 = vcombine.high %v610_v56, %v622_v57  ;;  %v5682_v62 = vcombine.low %v587_v50, %v599_v52  ;;  %v5704_v3 = vcombine.low %v610_v56, %v622_v57  ;;  %v8369_v50 = vld [vmem:[%s7798_s14 + $0x270] sm:$0xff]  ;;  %v7223_v52 = vld [vmem:[%s9415_s1 + $0x4e0] sm:$0xff]  }
 0x137   : > { %3659 = vmatmul.mubr.bf16.gmra.mxu1 %v5562_v63  ;;  %6380 = vmatprep.subr.bf16.mxu0 %v7189_v0  ;;  %v5707_v63 = vcombine.high %v611_v59, %v623_v60  ;;  %v444_v0 = vld [vmem:[%s7798_s14 + $0x30] sm:$0xff] }
 0x138   : > { %3666 = vmatprep.mubr.bf16.mxu1 %v5587_v1  ;;  %6443 = vmatpush3.bf16.msra.mxu1 %v7188_v2  ;;  %v456_v1 = vld [vmem:[%s7798_s14 + $0x90] sm:$0xff]  ;;  %v445_v2 = vld [vmem:[%s7798_s14 + $0x38] sm:$0xff] }
 0x139   : > { %6444 = vmatprep.subr.bf16.mxu1 %v7191_v5  ;;  %v5541_v5 = vcombine.high %v444_v0, %v456_v1  ;;  %v5543_v7 = vcombine.high %v445_v2, %v457_v4 }
 0x13a   : > { %6381 = vmatpush3.bf16.msra.mxu0 %v7190_v6  ;;  %v5706_v6 = vcombine.low %v611_v59, %v623_v60  ;;  %v7225_v59 = vld [vmem:[%s9415_s1 + $0x458] sm:$0xff]  }
 0x13b   : > { %6382 = vmatprep.subr.bf16.mxu0 %v7193_v8  ;;  %v468_v8 = vld [vmem:[%s7798_s14 + $0xf0] sm:$0xff] }
 0x13c   : > { %6445 = vmatpush3.bf16.msra.mxu1 %v7192_v10  ;;  %v8309_v10 = vld [vmem:[%s7798_s14 + $0xf8] sm:$0xff] }
 0x13d   : > { %3570 = vmatmul.mubr.bf16.gmra.mxu0 %v5584_v11  ;;  %6446 = vmatprep.subr.bf16.mxu1 %v7195_v12  ;;  %v5540_v11 = vcombine.low %v444_v0, %v456_v1  ;;  %v481_v12 = vld [vmem:[%s7798_s14 + $0x158] sm:$0xff] }
 0x13e   : > { %3577 = vmatprep.mubr.bf16.mxu0 %v5609_v13  ;;  %6383 = vmatpush3.bf16.msra.mxu0 %v7194_v14  ;;  %v5565_v13 = vcombine.high %v468_v8, %v480_v9  ;;  %v7210_v14 = vld [vmem:[%s9415_s1 + $0x438] sm:$0xff]  }
 0x13f   : > { %3667 = vmatmul.mubr.bf16.gmra.mxu1 %v5586_v15  ;;  %6384 = vmatprep.subr.bf16.mxu0 %v7197_v16  ;;  %v5542_v15 = vcombine.low %v445_v2, %v457_v4  ;;  %v7213_v16 = vld [vmem:[%s9415_s1 + $0x470] sm:$0xff]  }
 0x140   : > { %3674 = vmatprep.mubr.bf16.mxu1 %v5611_v17  ;;  %6447 = vmatpush3.bf16.msra.mxu1 %v7196_v18  ;;  %v5567_v17 = vcombine.high %v8309_v10, %v481_v12  ;;  %v7212_v18 = vld [vmem:[%s9415_s1 + $0x4b8] sm:$0xff]  }
 0x141   : > { %6448 = vmatprep.subr.bf16.mxu1 %v7199_v21  ;;  %v8325_v21 = vld [vmem:[%s7798_s14 + $0x1b0] sm:$0xff] }
 0x142   : > { %6385 = vmatpush3.bf16.msra.mxu0 %v7198_v22  ;;  %v7215_v22 = vld [vmem:[%s9415_s1 + $0x4f0] sm:$0xff]  }
 0x143   : > { %6386 = vmatprep.subr.bf16.mxu0 %v7201_v23  ;;  %v8331_v23 = vld [vmem:[%s7798_s14 + $0x210] sm:$0xff] }
 0x144   : > { %6449 = vmatpush3.bf16.msra.mxu1 %v7200_v24  ;;  %v7214_v24 = vld [vmem:[%s9415_s1 + $0x430] sm:$0xff]   ;;  %v5588_v2 = vcombine.low %v8325_v21, %v8331_v23 }
 0x145   : > { %3578 = vmatmul.mubr.bf16.gmra.mxu0 %v5608_v25  ;;  %6450 = vmatprep.subr.bf16.mxu1 %v7203_v28  ;;  %v8340_v28 = vld [vmem:[%s7798_s14 + $0x218] sm:$0xff] }
 0x146   : > { %3585 = vmatprep.mubr.bf16.mxu0 %v5633_v29  ;;  %6387 = vmatpush3.bf16.msra.mxu0 %v7202_v30  ;;  %v7217_v29 = vld [vmem:[%s9415_s1 + $0x468] sm:$0xff]  }
 0x147   : > { %3675 = vmatmul.mubr.bf16.gmra.mxu1 %v5610_v31  ;;  %6388 = vmatprep.subr.bf16.mxu0 %v7205_v32  ;;  %v7216_v31 = vld [vmem:[%s9415_s1 + $0x4b0] sm:$0xff]  }
 0x148   : > { %3682 = vmatprep.mubr.bf16.mxu1 %v5635_v33  ;;  %6451 = vmatpush3.bf16.msra.mxu1 %v7204_v34  ;;  %v5564_v34 = vcombine.low %v468_v8, %v480_v9 }
 0x149   : > { %6452 = vmatprep.subr.bf16.mxu1 %v7207_v37 }
 0x14a   : > { %6389 = vmatpush3.bf16.msra.mxu0 %v7206_v38  ;;  %v5589_v38 = vcombine.high %v8325_v21, %v8331_v23  ;;  %v8426_v23 = vld [vmem:[%s7798_s14 + $0x390] sm:$0xff] }
 0x14b   : > { %6502 = vmatprep.subr.bf16.mxu0 %v7209_v41 }
 0x14c   : > { %6453 = vmatpush3.bf16.msra.mxu1 %v7208_v42  ;;  %v5566_v42 = vcombine.low %v8309_v10, %v481_v12  ;;  %v5590_v10 = vcombine.low %v8337_v27, %v8340_v28 }
 0x14d   : > { %3586 = vmatmul.mubr.bf16.gmra.mxu0 %v5632_v43  ;;  %6566 = vmatprep.subr.bf16.mxu1 %v7211_v44  ;;  %v7221_v43 = vld [vmem:[%s9415_s1 + $0x460] sm:$0xff]  }
 0x14e   : > { %3593 = vmatprep.mubr.bf16.mxu0 %v5657_v45 }
 0x14f   : > { %3683 = vmatmul.mubr.bf16.gmra.mxu1 %v5634_v46  ;;  %v5591_v46 = vcombine.high %v8337_v27, %v8340_v28  ;;  %v7233_v27 = vld [vmem:[%s9415_s1 + $0x448] sm:$0xff]  }
 0x150   : > { %3690 = vmatprep.mubr.bf16.mxu1 %v5659_v47  ;;  %v7220_v47 = vld [vmem:[%s9415_s1 + $0x4a8] sm:$0xff]  }
 0x155   : > { %3594 = vmatmul.mubr.bf16.gmra.mxu0 %v5656_v51  ;;  %v8372_v51 = vld [vmem:[%s7798_s14 + $0x2d0] sm:$0xff] }
 0x156   : > { %3601 = vmatprep.mubr.bf16.mxu0 %v5681_v53 }
 0x157   : > { %3691 = vmatmul.mubr.bf16.gmra.mxu1 %v5658_v54 }
 0x158   : > { %3698 = vmatprep.mubr.bf16.mxu1 %v5683_v55  ;;  %v7222_v55 = vld [vmem:[%s9415_s1 + $0x420] sm:$0xff]  }
 0x15d   : > { %3602 = vmatmul.mubr.bf16.gmra.mxu0 %v5680_v58  ;;  %v8382_v58 = vld [vmem:[%s7798_s14 + $0x278] sm:$0xff] }
 0x15e   : > { %3609 = vmatprep.mubr.bf16.mxu0 %v5705_v61 }
 0x15f   : > { %3699 = vmatmul.mubr.bf16.gmra.mxu1 %v5682_v62  ;;  %v8390_v62 = vld [vmem:[%s7798_s14 + $0x2d8] sm:$0xff] }
 0x160   : > { %3706 = vmatprep.mubr.bf16.mxu1 %v5707_v63  ;;  %v7224_v63 = vld [vmem:[%s9415_s1 + $0x4a0] sm:$0xff]  }
 0x165   : > { %3610 = vmatmul.mubr.bf16.gmra.mxu0 %v5704_v3  ;;  %v7227_v3 = vld [vmem:[%s9415_s1 + $0x4d8] sm:$0xff]  }
 0x166   : > { %3747 = vmatprep.mubr.bf16.mxu0 %v5541_v5 }
 0x167   : > { %3707 = vmatmul.mubr.bf16.gmra.mxu1 %v5706_v6  ;;  %v5613_v6 = vcombine.high %v8369_v50, %v8372_v51 }
 0x168   : > { %3844 = vmatprep.mubr.bf16.mxu1 %v5543_v7  ;;  %v7226_v7 = vld [vmem:[%s9415_s1 + $0x418] sm:$0xff]  }
 0x16d   : > { %v6006_v19 = vpop.f32.mrf.mxu0  ;;  %3748 = vmatmul.mubr.bf16.vlgmr.msra.gmra.mxu0 %v5540_v11  ;;  %v7229_v11 = vld [vmem:[%s9415_s1 + $0x450] sm:$0xff]  }
 0x16e   : > { %3755 = vmatprep.mubr.bf16.mxu0 %v5565_v13  ;;  %6503 = vmatpush3.bf16.msra.mxu0 %v7210_v14  ;;  %v5615_v14 = vcombine.high %v8382_v58, %v8390_v62 }
 0x16f   : > { %v6007_v25 = vpop.f32.mrf.mxu0  ;;  %v6070_v26 = vpop.f32.mrf.mxu1  ;;  %3845 = vmatmul.mubr.bf16.vlgmr.msra.gmra.mxu1 %v5542_v15  ;;  %6504 = vmatprep.subr.bf16.mxu0 %v7213_v16  ;;  %v7228_v15 = vld [vmem:[%s9415_s1 + $0x498] sm:$0xff]  }
 0x170   : > { %v6008_v30 = vadd.f32 %v6007_v25, %v6006_v19  ;;  %3852 = vmatprep.mubr.bf16.mxu1 %v5567_v17  ;;  %6567 = vmatpush3.bf16.msra.mxu1 %v7212_v18  ;;  %v8419_v18 = vld [vmem:[%s7798_s14 + $0x330] sm:$0xff] }
 0x171   : > { %v6009_v32 = vpop.f32.mrf.mxu0  ;;  %v6071_v33 = vpop.f32.mrf.mxu1  ;;  %6568 = vmatprep.subr.bf16.mxu1 %v7215_v22  ;;  %v7231_v19 = vld [vmem:[%s9415_s1 + $0x4d0] sm:$0xff]  }
 0x172   : > { %v3168_v36 = vadd.f32 %v6008_v30, %v8322_v20  ;;  %v6072_v37 = vadd.f32 %v6071_v33, %v6070_v26  ;;  %6505 = vmatpush3.bf16.msra.mxu0 %v7214_v24  ;;  %v7230_v24 = vld [vmem:[%s9415_s1 + $0x410] sm:$0xff]   ;;  %v5612_v33 = vcombine.low %v8369_v50, %v8372_v51 }
 0x173   : > { %v6010_v40 = vpop.f32.mrf.mxu0  ;;  %v6073_v41 = vpop.f32.mrf.mxu1  ;;  %6506 = vmatprep.subr.bf16.mxu0 %v7217_v29  ;;  %v7232_v30 = vld [vmem:[%s9415_s1 + $0x490] sm:$0xff]  }
 0x174   : > { %v8361_v44 = vadd.f32 %v6072_v37, %v3168_v36  ;;  %v6011_v45 = vadd.f32 %v6010_v40, %v6009_v32  ;;  %6569 = vmatpush3.bf16.msra.mxu1 %v7216_v31  ;;  %v7235_v36 = vld [vmem:[%s9415_s1 + $0x4c8] sm:$0xff]  }
 0x175   : > { %v6012_v48 = vpop.f32.mrf.mxu0  ;;  %v6074_v49 = vpop.f32.mrf.mxu1  ;;  %3756 = vmatmul.mubr.bf16.gmra.mxu0 %v5564_v34  ;;  %6570 = vmatprep.subr.bf16.mxu1 %v7219_v35  ;;  %v8442_v34 = vld [vmem:[%s7798_s14 + $0x338] sm:$0xff]  ;;  %v7234_v40 = vld [vmem:[%s9415_s1 + $0x408] sm:$0xff]  }
 0x176   : > { %v3171_v53 = vadd.f32 %v6011_v45, %v8322_v20  ;;  %v6075_v54 = vadd.f32 %v6074_v49, %v6073_v41  ;;  %3763 = vmatprep.mubr.bf16.mxu0 %v5589_v38  ;;  %6507 = vmatpush3.bf16.msra.mxu0 %v7218_v39  ;;  %v8445_v35 = vld [vmem:[%s7798_s14 + $0x398] sm:$0xff]  ;;  %v5637_v39 = vcombine.high %v8419_v18, %v8426_v23  ;;  %v7237_v45 = vld [vmem:[%s9415_s1 + $0x440] sm:$0xff]   ;;  %v7236_v49 = vld [vmem:[%s9415_s1 + $0x488] sm:$0xff]  }
 0x177   : > { %v6013_v56 = vpop.f32.mrf.mxu0  ;;  %v6076_v57 = vpop.f32.mrf.mxu1  ;;  %3853 = vmatmul.mubr.bf16.gmra.mxu1 %v5566_v42  ;;  %6508 = vmatprep.subr.bf16.mxu0 %v7221_v43  ;;  %v5614_v43 = vcombine.low %v8382_v58, %v8390_v62  ;;  %v564_v58 = vld [vmem:[%s7798_s14 + $0x3f0] sm:$0xff] }
 0x178   : > { %v8387_v60 = vadd.f32 %v6075_v54, %v3171_v53  ;;  %v6014_v61 = vadd.f32 %v6013_v56, %v6012_v48  ;;  %3860 = vmatprep.mubr.bf16.mxu1 %v5591_v46  ;;  %6571 = vmatpush3.bf16.msra.mxu1 %v7220_v47  ;;  %v5639_v48 = vcombine.high %v8442_v34, %v8445_v35 }
 0x179   : > { %v6015_v0 = vpop.f32.mrf.mxu0  ;;  %v6077_v1 = vpop.f32.mrf.mxu1  ;;  %6572 = vmatprep.subr.bf16.mxu1 %v7223_v52  ;;  %v7239_v52 = vld [vmem:[%s9415_s1 + $0x4c0] sm:$0xff]  }
 0x17a   : > { %v3176_v4 = vadd.f32 %v6014_v61, %v8322_v20  ;;  %v6078_v5 = vadd.f32 %v6077_v1, %v6076_v57  ;;  %6509 = vmatpush3.bf16.msra.mxu0 %v7222_v55  ;;  %v7238_v55 = vld [vmem:[%s9415_s1 + $0x400] sm:$0xff]   ;;  %v7241_v61 = vld [vmem:[%s9415_s1 + $0x578] sm:$0xff]  }
 0x17b   : > { %v6016_v8 = vpop.f32.mrf.mxu0  ;;  %v6079_v9 = vpop.f32.mrf.mxu1  ;;  %6510 = vmatprep.subr.bf16.mxu0 %v7225_v59  ;;  %v576_v59 = vld [vmem:[%s7798_s14 + $0x450] sm:$0xff] }
 0x17c   : > { %v8411_v12 = vadd.f32 %v6078_v5, %v3176_v4  ;;  %v6017_v13 = vadd.f32 %v6016_v8, %v6015_v0  ;;  %6573 = vmatpush3.bf16.msra.mxu1 %v7224_v63  ;;  %v7240_v0 = vld [vmem:[%s9415_s1 + $0x480] sm:$0xff]   ;;  %v565_v4 = vld [vmem:[%s7798_s14 + $0x3f8] sm:$0xff] }
 0x17d   : > { %v6018_v16 = vpop.f32.mrf.mxu0  ;;  %v6080_v17 = vpop.f32.mrf.mxu1  ;;  %3764 = vmatmul.mubr.bf16.gmra.mxu0 %v5588_v2  ;;  %6574 = vmatprep.subr.bf16.mxu1 %v7227_v3  ;;  %v5636_v3 = vcombine.low %v8419_v18, %v8426_v23  ;;  %v577_v5 = vld [vmem:[%s7798_s14 + $0x458] sm:$0xff] }
 0x17e   : > { %v3179_v21 = vadd.f32 %v6017_v13, %v8322_v20  ;;  %v6081_v22 = vadd.f32 %v6080_v17, %v6079_v9  ;;  %3771 = vmatprep.mubr.bf16.mxu0 %v5613_v6  ;;  %6511 = vmatpush3.bf16.msra.mxu0 %v7226_v7  ;;  %v7243_v6 = vld [vmem:[%s9415_s1 + $0x5f8] sm:$0xff]   ;;  %v5661_v9 = vcombine.high %v564_v58, %v576_v59 }
 0x17f   : > { %v6019_v25 = vpop.f32.mrf.mxu0  ;;  %v6082_v26 = vpop.f32.mrf.mxu1  ;;  %3861 = vmatmul.mubr.bf16.gmra.mxu1 %v5590_v10  ;;  %6512 = vmatprep.subr.bf16.mxu0 %v7229_v11  ;;  %v5638_v13 = vcombine.low %v8442_v34, %v8445_v35 }
 0x180   : > { %v8434_v28 = vadd.f32 %v6081_v22, %v3179_v21  ;;  %v6020_v29 = vadd.f32 %v6019_v25, %v6018_v16  ;;  %3868 = vmatprep.mubr.bf16.mxu1 %v5615_v14  ;;  %6575 = vmatpush3.bf16.msra.mxu1 %v7228_v15  ;;  %v5663_v16 = vcombine.high %v565_v4, %v577_v5  ;;  %v600_v25 = vld [vmem:[%s7798_s14 + $0x510] sm:$0xff] }
 0x181   : > { %v6021_v31 = vpop.f32.mrf.mxu0  ;;  %v6083_v32 = vpop.f32.mrf.mxu1  ;;  %6576 = vmatprep.subr.bf16.mxu1 %v7231_v19 }
 0x182   : > { %v3184_v37 = vadd.f32 %v6020_v29, %v8322_v20  ;;  %v6084_v38 = vadd.f32 %v6083_v32, %v6082_v26  ;;  %6513 = vmatpush3.bf16.msra.mxu0 %v7230_v24  ;;  %v588_v24 = vld [vmem:[%s7798_s14 + $0x4b0] sm:$0xff]  ;;  %v589_v32 = vld [vmem:[%s7798_s14 + $0x4b8] sm:$0xff] }
 0x183   : > { %v6022_v41 = vpop.f32.mrf.mxu0  ;;  %v6085_v42 = vpop.f32.mrf.mxu1  ;;  %6514 = vmatprep.subr.bf16.mxu0 %v7233_v27 }
 0x184   : > { %v8461_v46 = vadd.f32 %v6084_v38, %v3184_v37  ;;  %v6023_v47 = vadd.f32 %v6022_v41, %v6021_v31  ;;  %6577 = vmatpush3.bf16.msra.mxu1 %v7232_v30  ;;  %v5660_v31 = vcombine.low %v564_v58, %v576_v59  ;;  %v613_v58 = vld [vmem:[%s7798_s14 + $0x578] sm:$0xff] }
 0x185   : > { %v6024_v50 = vpop.f32.mrf.mxu0  ;;  %v6086_v51 = vpop.f32.mrf.mxu1  ;;  %3772 = vmatmul.mubr.bf16.gmra.mxu0 %v5612_v33  ;;  %6578 = vmatprep.subr.bf16.mxu1 %v7235_v36  ;;  %v601_v33 = vld [vmem:[%s7798_s14 + $0x518] sm:$0xff]  ;;  %v5685_v36 = vcombine.high %v588_v24, %v600_v25 }
 0x186   : > { %v3187_v53 = vadd.f32 %v6023_v47, %v8322_v20  ;;  %v6087_v54 = vadd.f32 %v6086_v51, %v6085_v42  ;;  %3779 = vmatprep.mubr.bf16.mxu0 %v5637_v39  ;;  %6515 = vmatpush3.bf16.msra.mxu0 %v7234_v40  ;;  %v5662_v39 = vcombine.low %v565_v4, %v577_v5  ;;  %v612_v51 = vld [vmem:[%s7798_s14 + $0x570] sm:$0xff]  ;;  %v625_v59 = vld [vmem:[%s7798_s14 + $0x5d8] sm:$0xff] }
 0x187   : > { %v6025_v56 = vpop.f32.mrf.mxu0  ;;  %v6088_v57 = vpop.f32.mrf.mxu1  ;;  %3869 = vmatmul.mubr.bf16.gmra.mxu1 %v5614_v43  ;;  %6516 = vmatprep.subr.bf16.mxu0 %v7237_v45  ;;  %v5687_v42 = vcombine.high %v589_v32, %v601_v33 }
 0x188   : > { %v8480_v62 = vadd.f32 %v6087_v54, %v3187_v53  ;;  %v6026_v63 = vadd.f32 %v6025_v56, %v6024_v50  ;;  %3876 = vmatprep.mubr.bf16.mxu1 %v5639_v48  ;;  %6579 = vmatpush3.bf16.msra.mxu1 %v7236_v49 }
 0x189   : > { %v6027_v1 = vpop.f32.mrf.mxu0  ;;  %v6089_v2 = vpop.f32.mrf.mxu1  ;;  %6580 = vmatprep.subr.bf16.mxu1 %v7239_v52  ;;  %v624_v52 = vld [vmem:[%s7798_s14 + $0x5d0] sm:$0xff] }
 0x18a   : > { %v3192_v7 = vadd.f32 %v6026_v63, %v8322_v20  ;;  %v6090_v8 = vadd.f32 %v6089_v2, %v6088_v57  ;;  %6517 = vmatpush3.bf16.msra.mxu0 %v7238_v55  ;;  %v5684_v57 = vcombine.low %v588_v24, %v600_v25  ;;  %v459_v24 = vld [vmem:[%s7798_s14 + $0xa8] sm:$0xff] }
 0x18b   : > { %v6028_v10 = vpop.f32.mrf.mxu0  ;;  %v6091_v11 = vpop.f32.mrf.mxu1  ;;  %6630 = vmatprep.subr.bf16.mxu0 %v7241_v61 }
 0x18c   : > { %v8495_v14 = vadd.f32 %v6090_v8, %v3192_v7  ;;  %v6029_v15 = vadd.f32 %v6028_v10, %v6027_v1  ;;  %6581 = vmatpush3.bf16.msra.mxu1 %v7240_v0  ;;  %v5709_v0 = vcombine.high %v612_v51, %v624_v52 }
 0x18d   : > { %v6030_v17 = vpop.f32.mrf.mxu0  ;;  %v6092_v18 = vpop.f32.mrf.mxu1  ;;  %3780 = vmatmul.mubr.bf16.gmra.mxu0 %v5636_v3  ;;  %6694 = vmatprep.subr.bf16.mxu1 %v7243_v6  ;;  %v5686_v3 = vcombine.low %v589_v32, %v601_v33  ;;  %v5711_v6 = vcombine.high %v613_v58, %v625_v59  ;;  %v5710_v32 = vcombine.low %v613_v58, %v625_v59  ;;  %v7242_v58 = vld [vmem:[%s9415_s1 + $0x538] sm:$0xff]  }
 0x18e   : > { %v3195_v19 = vadd.f32 %v6029_v15, %v8322_v20  ;;  %v6093_v21 = vadd.f32 %v6092_v18, %v6091_v11  ;;  %3787 = vmatprep.mubr.bf16.mxu0 %v5661_v9  ;;  %v446_v15 = vld [vmem:[%s7798_s14 + $0x40] sm:$0xff] }
 0x18f   : > { %v6031_v22 = vpop.f32.mrf.mxu0  ;;  %v6094_v23 = vpop.f32.mrf.mxu1  ;;  %3877 = vmatmul.mubr.bf16.gmra.mxu1 %v5638_v13 }
 0x190   : > { %v8500_v26 = vadd.f32 %v6093_v21, %v3195_v19  ;;  %v6032_v27 = vadd.f32 %v6031_v22, %v6030_v17  ;;  %3884 = vmatprep.mubr.bf16.mxu1 %v5663_v16  ;;  %v458_v16 = vld [vmem:[%s7798_s14 + $0xa0] sm:$0xff]  ;;  %v5708_v22 = vcombine.low %v612_v51, %v624_v52  ;;  %v8537_v52 = vld [vmem:[%s7798_s14 + $0x108] sm:$0xff] }
 0x191   : > { %v6033_v29 = vpop.f32.mrf.mxu0  ;;  %v6095_v30 = vpop.f32.mrf.mxu1  ;;  %v5544_v51 = vcombine.low %v446_v15, %v458_v16 }
 0x192   : > { %v3200_v34 = vadd.f32 %v6032_v27, %v8322_v20  ;;  %v6096_v35 = vadd.f32 %v6095_v30, %v6094_v23  ;;  %v447_v23 = vld [vmem:[%s7798_s14 + $0x48] sm:$0xff] }
 0x193   : > { %v6034_v37 = vpop.f32.mrf.mxu0  ;;  %v6097_v38 = vpop.f32.mrf.mxu1 }
 0x194   : > { %v8505_v40 = vadd.f32 %v6096_v35, %v3200_v34  ;;  %v6035_v41 = vadd.f32 %v6034_v37, %v6033_v29  ;;  %v5545_v29 = vcombine.high %v446_v15, %v458_v16  ;;  %v5547_v35 = vcombine.high %v447_v23, %v459_v24  ;;  %v8566_v16 = vld [vmem:[%s7798_s14 + $0x1c0] sm:$0xff] }
 0x195   : > { %v6036_v43 = vpop.f32.mrf.mxu0  ;;  %v6098_v45 = vpop.f32.mrf.mxu1  ;;  %3788 = vmatmul.mubr.bf16.gmra.mxu0 %v5660_v31 }
 0x196   : > { %v3203_v47 = vadd.f32 %v6035_v41, %v8322_v20  ;;  %v6099_v48 = vadd.f32 %v6098_v45, %v6097_v38  ;;  %3795 = vmatprep.mubr.bf16.mxu0 %v5685_v36  ;;  %v8532_v45 = vld [vmem:[%s7798_s14 + $0x160] sm:$0xff] }
 0x197   : > { %v6037_v49 = vpop.f32.mrf.mxu0  ;;  %v6100_v50 = vpop.f32.mrf.mxu1  ;;  %3885 = vmatmul.mubr.bf16.gmra.mxu1 %v5662_v39 }
 0x198   : > { %v8510_v53 = vadd.f32 %v6099_v48, %v3203_v47  ;;  %v6038_v54 = vadd.f32 %v6037_v49, %v6036_v43  ;;  %3892 = vmatprep.mubr.bf16.mxu1 %v5687_v42  ;;  %v8529_v43 = vld [vmem:[%s7798_s14 + $0x100] sm:$0xff] }
 0x199   : > { %v6039_v55 = vpop.f32.mrf.mxu0  ;;  %v6101_v56 = vpop.f32.mrf.mxu1 }
 0x19a   : > { %v3208_v61 = vadd.f32 %v6038_v54, %v8322_v20  ;;  %v6102_v63 = vadd.f32 %v6101_v56, %v6100_v50  ;;  %v8540_v54 = vld [vmem:[%s7798_s14 + $0x168] sm:$0xff] }
 0x19b   : > { %v6040_v1 = vpop.f32.mrf.mxu0  ;;  %v6103_v2 = vpop.f32.mrf.mxu1 }
 0x19c   : > { %v8515_v4 = vadd.f32 %v6102_v63, %v3208_v61  ;;  %v6041_v5 = vadd.f32 %v6040_v1, %v6039_v55  ;;  %v5546_v63 = vcombine.low %v447_v23, %v459_v24 }
 0x19d   : > { %v6042_v7 = vpop.f32.mrf.mxu0  ;;  %v6104_v8 = vpop.f32.mrf.mxu1  ;;  %3796 = vmatmul.mubr.bf16.gmra.mxu0 %v5684_v57  ;;  %v5569_v57 = vcombine.high %v8529_v43, %v8532_v45 }
 0x19e   : > { %v3211_v9 = vadd.f32 %v6041_v5, %v8322_v20  ;;  %v6105_v10 = vadd.f32 %v6104_v8, %v6103_v2  ;;  %3803 = vmatprep.mubr.bf16.mxu0 %v5709_v0  ;;  %v7245_v0 = vld [vmem:[%s9415_s1 + $0x570] sm:$0xff]   ;;  %v7244_v5 = vld [vmem:[%s9415_s1 + $0x5b8] sm:$0xff]  }
 0x19f   : > { %v6043_v11 = vpop.f32.mrf.mxu0  ;;  %v6106_v13 = vpop.f32.mrf.mxu1  ;;  %3893 = vmatmul.mubr.bf16.gmra.mxu1 %v5686_v3  ;;  %v5571_v3 = vcombine.high %v8537_v52, %v8540_v54  ;;  %v7247_v8 = vld [vmem:[%s9415_s1 + $0x5f0] sm:$0xff]  }
 0x1a0   : > { %v8520_v17 = vadd.f32 %v6105_v10, %v3211_v9  ;;  %v6044_v18 = vadd.f32 %v6043_v11, %v6042_v7  ;;  %3900 = vmatprep.mubr.bf16.mxu1 %v5711_v6  ;;  %v7246_v11 = vld [vmem:[%s9415_s1 + $0x530] sm:$0xff]  }
 0x1a1   : > { %v6045_v19 = vpop.f32.mrf.mxu0  ;;  %v6107_v21 = vpop.f32.mrf.mxu1 }
 0x1a2   : > { %v3216_v25 = vadd.f32 %v6044_v18, %v8322_v20  ;;  %v6108_v27 = vadd.f32 %v6107_v21, %v6106_v13  ;;  %v8569_v18 = vld [vmem:[%s7798_s14 + $0x220] sm:$0xff] }
 0x1a3   : > { %v6046_v30 = vpop.f32.mrf.mxu0  ;;  %v6109_v31 = vpop.f32.mrf.mxu1 }
 0x1a4   : > { %v8525_v33 = vadd.f32 %v6108_v27, %v3216_v25  ;;  %v6047_v34 = vadd.f32 %v6046_v30, %v6045_v19  ;;  %v5568_v25 = vcombine.low %v8529_v43, %v8532_v45  ;;  %v8582_v27 = vld [vmem:[%s7798_s14 + $0x1c8] sm:$0xff] }
 0x1a5   : > { %v6048_v36 = vpop.f32.mrf.mxu0  ;;  %v6110_v37 = vpop.f32.mrf.mxu1  ;;  %3804 = vmatmul.mubr.bf16.gmra.mxu0 %v5708_v22  ;;  %v7248_v22 = vld [vmem:[%s9415_s1 + $0x5b0] sm:$0xff]   ;;  %v7251_v30 = vld [vmem:[%s9415_s1 + $0x5e8] sm:$0xff]  }
 0x1a6   : > { %v3219_v38 = vadd.f32 %v6047_v34, %v8322_v20  ;;  %v6111_v39 = vadd.f32 %v6110_v37, %v6109_v31  ;;  %3941 = vmatprep.mubr.bf16.mxu0 %v5545_v29  ;;  %v8585_v29 = vld [vmem:[%s7798_s14 + $0x228] sm:$0xff]  ;;  %v5593_v34 = vcombine.high %v8566_v16, %v8569_v18 }
 0x1a7   : > { %v6049_v41 = vpop.f32.mrf.mxu0  ;;  %v6112_v42 = vpop.f32.mrf.mxu1  ;;  %3901 = vmatmul.mubr.bf16.gmra.mxu1 %v5710_v32  ;;  %v7252_v43 = vld [vmem:[%s9415_s1 + $0x5a8] sm:$0xff]  }
 0x1a8   : > { %v8534_v47 = vadd.f32 %v6111_v39, %v3219_v38  ;;  %v6050_v48 = vadd.f32 %v6049_v41, %v6048_v36  ;;  %4038 = vmatprep.mubr.bf16.mxu1 %v5547_v35  ;;  %v7250_v35 = vld [vmem:[%s9415_s1 + $0x528] sm:$0xff]   ;;  %v5570_v38 = vcombine.low %v8537_v52, %v8540_v54  ;;  %v7253_v39 = vld [vmem:[%s9415_s1 + $0x560] sm:$0xff]  }
 0x1a9   : > { %v6051_v49 = vpop.f32.mrf.mxu0  ;;  %v6113_v50 = vpop.f32.mrf.mxu1  ;;  %v7254_v52 = vld [vmem:[%s9415_s1 + $0x520] sm:$0xff]  }
 0x1aa   : > { %v3224_v55 = vadd.f32 %v6050_v48, %v8322_v20  ;;  %v6114_v56 = vadd.f32 %v6113_v50, %v6112_v42  ;;  %v5595_v42 = vcombine.high %v8582_v27, %v8585_v29 }
 0x1ab   : > { %v6052_v59 = vpop.f32.mrf.mxu0  ;;  %v6115_v61 = vpop.f32.mrf.mxu1 }
 0x1ac   : > { %v8551_v1 = vadd.f32 %v6114_v56, %v3224_v55  ;;  %v6053_v2 = vadd.f32 %v6052_v59, %v6051_v49  ;;  %v7255_v49 = vld [vmem:[%s9415_s1 + $0x5e0] sm:$0xff]  }
 0x1ad   : > { %v6116_v6 = vpop.f32.mrf.mxu1  ;;  %v6134_v7 = vpop.f32.mrf.mxu0  ;;  %3942 = vmatmul.mubr.bf16.vlgmr.msra.gmra.mxu0 %v5544_v51  ;;  %v8616_v56 = vld [vmem:[%s7798_s14 + $0x280] sm:$0xff] }
 0x1ae   : > { %v3227_v9 = vadd.f32 %v6053_v2, %v8322_v20  ;;  %v6117_v10 = vadd.f32 %v6116_v6, %v6115_v61  ;;  %3949 = vmatprep.mubr.bf16.mxu0 %v5569_v57  ;;  %6631 = vmatpush3.bf16.msra.mxu0 %v7242_v58  ;;  %v7249_v20 = vld [vmem:[%s9415_s1 + $0x568] sm:$0xff]   ;;  %v8619_v57 = vld [vmem:[%s7798_s14 + $0x2e0] sm:$0xff]  ;;  %v5592_v2 = vcombine.low %v8566_v16, %v8569_v18  ;;  %v7259_v6 = vld [vmem:[%s9415_s1 + $0x5d8] sm:$0xff]  }
 0x1af   : > { %v6135_v13 = vpop.f32.mrf.mxu0  ;;  %v6198_v15 = vpop.f32.mrf.mxu1  ;;  %4039 = vmatmul.mubr.bf16.vlgmr.msra.gmra.mxu1 %v5546_v63  ;;  %6632 = vmatprep.subr.bf16.mxu0 %v7245_v0  ;;  %v7256_v61 = vld [vmem:[%s9415_s1 + $0x5a0] sm:$0xff]   ;;  %v7261_v16 = vld [vmem:[%s9415_s1 + $0x550] sm:$0xff]  }
 0x1b0   : > { %v8574_v19 = vadd.f32 %v6117_v10, %v3227_v9  ;;  %v6136_v21 = vadd.f32 %v6135_v13, %v6134_v7  ;;  %4046 = vmatprep.mubr.bf16.mxu1 %v5571_v3  ;;  %6695 = vmatpush3.bf16.msra.mxu1 %v7244_v5  ;;  %v8632_v3 = vld [vmem:[%s7798_s14 + $0x288] sm:$0xff]  ;;  %v5617_v9 = vcombine.high %v8616_v56, %v8619_v57  ;;  %v7258_v10 = vld [vmem:[%s9415_s1 + $0x518] sm:$0xff]  }
 0x1b1   : > { %v6137_v23 = vpop.f32.mrf.mxu0  ;;  %v6199_v24 = vpop.f32.mrf.mxu1  ;;  %6696 = vmatprep.subr.bf16.mxu1 %v7247_v8  ;;  %v8635_v5 = vld [vmem:[%s7798_s14 + $0x2e8] sm:$0xff] }
 0x1b2   : > { %v3362_v31 = vadd.f32 %v6136_v21, %v8361_v44  ;;  %v6200_v32 = vadd.f32 %v6199_v24, %v6198_v15  ;;  %6633 = vmatpush3.bf16.msra.mxu0 %v7246_v11  ;;  %v5594_v15 = vcombine.low %v8582_v27, %v8585_v29  ;;  %v7260_v21 = vld [vmem:[%s9415_s1 + $0x598] sm:$0xff]   ;;  %v7263_v24 = vld [vmem:[%s9415_s1 + $0x5d0] sm:$0xff]  }
 0x1b3   : > { %v6138_v36 = vpop.f32.mrf.mxu0  ;;  %v6201_v37 = vpop.f32.mrf.mxu1  ;;  %6634 = vmatprep.subr.bf16.mxu0 %v7249_v20  ;;  %v5619_v20 = vcombine.high %v8632_v3, %v8635_v5  ;;  %v7262_v29 = vld [vmem:[%s9415_s1 + $0x510] sm:$0xff]  }
 0x1b4   : > { %v8601_v44 = vadd.f32 %v6200_v32, %v3362_v31  ;;  %v6139_v41 = vadd.f32 %v6138_v36, %v6137_v23  ;;  %6697 = vmatpush3.bf16.msra.mxu1 %v7248_v22  ;;  %v8666_v32 = vld [vmem:[%s7798_s14 + $0x340] sm:$0xff] }
 0x1b5   : > { %v6140_v45 = vpop.f32.mrf.mxu0  ;;  %v6202_v48 = vpop.f32.mrf.mxu1  ;;  %3950 = vmatmul.mubr.bf16.gmra.mxu0 %v5568_v25  ;;  %6698 = vmatprep.subr.bf16.mxu1 %v7251_v30 }
 0x1b6   : > { %v3365_v50 = vadd.f32 %v6139_v41, %v8387_v60  ;;  %v6203_v51 = vadd.f32 %v6202_v48, %v6201_v37  ;;  %3957 = vmatprep.mubr.bf16.mxu0 %v5593_v34  ;;  %6635 = vmatpush3.bf16.msra.mxu0 %v7250_v35  ;;  %v7257_v60 = vld [vmem:[%s9415_s1 + $0x558] sm:$0xff]   ;;  %v8669_v34 = vld [vmem:[%s7798_s14 + $0x3a0] sm:$0xff]  ;;  %v7264_v37 = vld [vmem:[%s9415_s1 + $0x590] sm:$0xff]   ;;  %v5616_v41 = vcombine.low %v8616_v56, %v8619_v57 }
 0x1b7   : > { %v6141_v54 = vpop.f32.mrf.mxu0  ;;  %v6204_v55 = vpop.f32.mrf.mxu1  ;;  %4047 = vmatmul.mubr.bf16.gmra.mxu1 %v5570_v38  ;;  %6636 = vmatprep.subr.bf16.mxu0 %v7253_v39  ;;  %v7269_v56 = vld [vmem:[%s9415_s1 + $0x540] sm:$0xff]  }
 0x1b8   : > { %v8624_v58 = vadd.f32 %v6203_v51, %v3365_v50  ;;  %v6142_v59 = vadd.f32 %v6141_v54, %v6140_v45  ;;  %4054 = vmatprep.mubr.bf16.mxu1 %v5595_v42  ;;  %6699 = vmatpush3.bf16.msra.mxu1 %v7252_v43  ;;  %v8682_v42 = vld [vmem:[%s7798_s14 + $0x348] sm:$0xff]  ;;  %v5641_v50 = vcombine.high %v8666_v32, %v8669_v34 }
 0x1b9   : > { %v6143_v63 = vpop.f32.mrf.mxu0  ;;  %v6205_v0 = vpop.f32.mrf.mxu1  ;;  %6700 = vmatprep.subr.bf16.mxu1 %v7255_v49  ;;  %v8685_v43 = vld [vmem:[%s7798_s14 + $0x3a8] sm:$0xff] }
 0x1ba   : > { %v3370_v7 = vadd.f32 %v6142_v59, %v8411_v12  ;;  %v6206_v8 = vadd.f32 %v6205_v0, %v6204_v55  ;;  %6637 = vmatpush3.bf16.msra.mxu0 %v7254_v52  ;;  %v7267_v45 = vld [vmem:[%s9415_s1 + $0x5c8] sm:$0xff]   ;;  %v5618_v55 = vcombine.low %v8632_v3, %v8635_v5  ;;  %v7271_v0 = vld [vmem:[%s9415_s1 + $0x5c0] sm:$0xff]  }
 0x1bb   : > { %v6144_v11 = vpop.f32.mrf.mxu0  ;;  %v6207_v13 = vpop.f32.mrf.mxu1  ;;  %6638 = vmatprep.subr.bf16.mxu0 %v7257_v60  ;;  %v7266_v51 = vld [vmem:[%s9415_s1 + $0x508] sm:$0xff]   ;;  %v5643_v60 = vcombine.high %v8682_v42, %v8685_v43  ;;  %v7270_v5 = vld [vmem:[%s9415_s1 + $0x500] sm:$0xff]  }
 0x1bc   : > { %v8651_v12 = vadd.f32 %v6206_v8, %v3370_v7  ;;  %v6145_v18 = vadd.f32 %v6144_v11, %v6143_v63  ;;  %6701 = vmatpush3.bf16.msra.mxu1 %v7256_v61  ;;  %v7268_v59 = vld [vmem:[%s9415_s1 + $0x588] sm:$0xff]   ;;  %v566_v8 = vld [vmem:[%s7798_s14 + $0x400] sm:$0xff] }
 0x1bd   : > { %v6146_v22 = vpop.f32.mrf.mxu0  ;;  %v6208_v23 = vpop.f32.mrf.mxu1  ;;  %3958 = vmatmul.mubr.bf16.gmra.mxu0 %v5592_v2  ;;  %6702 = vmatprep.subr.bf16.mxu1 %v7259_v6 }
 0x1be   : > { %v3373_v25 = vadd.f32 %v6145_v18, %v8434_v28  ;;  %v6209_v27 = vadd.f32 %v6208_v23, %v6207_v13  ;;  %3965 = vmatprep.mubr.bf16.mxu0 %v5617_v9  ;;  %6639 = vmatpush3.bf16.msra.mxu0 %v7258_v10  ;;  %v7265_v28 = vld [vmem:[%s9415_s1 + $0x548] sm:$0xff]   ;;  %v578_v9 = vld [vmem:[%s7798_s14 + $0x460] sm:$0xff] }
 0x1bf   : > { %v6147_v30 = vpop.f32.mrf.mxu0  ;;  %v6210_v31 = vpop.f32.mrf.mxu1  ;;  %4055 = vmatmul.mubr.bf16.gmra.mxu1 %v5594_v15  ;;  %6640 = vmatprep.subr.bf16.mxu0 %v7261_v16  ;;  %v5640_v16 = vcombine.low %v8666_v32, %v8669_v34  ;;  %v567_v18 = vld [vmem:[%s7798_s14 + $0x408] sm:$0xff]  ;;  %v5665_v23 = vcombine.high %v566_v8, %v578_v9 }
 0x1c0   : > { %v8674_v35 = vadd.f32 %v6209_v27, %v3373_v25  ;;  %v6148_v36 = vadd.f32 %v6147_v30, %v6146_v22  ;;  %4062 = vmatprep.mubr.bf16.mxu1 %v5619_v20  ;;  %6703 = vmatpush3.bf16.msra.mxu1 %v7260_v21  ;;  %v579_v20 = vld [vmem:[%s7798_s14 + $0x468] sm:$0xff]  ;;  %v5642_v27 = vcombine.low %v8682_v42, %v8685_v43 }
 0x1c1   : > { %v6149_v38 = vpop.f32.mrf.mxu0  ;;  %v6211_v39 = vpop.f32.mrf.mxu1  ;;  %6704 = vmatprep.subr.bf16.mxu1 %v7263_v24  ;;  %v5667_v32 = vcombine.high %v567_v18, %v579_v20 }
 0x1c2   : > { %v3378_v48 = vadd.f32 %v6148_v36, %v8461_v46  ;;  %v6212_v49 = vadd.f32 %v6211_v39, %v6210_v31  ;;  %6641 = vmatpush3.bf16.msra.mxu0 %v7262_v29  ;;  %v7583_v29 = vmov 0.0   ;;  %v590_v39 = vld [vmem:[%s7798_s14 + $0x4c0] sm:$0xff] }
 0x1c3   : > { %v6150_v52 = vpop.f32.mrf.mxu0  ;;  %v6213_v54 = vpop.f32.mrf.mxu1  ;;  %6642 = vmatprep.subr.bf16.mxu0 %v7265_v28 }
 0x1c4   : > { %v8701_v46 = vadd.f32 %v6212_v49, %v3378_v48  ;;  %v6151_v57 = vadd.f32 %v6150_v52, %v6149_v38  ;;  %6705 = vmatpush3.bf16.msra.mxu1 %v7264_v37  ;;  %v5664_v49 = vcombine.low %v566_v8, %v578_v9 }
 0x1c5   : > { %v6152_v61 = vpop.f32.mrf.mxu0  ;;  %v6214_v63 = vpop.f32.mrf.mxu1  ;;  %3966 = vmatmul.mubr.bf16.gmra.mxu0 %v5616_v41  ;;  %6706 = vmatprep.subr.bf16.mxu1 %v7267_v45  ;;  %v602_v41 = vld [vmem:[%s7798_s14 + $0x520] sm:$0xff] }
 0x1c6   : > { %v3381_v2 = vadd.f32 %v6151_v57, %v8480_v62  ;;  %v6215_v3 = vadd.f32 %v6214_v63, %v6213_v54  ;;  %3973 = vmatprep.mubr.bf16.mxu0 %v5641_v50  ;;  %6643 = vmatpush3.bf16.msra.mxu0 %v7266_v51  ;;  %v7272_v62 = vld [vmem:[%s9415_s1 + $0x580] sm:$0xff]   ;;  %v591_v50 = vld [vmem:[%s7798_s14 + $0x4c8] sm:$0xff]  ;;  %v5666_v57 = vcombine.low %v567_v18, %v579_v20 }
 0x1c7   : > { %v6153_v6 = vpop.f32.mrf.mxu0  ;;  %v6216_v7 = vpop.f32.mrf.mxu1  ;;  %4063 = vmatmul.mubr.bf16.gmra.mxu1 %v5618_v55  ;;  %6644 = vmatprep.subr.bf16.mxu0 %v7269_v56  ;;  %v603_v51 = vld [vmem:[%s7798_s14 + $0x528] sm:$0xff] }
 0x1c8   : > { %v8717_v10 = vadd.f32 %v6215_v3, %v3381_v2  ;;  %v6154_v11 = vadd.f32 %v6153_v6, %v6152_v61  ;;  %4070 = vmatprep.mubr.bf16.mxu1 %v5643_v60  ;;  %6707 = vmatpush3.bf16.msra.mxu1 %v7268_v59  ;;  %v5691_v61 = vcombine.high %v591_v50, %v603_v51  ;;  %v614_v6 = vld [vmem:[%s7798_s14 + $0x580] sm:$0xff] }
 0x1c9   : > { %v6155_v13 = vpop.f32.mrf.mxu0  ;;  %v6217_v15 = vpop.f32.mrf.mxu1  ;;  %6708 = vmatprep.subr.bf16.mxu1 %v7271_v0 }
 0x1ca   : > { %v3386_v21 = vadd.f32 %v6154_v11, %v8495_v14  ;;  %v6218_v22 = vadd.f32 %v6217_v15, %v6216_v7  ;;  %6645 = vmatpush3.bf16.msra.mxu0 %v7270_v5  ;;  %v626_v7 = vld [vmem:[%s7798_s14 + $0x5e0] sm:$0xff]  ;;  %v615_v15 = vld [vmem:[%s7798_s14 + $0x588] sm:$0xff] }
 0x1cb   : > { %v6156_v24 = vpop.f32.mrf.mxu0  ;;  %v6219_v25 = vpop.f32.mrf.mxu1  ;;  %6837 = vmatprep.subr.mxu0 %v7583_v29 }
 0x1cc   : > { %v8730_v30 = vadd.f32 %v6218_v22, %v3386_v21  ;;  %v6157_v31 = vadd.f32 %v6156_v24, %v6155_v13  ;;  %6709 = vmatpush3.bf16.msra.mxu1 %v7272_v62  ;;  %v5688_v13 = vcombine.low %v590_v39, %v602_v41 }
 0x1cd   : > { %v6158_v34 = vpop.f32.mrf.mxu0  ;;  %v6220_v14 = vpop.f32.mrf.mxu1  ;;  %3974 = vmatmul.mubr.bf16.gmra.mxu0 %v5640_v16  ;;  %v627_v16 = vld [vmem:[%s7798_s14 + $0x5e8] sm:$0xff] }
 0x1ce   : > { %v3389_v28 = vadd.f32 %v6157_v31, %v8500_v26  ;;  %v6221_v36 = vadd.f32 %v6220_v14, %v6219_v25  ;;  %3981 = vmatprep.mubr.bf16.mxu0 %v5665_v23  ;;  %v5689_v26 = vcombine.high %v590_v39, %v602_v41  ;;  %v5690_v23 = vcombine.low %v591_v50, %v603_v51 }
 0x1cf   : > { %v6159_v37 = vpop.f32.mrf.mxu0  ;;  %v6222_v38 = vpop.f32.mrf.mxu1  ;;  %4071 = vmatmul.mubr.bf16.gmra.mxu1 %v5642_v27  ;;  %v5715_v27 = vcombine.high %v615_v15, %v627_v16 }
 0x1d0   : > { %v8735_v42 = vadd.f32 %v6221_v36, %v3389_v28  ;;  %v6160_v43 = vadd.f32 %v6159_v37, %v6158_v34  ;;  %4078 = vmatprep.mubr.bf16.mxu1 %v5667_v32  ;;  %v448_v36 = vld [vmem:[%s7798_s14 + $0x50] sm:$0xff] }
 0x1d1   : > { %v6161_v45 = vpop.f32.mrf.mxu0  ;;  %v6223_v48 = vpop.f32.mrf.mxu1  ;;  %v460_v37 = vld [vmem:[%s7798_s14 + $0xb0] sm:$0xff] }
 0x1d2   : > { %v3394_v52 = vadd.f32 %v6160_v43, %v8505_v40  ;;  %v6224_v54 = vadd.f32 %v6223_v48, %v6222_v38  ;;  %v449_v48 = vld [vmem:[%s7798_s14 + $0x58] sm:$0xff] }
 0x1d3   : > { %v6162_v55 = vpop.f32.mrf.mxu0  ;;  %v6225_v56 = vpop.f32.mrf.mxu1 }
 0x1d4   : > { %v8740_v60 = vadd.f32 %v6224_v54, %v3394_v52  ;;  %v6163_v59 = vadd.f32 %v6162_v55, %v6161_v45  ;;  %v5712_v45 = vcombine.low %v614_v6, %v626_v7 }
 0x1d5   : > { %v6164_v63 = vpop.f32.mrf.mxu0  ;;  %v6226_v0 = vpop.f32.mrf.mxu1  ;;  %3982 = vmatmul.mubr.bf16.gmra.mxu0 %v5664_v49  ;;  %v461_v49 = vld [vmem:[%s7798_s14 + $0xb8] sm:$0xff] }
 0x1d6   : > { %v3397_v2 = vadd.f32 %v6163_v59, %v8510_v53  ;;  %v6227_v3 = vadd.f32 %v6226_v0, %v6225_v56  ;;  %3989 = vmatprep.mubr.bf16.mxu0 %v5689_v26  ;;  %v5713_v53 = vcombine.high %v614_v6, %v626_v7  ;;  %v5714_v26 = vcombine.low %v615_v15, %v627_v16 }
 0x1d7   : > { %v6165_v40 = vpop.f32.mrf.mxu0  ;;  %v6228_v5 = vpop.f32.mrf.mxu1  ;;  %4079 = vmatmul.mubr.bf16.gmra.mxu1 %v5666_v57  ;;  %v5551_v57 = vcombine.high %v449_v48, %v461_v49 }
 0x1d8   : > { %v8745_v8 = vadd.f32 %v6227_v3, %v3397_v2  ;;  %v6166_v9 = vadd.f32 %v6165_v40, %v6164_v63  ;;  %4086 = vmatprep.mubr.bf16.mxu1 %v5691_v61  ;;  %v472_v3 = vld [vmem:[%s7798_s14 + $0x110] sm:$0xff] }
 0x1d9   : > { %v6167_v11 = vpop.f32.mrf.mxu0  ;;  %v6229_v62 = vpop.f32.mrf.mxu1  ;;  %v484_v40 = vld [vmem:[%s7798_s14 + $0x170] sm:$0xff] }
 0x1da   : > { %v3402_v18 = vadd.f32 %v6166_v9, %v8515_v4  ;;  %v6230_v20 = vadd.f32 %v6229_v62, %v6228_v5  ;;  %v473_v62 = vld [vmem:[%s7798_s14 + $0x118] sm:$0xff] }
 0x1db   : > { %v6168_v21 = vpop.f32.mrf.mxu0  ;;  %v6231_v22 = vpop.f32.mrf.mxu1 }
 0x1dc   : > { %v8750_v24 = vadd.f32 %v6230_v20, %v3402_v18  ;;  %v6169_v25 = vadd.f32 %v6168_v21, %v6167_v11  ;;  %v5548_v11 = vcombine.low %v448_v36, %v460_v37  ;;  %v4301_v21 = vld [vmem:[#allocation6 + $0x8] sm:$0x3] }
 0x1dd   : > { %v6170_v31 = vpop.f32.mrf.mxu0  ;;  %v6232_v32 = vpop.f32.mrf.mxu1  ;;  %3990 = vmatmul.mubr.bf16.gmra.mxu0 %v5688_v13  ;;  %v485_v13 = vld [vmem:[%s7798_s14 + $0x178] sm:$0xff] }
 0x1de   : > { %v3405_v34 = vadd.f32 %v6169_v25, %v8520_v17  ;;  %v6233_v14 = vadd.f32 %v6232_v32, %v6231_v22  ;;  %3997 = vmatprep.mubr.bf16.mxu0 %v5713_v53  ;;  %v5549_v17 = vcombine.high %v448_v36, %v460_v37  ;;  %v5550_v53 = vcombine.low %v449_v48, %v461_v49  ;;  %v4300_v32 = vld [vmem:[#allocation6] sm:$0xff]  ;;  %v508_v36 = vld [vmem:[%s7798_s14 + $0x230] sm:$0xff]  ;;  %v509_v48 = vld [vmem:[%s7798_s14 + $0x238] sm:$0xff] }
 0x1df   : > { %v6171_v4 = vpop.f32.mrf.mxu0  ;;  %v6234_v28 = vpop.f32.mrf.mxu1  ;;  %4087 = vmatmul.mubr.bf16.gmra.mxu1 %v5690_v23  ;;  %v5575_v25 = vcombine.high %v473_v62, %v485_v13 }
 0x1e0   : > { %v8755_v38 = vadd.f32 %v6233_v14, %v3405_v34  ;;  %v6172_v39 = vadd.f32 %v6171_v4, %v6170_v31  ;;  %4094 = vmatprep.mubr.bf16.mxu1 %v5715_v27 }
 0x1e1   : > { %v6173_v41 = vpop.f32.mrf.mxu0  ;;  %v6235_v43 = vpop.f32.mrf.mxu1 }
 0x1e2   : > { %v3410_v50 = vadd.f32 %v6172_v39, %v8525_v33  ;;  %v6236_v51 = vadd.f32 %v6235_v43, %v6234_v28  ;;  %v496_v28 = vld [vmem:[%s7798_s14 + $0x1d0] sm:$0xff]  ;;  %v5572_v43 = vcombine.low %v472_v3, %v484_v40 }
 0x1e3   : > { %v6174_v52 = vpop.f32.mrf.mxu0  ;;  %v6237_v54 = vpop.f32.mrf.mxu1 }
 0x1e4   : > { %v8760_v55 = vadd.f32 %v6236_v51, %v3410_v50  ;;  %v6175_v56 = vadd.f32 %v6174_v52, %v6173_v41  ;;  %v5597_v51 = vcombine.high %v496_v28, %v508_v36 }
 0x1e5   : > { %v6176_v59 = vpop.f32.mrf.mxu0  ;;  %v6238_v61 = vpop.f32.mrf.mxu1  ;;  %3998 = vmatmul.mubr.bf16.gmra.mxu0 %v5712_v45  ;;  %v497_v45 = vld [vmem:[%s7798_s14 + $0x1d8] sm:$0xff] }
 0x1e6   : > { %v3413_v63 = vadd.f32 %v6175_v56, %v8534_v47  ;;  %v6239_v0 = vadd.f32 %v6238_v61, %v6237_v54  ;;  %4135 = vmatprep.mubr.bf16.mxu0 %v5549_v17  ;;  %v5573_v47 = vcombine.high %v472_v3, %v484_v40  ;;  %v5574_v54 = vcombine.low %v473_v62, %v485_v13  ;;  %v532_v3 = vld [vmem:[%s7798_s14 + $0x2f0] sm:$0xff]  ;;  %v521_v62 = vld [vmem:[%s7798_s14 + $0x298] sm:$0xff] }
 0x1e7   : > { %v6177_v33 = vpop.f32.mrf.mxu0  ;;  %v6240_v2 = vpop.f32.mrf.mxu1  ;;  %4095 = vmatmul.mubr.bf16.gmra.mxu1 %v5714_v26  ;;  %v533_v13 = vld [vmem:[%s7798_s14 + $0x2f8] sm:$0xff] }
 0x1e8   : > { %v8765_v5 = vadd.f32 %v6239_v0, %v3413_v63  ;;  %v6178_v6 = vadd.f32 %v6177_v33, %v6176_v59  ;;  %4232 = vmatprep.mubr.bf16.mxu1 %v5551_v57  ;;  %v5599_v57 = vcombine.high %v497_v45, %v509_v48 }
 0x1e9   : > { %v6179_v7 = vpop.f32.mrf.mxu0  ;;  %v6241_v9 = vpop.f32.mrf.mxu1 }
 0x1ea   : > { %v3418_v15 = vadd.f32 %v6178_v6, %v8551_v1  ;;  %v6242_v16 = vadd.f32 %v6241_v9, %v6240_v2  ;;  %v520_v2 = vld [vmem:[%s7798_s14 + $0x290] sm:$0xff] }
 0x1eb   : > { %v6180_v18 = vpop.f32.mrf.mxu0  ;;  %v6243_v20 = vpop.f32.mrf.mxu1 }
 0x1ec   : > { %v8770_v22 = vadd.f32 %v6242_v16, %v3418_v15  ;;  %v6181_v23 = vadd.f32 %v6180_v18, %v6179_v7 }
 0x1ed   : > { %v6244_v27 = vpop.f32.mrf.mxu1  ;;  %v6262_v31 = vpop.f32.mrf.mxu0  ;;  %4136 = vmatmul.mubr.bf16.vlgmr.msra.gmra.mxu0 %v5548_v11  ;;  %v5596_v11 = vcombine.low %v496_v28, %v508_v36 }
 0x1ee   : > { %v3421_v34 = vadd.f32 %v6181_v23, %v8574_v19  ;;  %v6245_v1 = vadd.f32 %v6244_v27, %v6243_v20  ;;  %4143 = vmatprep.mubr.bf16.mxu0 %v5573_v47  ;;  %6838 = vmatpush3.msk.msra.mxu0 %vm4319_vm0, %v4301_v21  ;;  %v5598_v20 = vcombine.low %v497_v45, %v509_v48 }
 0x1ef   : > { %v6263_v14 = vpop.f32.mrf.mxu0  ;;  %v6326_v4 = vpop.f32.mrf.mxu1  ;;  %4233 = vmatmul.mubr.bf16.vlgmr.msra.gmra.mxu1 %v5550_v53  ;;  %6839 = vmatprep.subr.mxu0 %v7583_v29  ;;  %v5623_v23 = vcombine.high %v521_v62, %v533_v13 }
 0x1f0   : > { %v8777_v37 = vadd.f32 %v6245_v1, %v3421_v34  ;;  %v6264_v39 = vadd.f32 %v6263_v14, %v6262_v31  ;;  %4240 = vmatprep.mubr.bf16.mxu1 %v5575_v25  ;;  %6840 = vmatpush3.msra.mxu0 %v4300_v32  ;;  %v544_v1 = vld [vmem:[%s7798_s14 + $0x350] sm:$0xff] }
 0x1f1   : > { %v6265_v41 = vpop.f32.mrf.mxu0  ;;  %v6327_v19 = vpop.f32.mrf.mxu1  ;;  %v556_v14 = vld [vmem:[%s7798_s14 + $0x3b0] sm:$0xff] }
 0x1f2   : > { %v3556_v49 = vadd.f32 %v6264_v39, %v8601_v44  ;;  %v6328_v50 = vadd.f32 %v6327_v19, %v6326_v4  ;;  %v545_v19 = vld [vmem:[%s7798_s14 + $0x358] sm:$0xff] }
 0x1f3   : > { %v6266_v17 = vpop.f32.mrf.mxu0  ;;  %v6329_v52 = vpop.f32.mrf.mxu1 }
 0x1f4   : > { %v8782_v26 = vadd.f32 %v6328_v50, %v3556_v49  ;;  %v6267_v56 = vadd.f32 %v6266_v17, %v6265_v41  ;;  %v5620_v41 = vcombine.low %v520_v2, %v532_v3 }
 0x1f5   : > { %v6268_v59 = vpop.f32.mrf.mxu0  ;;  %v6330_v61 = vpop.f32.mrf.mxu1  ;;  %4144 = vmatmul.mubr.bf16.gmra.mxu0 %v5572_v43  ;;  %v557_v43 = vld [vmem:[%s7798_s14 + $0x3b8] sm:$0xff] }
 0x1f6   : > { %v3559_v63 = vadd.f32 %v6267_v56, %v8624_v58  ;;  %v6331_v0 = vadd.f32 %v6330_v61, %v6329_v52  ;;  %4151 = vmatprep.mubr.bf16.mxu0 %v5597_v51  ;;  %v5621_v58 = vcombine.high %v520_v2, %v532_v3  ;;  %v5622_v51 = vcombine.low %v521_v62, %v533_v13 }
 0x1f7   : > { %v6269_v44 = vpop.f32.mrf.mxu0  ;;  %v6332_v33 = vpop.f32.mrf.mxu1  ;;  %4241 = vmatmul.mubr.bf16.gmra.mxu1 %v5574_v54  ;;  %v5647_v54 = vcombine.high %v545_v19, %v557_v43 }
 0x1f8   : > { %v8787_v40 = vadd.f32 %v6331_v0, %v3559_v63  ;;  %v6270_v6 = vadd.f32 %v6269_v44, %v6268_v59  ;;  %4248 = vmatprep.mubr.bf16.mxu1 %v5599_v57  ;;  %v568_v0 = vld [vmem:[%s7798_s14 + $0x410] sm:$0xff] }
 0x1f9   : > { %v6271_v7 = vpop.f32.mrf.mxu0  ;;  %v6333_v9 = vpop.f32.mrf.mxu1  ;;  %v580_v44 = vld [vmem:[%s7798_s14 + $0x470] sm:$0xff] }
 0x1fa   : > { %v3564_v15 = vadd.f32 %v6270_v6, %v8651_v12  ;;  %v6334_v16 = vadd.f32 %v6333_v9, %v6332_v33  ;;  %v569_v9 = vld [vmem:[%s7798_s14 + $0x418] sm:$0xff] }
 0x1fb   : > { %v6272_v47 = vpop.f32.mrf.mxu0  ;;  %v6335_v18 = vpop.f32.mrf.mxu1 }
 0x1fc   : > { %v8792_v53 = vadd.f32 %v6334_v16, %v3564_v15  ;;  %v6273_v21 = vadd.f32 %v6272_v47, %v6271_v7  ;;  %v5644_v7 = vcombine.low %v544_v1, %v556_v14 }
 0x1fd   : > { %v6274_v25 = vpop.f32.mrf.mxu0  ;;  %v6336_v27 = vpop.f32.mrf.mxu1  ;;  %4152 = vmatmul.mubr.bf16.gmra.mxu0 %v5596_v11  ;;  %v581_v11 = vld [vmem:[%s7798_s14 + $0x478] sm:$0xff] }
 0x1fe   : > { %v3567_v31 = vadd.f32 %v6273_v21, %v8674_v35  ;;  %v6337_v32 = vadd.f32 %v6336_v27, %v6335_v18  ;;  %4159 = vmatprep.mubr.bf16.mxu0 %v5621_v58  ;;  %v5645_v35 = vcombine.high %v544_v1, %v556_v14  ;;  %v5646_v58 = vcombine.low %v545_v19, %v557_v43 }
 0x1ff   : > { %v6275_v12 = vpop.f32.mrf.mxu0  ;;  %v6338_v34 = vpop.f32.mrf.mxu1  ;;  %4249 = vmatmul.mubr.bf16.gmra.mxu1 %v5598_v20  ;;  %v5671_v20 = vcombine.high %v569_v9, %v581_v11 }
 0x200   : > { %v8797_v4 = vadd.f32 %v6337_v32, %v3567_v31  ;;  %v6276_v28 = vadd.f32 %v6275_v12, %v6274_v25  ;;  %4256 = vmatprep.mubr.bf16.mxu1 %v5623_v23  ;;  %v592_v32 = vld [vmem:[%s7798_s14 + $0x4d0] sm:$0xff] }
 0x201   : > { %v6277_v36 = vpop.f32.mrf.mxu0  ;;  %v6339_v39 = vpop.f32.mrf.mxu1  ;;  %v604_v12 = vld [vmem:[%s7798_s14 + $0x530] sm:$0xff] }
 0x202   : > { %v3572_v45 = vadd.f32 %v6276_v28, %v8701_v46  ;;  %v6340_v48 = vadd.f32 %v6339_v39, %v6338_v34  ;;  %v593_v39 = vld [vmem:[%s7798_s14 + $0x4d8] sm:$0xff] }
 0x203   : > { %v6278_v49 = vpop.f32.mrf.mxu0  ;;  %v6341_v50 = vpop.f32.mrf.mxu1 }
 0x204   : > { %v8802_v17 = vadd.f32 %v6340_v48, %v3572_v45  ;;  %v6279_v52 = vadd.f32 %v6278_v49, %v6277_v36  ;;  %v5668_v36 = vcombine.low %v568_v0, %v580_v44 }
 0x205   : > { %v6280_v56 = vpop.f32.mrf.mxu0  ;;  %v6342_v57 = vpop.f32.mrf.mxu1  ;;  %4160 = vmatmul.mubr.bf16.gmra.mxu0 %v5620_v41  ;;  %v605_v41 = vld [vmem:[%s7798_s14 + $0x538] sm:$0xff] }
 0x206   : > { %v3575_v59 = vadd.f32 %v6279_v52, %v8717_v10  ;;  %v6343_v61 = vadd.f32 %v6342_v57, %v6341_v50  ;;  %4167 = vmatprep.mubr.bf16.mxu0 %v5645_v35  ;;  %v5669_v10 = vcombine.high %v568_v0, %v580_v44  ;;  %v5670_v35 = vcombine.low %v569_v9, %v581_v11 }
 0x207   : > { %v6281_v46 = vpop.f32.mrf.mxu0  ;;  %v6344_v63 = vpop.f32.mrf.mxu1  ;;  %4257 = vmatmul.mubr.bf16.gmra.mxu1 %v5622_v51  ;;  %v5695_v51 = vcombine.high %v593_v39, %v605_v41 }
 0x208   : > { %v8807_v33 = vadd.f32 %v6343_v61, %v3575_v59  ;;  %v6282_v2 = vadd.f32 %v6281_v46, %v6280_v56  ;;  %4264 = vmatprep.mubr.bf16.mxu1 %v5647_v54  ;;  %v616_v61 = vld [vmem:[%s7798_s14 + $0x590] sm:$0xff] }
 0x209   : > { %v6283_v3 = vpop.f32.mrf.mxu0  ;;  %v6345_v6 = vpop.f32.mrf.mxu1  ;;  %v628_v46 = vld [vmem:[%s7798_s14 + $0x5f0] sm:$0xff] }
 0x20a   : > { %v3580_v62 = vadd.f32 %v6282_v2, %v8730_v30  ;;  %v6346_v13 = vadd.f32 %v6345_v6, %v6344_v63  ;;  %v617_v6 = vld [vmem:[%s7798_s14 + $0x598] sm:$0xff] }
 0x20b   : > { %v6284_v15 = vpop.f32.mrf.mxu0  ;;  %v6347_v16 = vpop.f32.mrf.mxu1 }
 0x20c   : > { %v8812_v47 = vadd.f32 %v6346_v13, %v3580_v62  ;;  %v6285_v18 = vadd.f32 %v6284_v15, %v6283_v3  ;;  %v5692_v3 = vcombine.low %v592_v32, %v604_v12 }
 0x20d   : > { %v6286_v21 = vpop.f32.mrf.mxu0  ;;  %v6348_v23 = vpop.f32.mrf.mxu1  ;;  %4168 = vmatmul.mubr.bf16.gmra.mxu0 %v5644_v7  ;;  %v629_v7 = vld [vmem:[%s7798_s14 + $0x5f8] sm:$0xff] }
 0x20e   : > { %v3583_v25 = vadd.f32 %v6285_v18, %v8735_v42  ;;  %v6349_v27 = vadd.f32 %v6348_v23, %v6347_v16  ;;  %4175 = vmatprep.mubr.bf16.mxu0 %v5669_v10  ;;  %v5693_v42 = vcombine.high %v592_v32, %v604_v12  ;;  %v5694_v10 = vcombine.low %v593_v39, %v605_v41 }
 0x20f   : > { %v6287_v30 = vpop.f32.mrf.mxu0  ;;  %v6350_v31 = vpop.f32.mrf.mxu1  ;;  %4265 = vmatmul.mubr.bf16.gmra.mxu1 %v5646_v58  ;;  %v5719_v58 = vcombine.high %v617_v6, %v629_v7  ;;  %v5716_v12 = vcombine.low %v616_v61, %v628_v46  ;;  %v5718_v39 = vcombine.low %v617_v6, %v629_v7 }
 0x210   : > { %v8817_v34 = vadd.f32 %v6349_v27, %v3583_v25  ;;  %v6288_v1 = vadd.f32 %v6287_v30, %v6286_v21  ;;  %4272 = vmatprep.mubr.bf16.mxu1 %v5671_v20 }
 0x211   : > { %v6289_v14 = vpop.f32.mrf.mxu0  ;;  %v6351_v28 = vpop.f32.mrf.mxu1 }
 0x212   : > { %v3588_v19 = vadd.f32 %v6288_v1, %v8740_v60  ;;  %v6352_v43 = vadd.f32 %v6351_v28, %v6350_v31 }
 0x213   : > { %v6290_v45 = vpop.f32.mrf.mxu0  ;;  %v6353_v48 = vpop.f32.mrf.mxu1 }
 0x214   : > { %v8822_v49 = vadd.f32 %v6352_v43, %v3588_v19  ;;  %v6291_v50 = vadd.f32 %v6290_v45, %v6289_v14 }
 0x215   : > { %v6292_v52 = vpop.f32.mrf.mxu0  ;;  %v6354_v54 = vpop.f32.mrf.mxu1  ;;  %4176 = vmatmul.mubr.bf16.gmra.mxu0 %v5668_v36 }
 0x216   : > { %v3591_v56 = vadd.f32 %v6291_v50, %v8745_v8  ;;  %v6355_v57 = vadd.f32 %v6354_v54, %v6353_v48  ;;  %4183 = vmatprep.mubr.bf16.mxu0 %v5693_v42  ;;  %v5717_v8 = vcombine.high %v616_v61, %v628_v46 }
 0x217   : > { %v6293_v60 = vpop.f32.mrf.mxu0  ;;  %v6356_v59 = vpop.f32.mrf.mxu1  ;;  %4273 = vmatmul.mubr.bf16.gmra.mxu1 %v5670_v35 }
 0x218   : > { %v8827_v63 = vadd.f32 %v6355_v57, %v3591_v56  ;;  %v6294_v0 = vadd.f32 %v6293_v60, %v6292_v52  ;;  %4280 = vmatprep.mubr.bf16.mxu1 %v5695_v51 }
 0x219   : > { %v6295_v44 = vpop.f32.mrf.mxu0  ;;  %v6357_v2 = vpop.f32.mrf.mxu1 }
 0x21a   : > { %v3596_v9 = vadd.f32 %v6294_v0, %v8750_v24  ;;  %v6358_v11 = vadd.f32 %v6357_v2, %v6356_v59 }
 0x21b   : > { %v6296_v62 = vpop.f32.mrf.mxu0  ;;  %v6359_v13 = vpop.f32.mrf.mxu1 }
 0x21c   : > { %v8832_v15 = vadd.f32 %v6358_v11, %v3596_v9  ;;  %v6297_v16 = vadd.f32 %v6296_v62, %v6295_v44 }
 0x21d   : > { %v6298_v18 = vpop.f32.mrf.mxu0  ;;  %v6360_v20 = vpop.f32.mrf.mxu1  ;;  %4184 = vmatmul.mubr.bf16.gmra.mxu0 %v5692_v3 }
 0x21e   : > { %v3599_v21 = vadd.f32 %v6297_v16, %v8755_v38  ;;  %v6361_v23 = vadd.f32 %v6360_v20, %v6359_v13  ;;  %4191 = vmatprep.mubr.bf16.mxu0 %v5717_v8  ;;  %v4299_v13 = vld [vmem:[%s9417_s3 + $0x10] sm:$0xf] }
 0x21f   : > { %v6299_v25 = vpop.f32.mrf.mxu0  ;;  %v6362_v27 = vpop.f32.mrf.mxu1  ;;  %4281 = vmatmul.mubr.bf16.gmra.mxu1 %v5694_v10 }
 0x220   : > { %v8835_v24 = vadd.f32 %v6361_v23, %v3599_v21  ;;  %v6300_v30 = vadd.f32 %v6299_v25, %v6298_v18  ;;  %4288 = vmatprep.mubr.bf16.mxu1 %v5719_v58 }
 0x221   : > { %v6301_v31 = vpop.f32.mrf.mxu0  ;;  %v6363_v32 = vpop.f32.mrf.mxu1 }
 0x222   : > { %v3604_v1 = vadd.f32 %v6300_v30, %v8760_v55  ;;  %v6364_v14 = vadd.f32 %v6363_v32, %v6362_v27 }
 0x223   : > { %v6302_v28 = vpop.f32.mrf.mxu0  ;;  %v6365_v36 = vpop.f32.mrf.mxu1 }
 0x224   : > { %v8838_v41 = vadd.f32 %v6364_v14, %v3604_v1  ;;  %v6303_v38 = vadd.f32 %v6302_v28, %v6301_v31 }
 0x225   : > { %v6304_v19 = vpop.f32.mrf.mxu0  ;;  %v6366_v43 = vpop.f32.mrf.mxu1  ;;  %4192 = vmatmul.mubr.bf16.gmra.mxu0 %v5716_v12 }
 0x226   : > { %v3607_v42 = vadd.f32 %v6303_v38, %v8765_v5  ;;  %v6367_v45 = vadd.f32 %v6366_v43, %v6365_v36  ;;  %6841 = vmatprep.mubr.msk.f32.mxu0 %vm7584_vm1, %v7583_v29  ;;  %v4297_v5 = vld [vmem:[%s9417_s3] sm:$0xff] }
 0x227   : > { %v6305_v48 = vpop.f32.mrf.mxu0  ;;  %v6368_v35 = vpop.f32.mrf.mxu1  ;;  %4289 = vmatmul.mubr.bf16.gmra.mxu1 %v5718_v39 }
 0x228   : > { %v8843_v55 = vadd.f32 %v6367_v45, %v3607_v42  ;;  %v6306_v50 = vadd.f32 %v6305_v48, %v6304_v19 }
 0x229   : > { %v6307_v51 = vpop.f32.mrf.mxu0  ;;  %v6369_v52 = vpop.f32.mrf.mxu1 }
 0x22a   : > { %v3612_v54 = vadd.f32 %v6306_v50, %v8770_v22  ;;  %v6370_v56 = vadd.f32 %v6369_v52, %v6368_v35  ;;  %v4298_v22 = vld [vmem:[%s9417_s3 + $0x8] sm:$0xff] }
 0x22b   : > { %v6308_v57 = vpop.f32.mrf.mxu0  ;;  %v6371_v60 = vpop.f32.mrf.mxu1 }
 0x22c   : > { %v8849_v59 = vadd.f32 %v6370_v56, %v3612_v54  ;;  %v6309_v61 = vadd.f32 %v6308_v57, %v6307_v51 }
 0x22d   : > { %v6372_v46 = vpop.f32.mrf.mxu1  ;;  %v6390_v0 = vpop.f32.mrf.mxu0  ;;  %6842 = vmatmul.mubr.msk.f32.vlgmr.msra.gmra.mxu0 %vm4309_vm2, %v4297_v5 }
 0x22e   : > { %v3615_v44 = vadd.f32 %v6309_v61, %v8777_v37  ;;  %v6373_v2 = vadd.f32 %v6372_v46, %v6371_v60  ;;  %6844 = vmatprep.mubr.msk.f32.mxu0 %vm7584_vm1, %v7583_v29 }
 0x22f   : > { %v6391_v3 = vpop.f32.mrf.mxu0  ;;  %v6454_v6 = vpop.f32.mrf.mxu1 }
 0x230   : > { %v8858_v7 = vadd.f32 %v6373_v2, %v3615_v44  ;;  %v6392_v9 = vadd.f32 %v6391_v3, %v6390_v0 }
 0x231   : > { %v6393_v11 = vpop.f32.mrf.mxu0  ;;  %v6455_v8 = vpop.f32.mrf.mxu1  ;;  %6845 = vmatmul.mubr.msk.f32.gmra.mxu0 %vm4309_vm2, %v4298_v22 }
 0x232   : > { %v3750_v62 = vadd.f32 %v6392_v9, %v8782_v26  ;;  %v6456_v37 = vadd.f32 %v6455_v8, %v6454_v6  ;;  %6847 = vmatprep.mubr.msk.f32.mxu0 %vm7584_vm1, %v7583_v29 }
 0x233   : > { %v6394_v10 = vpop.f32.mrf.mxu0  ;;  %v6457_v16 = vpop.f32.mrf.mxu1 }
 0x234   : > { %v8867_v58 = vadd.f32 %v6456_v37, %v3750_v62  ;;  %v6395_v18 = vadd.f32 %v6394_v10, %v6393_v11 }
 0x235   : > { %v6396_v20 = vpop.f32.mrf.mxu0  ;;  %v6458_v21 = vpop.f32.mrf.mxu1  ;;  %6848 = vmatmul.mubr.msk.f32.gmra.mxu0 %vm4309_vm2, %v4299_v13 }
 0x236   : > { %v3753_v23 = vadd.f32 %v6395_v18, %v8787_v40  ;;  %v6459_v26 = vadd.f32 %v6458_v21, %v6457_v16 }
 0x237   : > { %v6397_v25 = vpop.f32.mrf.mxu0  ;;  %v6460_v27 = vpop.f32.mrf.mxu1 }
 0x238   : > { %v8871_v30 = vadd.f32 %v6459_v26, %v3753_v23  ;;  %v6398_v29 = vadd.f32 %v6397_v25, %v6396_v20 }
 0x239   : > { %v6399_v31 = vpop.f32.mrf.mxu0  ;;  %v6461_v32 = vpop.f32.mrf.mxu1 }
 0x23a   : > { %v3758_v12 = vadd.f32 %v6398_v29, %v8792_v53  ;;  %v6462_v1 = vadd.f32 %v6461_v32, %v6460_v27 }
 0x23b   : > { %v6400_v14 = vpop.f32.mrf.mxu0  ;;  %v6463_v28 = vpop.f32.mrf.mxu1 }
 0x23c   : > { %v8874_v36 = vadd.f32 %v6462_v1, %v3758_v12  ;;  %v6401_v39 = vadd.f32 %v6400_v14, %v6399_v31 }
 0x23d   : > { %v6402_v38 = vpop.f32.mrf.mxu0  ;;  %v6464_v19 = vpop.f32.mrf.mxu1 }
 0x23e   : > { %v3761_v40 = vadd.f32 %v6401_v39, %v8797_v4  ;;  %v6465_v43 = vadd.f32 %v6464_v19, %v6463_v28 }
 0x23f   : > { %v6403_v42 = vpop.f32.mrf.mxu0  ;;  %v6466_v45 = vpop.f32.mrf.mxu1 }
 0x240   : > { %v8877_v48 = vadd.f32 %v6465_v43, %v3761_v40  ;;  %v6404_v35 = vadd.f32 %v6403_v42, %v6402_v38 }
 0x241   : > { %v6405_v50 = vpop.f32.mrf.mxu0  ;;  %v6467_v51 = vpop.f32.mrf.mxu1 }
 0x242   : > { %v3766_v53 = vadd.f32 %v6404_v35, %v8802_v17  ;;  %v6468_v52 = vadd.f32 %v6467_v51, %v6466_v45 }
 0x243   : > { %v6406_v54 = vpop.f32.mrf.mxu0  ;;  %v6469_v56 = vpop.f32.mrf.mxu1 }
 0x244   : > { %v8880_v5 = vadd.f32 %v6468_v52, %v3766_v53  ;;  %v6407_v57 = vadd.f32 %v6406_v54, %v6405_v50 }
 0x245   : > { %v6408_v60 = vpop.f32.mrf.mxu0  ;;  %v6470_v61 = vpop.f32.mrf.mxu1 }
 0x246   : > { %v3769_v4 = vadd.f32 %v6407_v57, %v8807_v33  ;;  %v6471_v46 = vadd.f32 %v6470_v61, %v6469_v56 }
 0x247   : > { %v6409_v0 = vpop.f32.mrf.mxu0  ;;  %v6472_v44 = vpop.f32.mrf.mxu1 }
 0x248   : > { %v8883_v2 = vadd.f32 %v6471_v46, %v3769_v4  ;;  %v6410_v22 = vadd.f32 %v6409_v0, %v6408_v60 }
 0x249   : > { %v6411_v3 = vpop.f32.mrf.mxu0  ;;  %v6473_v6 = vpop.f32.mrf.mxu1 }
 0x24a   : > { %v3774_v17 = vadd.f32 %v6410_v22, %v8812_v47  ;;  %v6474_v9 = vadd.f32 %v6473_v6, %v6472_v44 }
 0x24b   : > { %v6412_v11 = vpop.f32.mrf.mxu0  ;;  %v6475_v8 = vpop.f32.mrf.mxu1 }
 0x24c   : > { %v8886_v62 = vadd.f32 %v6474_v9, %v3774_v17  ;;  %v6413_v37 = vadd.f32 %v6412_v11, %v6411_v3 }
 0x24d   : > { %v6414_v13 = vpop.f32.mrf.mxu0  ;;  %v6476_v10 = vpop.f32.mrf.mxu1 }
 0x24e   : > { %v3777_v33 = vadd.f32 %v6413_v37, %v8817_v34  ;;  %v6477_v16 = vadd.f32 %v6476_v10, %v6475_v8 }
 0x24f   : > { %v6415_v18 = vpop.f32.mrf.mxu0  ;;  %v6478_v20 = vpop.f32.mrf.mxu1 }
 0x250   : > { %v8889_v21 = vadd.f32 %v6477_v16, %v3777_v33  ;;  %v6416_v23 = vadd.f32 %v6415_v18, %v6414_v13 }
 0x251   : > { %v6417_v26 = vpop.f32.mrf.mxu0  ;;  %v6479_v25 = vpop.f32.mrf.mxu1 }
 0x252   : > { %v3782_v47 = vadd.f32 %v6416_v23, %v8822_v49  ;;  %v6480_v27 = vadd.f32 %v6479_v25, %v6478_v20 }
 0x253   : > { %v6418_v29 = vpop.f32.mrf.mxu0  ;;  %v6481_v31 = vpop.f32.mrf.mxu1 }
 0x254   : > { %v8892_v32 = vadd.f32 %v6480_v27, %v3782_v47  ;;  %v6419_v12 = vadd.f32 %v6418_v29, %v6417_v26 }
 0x255   : > { %v6420_v1 = vpop.f32.mrf.mxu0  ;;  %v6482_v14 = vpop.f32.mrf.mxu1 }
 0x256   : > { %v3785_v34 = vadd.f32 %v6419_v12, %v8827_v63  ;;  %v6483_v28 = vadd.f32 %v6482_v14, %v6481_v31 }
 0x257   : > { %v6421_v39 = vpop.f32.mrf.mxu0  ;;  %v6484_v38 = vpop.f32.mrf.mxu1 }
 0x258   : > { %v8895_v19 = vadd.f32 %v6483_v28, %v3785_v34  ;;  %v6422_v40 = vadd.f32 %v6421_v39, %v6420_v1 }
 0x259   : > { %v6423_v43 = vpop.f32.mrf.mxu0  ;;  %v6485_v42 = vpop.f32.mrf.mxu1 }
 0x25a   : > { %v3790_v49 = vadd.f32 %v6422_v40, %v8832_v15  ;;  %v6486_v45 = vadd.f32 %v6485_v42, %v6484_v38 }
 0x25b   : > { %v6424_v35 = vpop.f32.mrf.mxu0  ;;  %v6487_v50 = vpop.f32.mrf.mxu1 }
 0x25c   : > { %v8898_v51 = vadd.f32 %v6486_v45, %v3790_v49  ;;  %v6425_v53 = vadd.f32 %v6424_v35, %v6423_v43 }
 0x25d   : > { %v6426_v52 = vpop.f32.mrf.mxu0  ;;  %v6488_v54 = vpop.f32.mrf.mxu1 }
 0x25e   : > { %v3793_v63 = vadd.f32 %v6425_v53, %v8835_v24  ;;  %v6489_v56 = vadd.f32 %v6488_v54, %v6487_v50 }
 0x25f   : > { %v6427_v57 = vpop.f32.mrf.mxu0  ;;  %v6490_v60 = vpop.f32.mrf.mxu1 }
 0x260   : > { %v8901_v61 = vadd.f32 %v6489_v56, %v3793_v63  ;;  %v6428_v4 = vadd.f32 %v6427_v57, %v6426_v52 }
 0x261   : > { %v6429_v46 = vpop.f32.mrf.mxu0  ;;  %v6491_v0 = vpop.f32.mrf.mxu1 }
 0x262   : > { %v3798_v15 = vadd.f32 %v6428_v4, %v8838_v41  ;;  %v6492_v44 = vadd.f32 %v6491_v0, %v6490_v60 }
 0x263   : > { %v6430_v22 = vpop.f32.mrf.mxu0  ;;  %v6493_v3 = vpop.f32.mrf.mxu1 }
 0x264   : > { %v8904_v6 = vadd.f32 %v6492_v44, %v3798_v15  ;;  %v6431_v17 = vadd.f32 %v6430_v22, %v6429_v46 }
 0x265   : > { %v6432_v9 = vpop.f32.mrf.mxu0  ;;  %v6494_v11 = vpop.f32.mrf.mxu1 }
 0x266   : > { %v3801_v24 = vadd.f32 %v6431_v17, %v8843_v55  ;;  %v6495_v8 = vadd.f32 %v6494_v11, %v6493_v3 }
 0x267   : > { %v6433_v37 = vpop.f32.mrf.mxu0  ;;  %v6496_v13 = vpop.f32.mrf.mxu1 }
 0x268   : > { %v8907_v10 = vadd.f32 %v6495_v8, %v3801_v24  ;;  %v6434_v33 = vadd.f32 %v6433_v37, %v6432_v9 }
 0x269   : > { %v6435_v16 = vpop.f32.mrf.mxu0  ;;  %v6497_v18 = vpop.f32.mrf.mxu1 }
 0x26a   : > { %v3806_v41 = vadd.f32 %v6434_v33, %v8849_v59  ;;  %v6498_v20 = vadd.f32 %v6497_v18, %v6496_v13 }
 0x26b   : > { %v6436_v23 = vpop.f32.mrf.mxu0  ;;  %v6499_v26 = vpop.f32.mrf.mxu1 }
 0x26c   : > { %v8910_v25 = vadd.f32 %v6498_v20, %v3806_v41  ;;  %v6437_v47 = vadd.f32 %v6436_v23, %v6435_v16 }
 0x26d   : > { %v6500_v27 = vpop.f32.mrf.mxu1  ;;  %v8912_v29 = vpop.f32.mrf.mxu0 }
 0x26e   : > { %v3809_v55 = vadd.f32 %v6437_v47, %v8858_v7  ;;  %v6501_v31 = vadd.f32 %v6500_v27, %v6499_v26 }
 0x26f   : > { %v8915_v12 = vpop.f32.mrf.mxu0  ;;  %v8917_v1 = vpop.f32.mrf.mxu1 }
 0x270   : > { %v8919_v14 = vadd.f32 %v6501_v31, %v3809_v55 }
 0x271   : > { %v6521_v34 = vpop.f32.mrf.mxu0  ;;  %v8921_v59 = vpop.f32.mrf.mxu1 }
 0x273   : > { %v6522_v28 = vpop.f32.mrf.mxu0  ;;  %v6585_v39 = vpop.f32.mrf.mxu1 }
 0x274   : > { %v6523_v38 = vadd.f32 %v6522_v28, %v6521_v34 }
 0x275   : > { %v6524_v40 = vpop.f32.mrf.mxu0  ;;  %v6586_v43 = vpop.f32.mrf.mxu1 }
 0x276   : > { %v3947_v42 = vadd.f32 %v6523_v38, %v8871_v30  ;;  %v6587_v49 = vadd.f32 %v6586_v43, %v6585_v39 }
 0x277   : > { %v6525_v45 = vpop.f32.mrf.mxu0  ;;  %v6588_v7 = vpop.f32.mrf.mxu1 }
 0x278   : > { %v8924_v35 = vadd.f32 %v6587_v49, %v3947_v42  ;;  %v6526_v50 = vadd.f32 %v6525_v45, %v6524_v40 }
 0x279   : > { %v6527_v53 = vpop.f32.mrf.mxu0  ;;  %v6589_v52 = vpop.f32.mrf.mxu1 }
 0x27a   : > { %v3952_v54 = vadd.f32 %v6526_v50, %v8874_v36  ;;  %v6590_v63 = vadd.f32 %v6589_v52, %v6588_v7 }
 0x27b   : > { %v6528_v56 = vpop.f32.mrf.mxu0  ;;  %v6591_v57 = vpop.f32.mrf.mxu1 }
 0x27c   : > { %v8927_v60 = vadd.f32 %v6590_v63, %v3952_v54  ;;  %v6529_v4 = vadd.f32 %v6528_v56, %v6527_v53 }
 0x27d   : > { %v6530_v46 = vpop.f32.mrf.mxu0  ;;  %v6592_v0 = vpop.f32.mrf.mxu1 }
 0x27e   : > { %v3955_v30 = vadd.f32 %v6529_v4, %v8877_v48  ;;  %v6593_v15 = vadd.f32 %v6592_v0, %v6591_v57 }
 0x27f   : > { %v6531_v44 = vpop.f32.mrf.mxu0  ;;  %v6594_v22 = vpop.f32.mrf.mxu1 }
 0x280   : > { %v8930_v3 = vadd.f32 %v6593_v15, %v3955_v30  ;;  %v6532_v17 = vadd.f32 %v6531_v44, %v6530_v46 }
 0x281   : > { %v6533_v9 = vpop.f32.mrf.mxu0  ;;  %v6595_v11 = vpop.f32.mrf.mxu1 }
 0x282   : > { %v3960_v36 = vadd.f32 %v6532_v17, %v8880_v5  ;;  %v6596_v24 = vadd.f32 %v6595_v11, %v6594_v22 }
 0x283   : > { %v6534_v8 = vpop.f32.mrf.mxu0  ;;  %v6597_v37 = vpop.f32.mrf.mxu1 }
 0x284   : > { %v8933_v13 = vadd.f32 %v6596_v24, %v3960_v36  ;;  %v6535_v33 = vadd.f32 %v6534_v8, %v6533_v9 }
 0x285   : > { %v6536_v16 = vpop.f32.mrf.mxu0  ;;  %v6598_v18 = vpop.f32.mrf.mxu1 }
 0x286   : > { %v3963_v48 = vadd.f32 %v6535_v33, %v8883_v2  ;;  %v6599_v41 = vadd.f32 %v6598_v18, %v6597_v37 }
 0x287   : > { %v6537_v20 = vpop.f32.mrf.mxu0  ;;  %v6600_v23 = vpop.f32.mrf.mxu1 }
 0x288   : > { %v8936_v26 = vadd.f32 %v6599_v41, %v3963_v48  ;;  %v6538_v47 = vadd.f32 %v6537_v20, %v6536_v16 }
 0x289   : > { %v6539_v27 = vpop.f32.mrf.mxu0  ;;  %v6601_v55 = vpop.f32.mrf.mxu1 }
 0x28a   : > { %v3968_v5 = vadd.f32 %v6538_v47, %v8886_v62  ;;  %v6602_v31 = vadd.f32 %v6601_v55, %v6600_v23 }
 0x28b   : > { %v6540_v34 = vpop.f32.mrf.mxu0  ;;  %v6603_v28 = vpop.f32.mrf.mxu1 }
 0x28c   : > { %v8939_v39 = vadd.f32 %v6602_v31, %v3968_v5  ;;  %v6541_v38 = vadd.f32 %v6540_v34, %v6539_v27 }
 0x28d   : > { %v6542_v40 = vpop.f32.mrf.mxu0  ;;  %v6604_v43 = vpop.f32.mrf.mxu1 }
 0x28e   : > { %v3971_v2 = vadd.f32 %v6541_v38, %v8889_v21  ;;  %v6605_v42 = vadd.f32 %v6604_v43, %v6603_v28 }
 0x28f   : > { %v6543_v49 = vpop.f32.mrf.mxu0  ;;  %v6606_v45 = vpop.f32.mrf.mxu1 }
 0x290   : > { %v8942_v7 = vadd.f32 %v6605_v42, %v3971_v2  ;;  %v6544_v50 = vadd.f32 %v6543_v49, %v6542_v40 }
 0x291   : > { %v6545_v53 = vpop.f32.mrf.mxu0  ;;  %v6607_v52 = vpop.f32.mrf.mxu1 }
 0x292   : > { %v3976_v62 = vadd.f32 %v6544_v50, %v8892_v32  ;;  %v6608_v54 = vadd.f32 %v6607_v52, %v6606_v45  ;;  %v6520_v45 = vadd.f32 %v8915_v12, %v8912_v29 }
 0x293   : > { %v6546_v63 = vpop.f32.mrf.mxu0  ;;  %v6609_v56 = vpop.f32.mrf.mxu1 }
 0x294   : > { %v8945_v57 = vadd.f32 %v6608_v54, %v3976_v62  ;;  %v6547_v4 = vadd.f32 %v6546_v63, %v6545_v53 }
 0x295   : > { %v6548_v46 = vpop.f32.mrf.mxu0  ;;  %v6610_v0 = vpop.f32.mrf.mxu1 }
 0x296   : > { %v3979_v21 = vadd.f32 %v6547_v4, %v8895_v19  ;;  %v6611_v30 = vadd.f32 %v6610_v0, %v6609_v56  ;;  %v3944_v4 = vadd.f32 %v6520_v45, %v8867_v58 }
 0x297   : > { %v6549_v15 = vpop.f32.mrf.mxu0  ;;  %v6612_v44 = vpop.f32.mrf.mxu1 }
 0x298   : > { %v8948_v22 = vadd.f32 %v6611_v30, %v3979_v21  ;;  %v6550_v17 = vadd.f32 %v6549_v15, %v6548_v46 }
 0x299   : > { %v6551_v9 = vpop.f32.mrf.mxu0  ;;  %v6613_v11 = vpop.f32.mrf.mxu1 }
 0x29a   : > { %v3984_v32 = vadd.f32 %v6550_v17, %v8898_v51  ;;  %v6614_v36 = vadd.f32 %v6613_v11, %v6612_v44 }
 0x29b   : > { %v6552_v24 = vpop.f32.mrf.mxu0  ;;  %v6615_v8 = vpop.f32.mrf.mxu1 }
 0x29c   : > { %v8951_v37 = vadd.f32 %v6614_v36, %v3984_v32  ;;  %v6553_v33 = vadd.f32 %v6552_v24, %v6551_v9 }
 0x29d   : > { %v6554_v16 = vpop.f32.mrf.mxu0  ;;  %v6616_v18 = vpop.f32.mrf.mxu1 }
 0x29e   : > { %v3987_v19 = vadd.f32 %v6553_v33, %v8901_v61  ;;  %v6617_v48 = vadd.f32 %v6616_v18, %v6615_v8 }
 0x29f   : > { %v6555_v41 = vpop.f32.mrf.mxu0  ;;  %v6618_v20 = vpop.f32.mrf.mxu1 }
 0x2a0   : > { %v8954_v23 = vadd.f32 %v6617_v48, %v3987_v19  ;;  %v6556_v47 = vadd.f32 %v6555_v41, %v6554_v16 }
 0x2a1   : > { %v6557_v27 = vpop.f32.mrf.mxu0  ;;  %v6619_v55 = vpop.f32.mrf.mxu1 }
 0x2a2   : > { %v3992_v51 = vadd.f32 %v6556_v47, %v8904_v6  ;;  %v6620_v5 = vadd.f32 %v6619_v55, %v6618_v20 }
 0x2a3   : > { %v6558_v31 = vpop.f32.mrf.mxu0  ;;  %v6621_v34 = vpop.f32.mrf.mxu1 }
 0x2a4   : > { %v8957_v28 = vadd.f32 %v6620_v5, %v3992_v51  ;;  %v6559_v38 = vadd.f32 %v6558_v31, %v6557_v27 }
 0x2a5   : > { %v6560_v40 = vpop.f32.mrf.mxu0  ;;  %v6622_v43 = vpop.f32.mrf.mxu1 }
 0x2a6   : > { %v3995_v61 = vadd.f32 %v6559_v38, %v8907_v10  ;;  %v6623_v2 = vadd.f32 %v6622_v43, %v6621_v34  ;;  %v6584_v10 = vadd.f32 %v8921_v59, %v8917_v1 }
 0x2a7   : > { %v6561_v42 = vpop.f32.mrf.mxu0  ;;  %v6624_v49 = vpop.f32.mrf.mxu1 }
 0x2a8   : > { %v8962_v50 = vadd.f32 %v6623_v2, %v3995_v61  ;;  %v6562_v53 = vadd.f32 %v6561_v42, %v6560_v40  ;;  %v4041_v17 = vadd.f32 %v6584_v10, %v3944_v4 }
 0x2a9   : > { %v6563_v6 = vpop.f32.mrf.mxu0  ;;  %v6625_v52 = vpop.f32.mrf.mxu1 }
 0x2aa   : > { %v4000_v62 = vadd.f32 %v6562_v53, %v8910_v25  ;;  %v6626_v54 = vadd.f32 %v6625_v52, %v6624_v49 }
 0x2ab   : > { %v6564_v63 = vpop.f32.mrf.mxu0  ;;  %v6627_v56 = vpop.f32.mrf.mxu1 }
 0x2ac   : > { %v8968_v46 = vadd.f32 %v6626_v54, %v4000_v62  ;;  %v6565_v0 = vadd.f32 %v6564_v63, %v6563_v6 }
 0x2ad   : > { %v6628_v21 = vpop.f32.mrf.mxu1  ;;  %v6646_v29 = vpop.f32.mrf.mxu0 }
 0x2ae   : > { %v4003_v12 = vadd.f32 %v6565_v0, %v8919_v14  ;;  %v6629_v30 = vadd.f32 %v6628_v21, %v6627_v56 }
 0x2af   : > { %v6647_v15 = vpop.f32.mrf.mxu0  ;;  %v6710_v44 = vpop.f32.mrf.mxu1 }
 0x2b0   : > { %v8971_v25 = vadd.f32 %v6629_v30, %v4003_v12  ;;  %v6648_v9 = vadd.f32 %v6647_v15, %v6646_v29 }
 0x2b1   : > { %v6649_v11 = vpop.f32.mrf.mxu0  ;;  %v6711_v32 = vpop.f32.mrf.mxu1 }
 0x2b2   : > { %v4138_v58 = vadd.f32 %v6648_v9, %v4041_v17  ;;  %v6712_v36 = vadd.f32 %v6711_v32, %v6710_v44 }
 0x2b3   : > { %v6650_v24 = vpop.f32.mrf.mxu0  ;;  %v8973_v1 = vpop.f32.mrf.mxu1 }
 0x2b4   : > { %v8975_v59 = vadd.f32 %v6712_v36, %v4138_v58  ;;  %v6651_v8 = vadd.f32 %v6650_v24, %v6649_v11 }
 0x2b5   : > { %v6652_v33 = vpop.f32.mrf.mxu0  ;;  %v8977_v16 = vpop.f32.mrf.mxu1 }
 0x2b6   : > { %9440 = vst [vmem:[#allocation17_spill] sm:$0xff] %v8975_v59  ;;  %v8980_v14 = vadd.f32 %v6651_v8, %v8924_v35  ;;  %6856 = vmatprep.mubr.msk.f32.mxu1 %vm4309_vm2, %v8975_v59 }
 0x2b7   : > { %v6653_v18 = vpop.f32.mrf.mxu0  ;;  %v8984_v19 = vpop.f32.mrf.mxu1 }
 0x2b8   : > { %v6654_v48 = vadd.f32 %v6653_v18, %v6652_v33 }
 0x2b9   : > { %v6655_v41 = vpop.f32.mrf.mxu0  ;;  %v8986_v20 = vpop.f32.mrf.mxu1 }
 0x2ba   : > { %v8989_v47 = vadd.f32 %v6654_v48, %v8927_v60 }
 0x2bb   : > { %v6656_v27 = vpop.f32.mrf.mxu0  ;;  %v8991_v55 = vpop.f32.mrf.mxu1 }
 0x2bc   : > { %v6657_v51 = vadd.f32 %v6656_v27, %v6655_v41 }
 0x2bd   : > { %v6658_v5 = vpop.f32.mrf.mxu0  ;;  %v8993_v35 = vpop.f32.mrf.mxu1 }
 0x2be   : > { %v8996_v31 = vadd.f32 %v6657_v51, %v8930_v3 }
 0x2bf   : > { %v6659_v34 = vpop.f32.mrf.mxu0  ;;  %v8998_v38 = vpop.f32.mrf.mxu1 }
 0x2c0   : > { %v6660_v40 = vadd.f32 %v6659_v34, %v6658_v5 }
 0x2c1   : > { %v6661_v43 = vpop.f32.mrf.mxu0  ;;  %v9000_v61 = vpop.f32.mrf.mxu1 }
 0x2c2   : > { %v9003_v60 = vadd.f32 %v6660_v40, %v8933_v13 }
 0x2c3   : > { %v6662_v2 = vpop.f32.mrf.mxu0  ;;  %v9005_v42 = vpop.f32.mrf.mxu1 }
 0x2c4   : > { %v6663_v49 = vadd.f32 %v6662_v2, %v6661_v43 }
 0x2c5   : > { %v6664_v45 = vpop.f32.mrf.mxu0  ;;  %v9010_v3 = vpop.f32.mrf.mxu1 }
 0x2c6   : > { %v9008_v53 = vadd.f32 %v6663_v49, %v8936_v26  ;;  %v5912_v49 = vld [vmem:[#allocation7] ss:$0 sm:$0xff] }
 0x2c7   : > { %v6665_v6 = vpop.f32.mrf.mxu0  ;;  %v6728_v63 = vpop.f32.mrf.mxu1 }
 0x2c8   : > { %v6666_v52 = vadd.f32 %v6665_v6, %v6664_v45 }
 0x2c9   : > { %v6667_v62 = vpop.f32.mrf.mxu0  ;;  %v6729_v0 = vpop.f32.mrf.mxu1 }
 0x2ca   : > { %v9013_v54 = vadd.f32 %v6666_v52, %v8939_v39 }
 0x2cb   : > { %v6668_v56 = vpop.f32.mrf.mxu0  ;;  %v6731_v26 = vpop.f32.mrf.mxu1 }
 0x2cc   : > { %v6669_v13 = vadd.f32 %v6668_v56, %v6667_v62 }
 0x2cd   : > { %v6670_v4 = vpop.f32.mrf.mxu0  ;;  %v6732_v15 = vpop.f32.mrf.mxu1 }
 0x2ce   : > { %v9016_v10 = vadd.f32 %v6669_v13, %v8942_v7 }
 0x2cf   : > { %v6671_v21 = vpop.f32.mrf.mxu0  ;;  %v6734_v9 = vpop.f32.mrf.mxu1 }
 0x2d1   : > { %v6673_v29 = vpop.f32.mrf.mxu0  ;;  %v6735_v32 = vpop.f32.mrf.mxu1 }
 0x2d3   : > { %v6674_v12 = vpop.f32.mrf.mxu0  ;;  %v6737_v36 = vpop.f32.mrf.mxu1 }
 0x2d5   : > { %v6676_v30 = vpop.f32.mrf.mxu0  ;;  %v6738_v33 = vpop.f32.mrf.mxu1 }
 0x2d7   : > { %v6677_v44 = vpop.f32.mrf.mxu0  ;;  %v6740_v41 = vpop.f32.mrf.mxu1 }
 0x2d9   : > { %v9018_v17 = vpop.f32.mrf.mxu0  ;;  %v6741_v5 = vpop.f32.mrf.mxu1 }
 0x2db   : > { %v9020_v39 = vpop.f32.mrf.mxu0  ;;  %v6743_v43 = vpop.f32.mrf.mxu1 }
 0x2dd   : > { %v9022_v11 = vpop.f32.mrf.mxu0  ;;  %v6744_v52 = vpop.f32.mrf.mxu1 }
 0x2df   : > { %v9024_v58 = vpop.f32.mrf.mxu0  ;;  %v6746_v13 = vpop.f32.mrf.mxu1 }
 0x2e1   : > { %v9026_v7 = vpop.f32.mrf.mxu0 }
 0x2e3   : > { %v9028_v24 = vpop.f32.mrf.mxu0 }
 0x2e5   : > { %v9030_v8 = vpop.f32.mrf.mxu0 }
 0x2e7   : > { %v9032_v18 = vpop.f32.mrf.mxu0 }
 0x2e9   : > { %v9034_v48 = vpop.f32.mrf.mxu0 }
 0x2eb   : > { %v9036_v27 = vpop.f32.mrf.mxu0 }
 0x2ed   : > { %v4389_v51 = vpop.f32.mrf.mxu0 }
 0x2ee   : > { %v4390_v59 = vadd.f32 %v5912_v49, %v4389_v51 }
 0x2ef   : > { %v6843_v34 = vpop.f32.mrf.mxu0 }
 0x2f0   : > { %v6715_v34 = vadd.f32 %v8977_v16, %v8973_v1  ;;  %v6724_v1 = vadd.f32 %v9000_v61, %v8998_v38  ;;  %v6675_v38 = vadd.f32 %v6674_v12, %v6673_v29  ;;  %v6742_v29 = vadd.f32 %v6741_v5, %v6740_v41 }
 0x2f1   : > { %v4394_v40 = vpop.f32.mrf.mxu0 }
 0x2f2   : > { %v4395_v56 = vadd.f32 %v5912_v49, %v4394_v40  ;;  %v9049_v40 = vadd.f32 %v6715_v34, %v8980_v14  ;;  %v6727_v14 = vadd.f32 %v9010_v3, %v9005_v42  ;;  %v6736_v42 = vadd.f32 %v6735_v32, %v6734_v9 }
 0x2f3   : > { %v6846_v2 = vpop.f32.mrf.mxu0  ;;  %v6678_v3 = vadd.f32 %v6677_v44, %v6676_v30  ;;  %v6745_v30 = vadd.f32 %v6744_v52, %v6743_v43  ;;  %v6690_v9 = vadd.f32 %v9032_v18, %v9030_v8 }
 0x2f4   : > { %v6718_v2 = vadd.f32 %v8986_v20, %v8984_v19  ;;  %v9068_v19 = vadd.f32 %v6724_v1, %v9003_v60  ;;  %v6730_v20 = vadd.f32 %v6729_v0, %v6728_v63  ;;  %v6739_v0 = vadd.f32 %v6738_v33, %v6737_v36 }
 0x2f5   : > { %v4399_v45 = vpop.f32.mrf.mxu0 }
 0x2f6   : > { %v4400_v6 = vadd.f32 %v5912_v49, %v4399_v45  ;;  %v6747_v45 = vpop.f32.mrf.mxu1  ;;  %v9054_v51 = vadd.f32 %v6718_v2, %v8989_v47  ;;  %v6672_v47 = vadd.f32 %v6671_v21, %v6670_v4  ;;  %v9078_v61 = vadd.f32 %v6730_v20, %v9013_v54 }
 0x2f7   : > { %v6849_v62 = vpop.f32.mrf.mxu0  ;;  %v6681_v54 = vadd.f32 %v9020_v39, %v9018_v17  ;;  %v6748_v17 = vadd.f32 %v6747_v45, %v6746_v13 }
 0x2f8   : > { %6850 = vmatprep.subr.msk.mxu1 %vm4309_vm2, %v4400_v6  ;;  %v6749_v16 = vpop.f32.mrf.mxu1  ;;  %v4170_v60 = vadd.f32 %v6672_v47, %v8945_v57  ;;  %v4178_v57 = vadd.f32 %v6678_v3, %v8951_v37 }
 0x2f9   : > { %6851 = vmatpush3.xpose.msk.msra.mxu1 %vm4309_vm2, %v4400_v6  ;;  %v6721_v6 = vadd.f32 %v8993_v35, %v8991_v55  ;;  %v9075_v35 = vadd.f32 %v6727_v14, %v9008_v53  ;;  %v4173_v53 = vadd.f32 %v6675_v38, %v8948_v22 }
 0x2fa   : > { %6852 = vmatprep.subr.msk.mxu1 %vm4309_vm2, %v4395_v56  ;;  %v6750_v55 = vpop.f32.mrf.mxu1  ;;  %v9091_v21 = vadd.f32 %v6736_v42, %v4170_v60  ;;  %v9105_v37 = vadd.f32 %v6742_v29, %v4178_v57 }
 0x2fb   : > { %v9100_v22 = vadd.f32 %v6739_v0, %v4173_v53  ;;  %v6751_v32 = vadd.f32 %v6750_v55, %v6749_v16 }
 0x2fc   : > { %v6752_v63 = vpop.f32.mrf.mxu1 }
 0x2fd   : > { %6853 = vmatpush3.xpose.msk.msra.mxu1 %vm4309_vm2, %v4395_v56 }
 0x2fe   : > { %6854 = vmatprep.subr.msk.mxu1 %vm4309_vm2, %v4390_v59  ;;  %v6753_v12 = vpop.f32.mrf.mxu1 }
 0x2ff   : > { %v6754_v36 = vadd.f32 %v6753_v12, %v6752_v63 }
 0x300   : > { %v6755_v39 = vpop.f32.mrf.mxu1 }
 0x301   : > { %6855 = vmatpush3.xpose.msk.msra.mxu1 %vm4309_vm2, %v4390_v59  ;;  %v9063_v59 = vadd.f32 %v6721_v6, %v8996_v31  ;;  %v6733_v31 = vadd.f32 %v6732_v15, %v6731_v26  ;;  %v6684_v26 = vadd.f32 %v9024_v58, %v9022_v11  ;;  %v6687_v15 = vadd.f32 %v9028_v24, %v9026_v7 }
 0x302   : > { %v6693_v58 = vadd.f32 %v9036_v27, %v9034_v48  ;;  %v4194_v7 = vadd.f32 %v6690_v9, %v8968_v46  ;;  %v6756_v24 = vpop.f32.mrf.mxu1 }
 0x303   : > { %v9086_v4 = vadd.f32 %v6733_v31, %v9016_v10  ;;  %v4181_v10 = vadd.f32 %v6681_v54, %v8954_v23  ;;  %v4186_v44 = vadd.f32 %v6684_v26, %v8957_v28  ;;  %v4189_v11 = vadd.f32 %v6687_v15, %v8962_v50 }
 0x304   : > { %6857 = vmatmul.mubr.msk.f32.vlgmr.msra.gmra.mxu1 %vm4309_vm2, %v9049_v40  ;;  %v4197_v50 = vadd.f32 %v6693_v58, %v8971_v25  ;;  %v6757_v33 = vadd.f32 %v6756_v24, %v6755_v39  ;;  %v9129_v18 = vadd.f32 %v6754_v36, %v4194_v7 }
 0x305   : > { %6859 = vmatprep.mubr.msk.f32.mxu1 %vm4309_vm2, %v9054_v51  ;;  %v9114_v23 = vadd.f32 %v6745_v30, %v4181_v10  ;;  %v9119_v28 = vadd.f32 %v6748_v17, %v4186_v44  ;;  %v9126_v8 = vadd.f32 %v6751_v32, %v4189_v11 }
 0x306   : > { %v9135_v46 = vadd.f32 %v6757_v33, %v4197_v50 }
 0x308   : > { %6860 = vmatmul.mubr.msk.f32.gmra.mxu1 %vm4309_vm2, %v9063_v59 }
 0x309   : > { %6862 = vmatprep.mubr.msk.f32.mxu1 %vm4309_vm2, %v9068_v19 }
 0x30c   : > { %6863 = vmatmul.mubr.msk.f32.gmra.mxu1 %vm4309_vm2, %v9075_v35 }
 0x30d   : > { %6865 = vmatprep.mubr.msk.f32.mxu1 %vm4309_vm2, %v9078_v61 }
 0x310   : > { %6866 = vmatmul.mubr.msk.f32.gmra.mxu1 %vm4309_vm2, %v9086_v4 }
 0x311   : > { %6868 = vmatprep.mubr.msk.f32.mxu1 %vm4309_vm2, %v9091_v21 }
 0x314   : > { %6869 = vmatmul.mubr.msk.f32.gmra.mxu1 %vm4309_vm2, %v9100_v22 }
 0x315   : > { %6871 = vmatprep.mubr.msk.f32.mxu1 %vm4309_vm2, %v9105_v37 }
 0x318   : > { %6872 = vmatmul.mubr.msk.f32.gmra.mxu1 %vm4309_vm2, %v9114_v23 }
 0x319   : > { %6874 = vmatprep.mubr.msk.f32.mxu1 %vm4309_vm2, %v9119_v28 }
 0x31c   : > { %6875 = vmatmul.mubr.msk.f32.gmra.mxu1 %vm4309_vm2, %v9126_v8 }
 0x31d   : > { %6877 = vmatprep.mubr.msk.f32.mxu1 %vm4309_vm2, %v9129_v18 }
 0x320   : > { %6878 = vmatmul.mubr.msk.f32.gmra.mxu1 %vm4309_vm2, %v9135_v46 }
 0x3c4   : > { %v6858_v48 = vpop.f32.mrf.mxu1 }
 0x3c5   : > { %v4609_v43 = vsel %vm4605_vm3, %v6858_v48, -inf }
 0x3c6   : > { %v4526_v41 = vpop.f32.mrf.mxu1 }
 0x3c7   : > { %v4606_v27 = vsel %vm4605_vm3, %v4526_v41, -inf }
 0x3c8   : > { %4607 = vmax.xlane.f32.xlu0 %v4606_v27  ;;  %v6861_v25 = vpop.f32.mrf.mxu1 }
 0x3c9   : > { %v4615_v56 = vsel %vm4605_vm3, %v6861_v25, -inf }
 0x3ca   : > { %v4536_v5 = vpop.f32.mrf.mxu1 }
 0x3cb   : > { %v4612_v49 = vsel %vm4605_vm3, %v4536_v5, -inf }
 0x3cc   : > { %4610 = vmax.xlane.f32.xlu0 %v4609_v43  ;;  %4613 = vmax.xlane.f32.xlu1 %v4612_v49  ;;  %v6864_v52 = vpop.f32.mrf.mxu1 }
 0x3cd   : > { %v4621_v45 = vsel %vm4605_vm3, %v6864_v52, -inf }
 0x3ce   : > { %v4546_v62 = vpop.f32.mrf.mxu1 }
 0x3cf   : > { %v4618_v13 = vsel %vm4605_vm3, %v4546_v62, -inf }
 0x3d0   : > { %4616 = vmax.xlane.f32.xlu1 %v4615_v56  ;;  %4619 = vmax.xlane.f32.xlu0 %v4618_v13  ;;  %v9144_v34 = vpop.f32.mrf.mxu1 }
 0x3d1   : > { %v4627_v14 = vsel %vm4605_vm3, %v9144_v34, -inf }
 0x3d2   : > { %v4556_v2 = vpop.f32.mrf.mxu1 }
 0x3d3   : > { %v4624_v6 = vsel %vm4605_vm3, %v4556_v2, -inf }
 0x3d4   : > { %4622 = vmax.xlane.f32.xlu1 %v4621_v45  ;;  %4625 = vmax.xlane.f32.xlu0 %v4624_v6  ;;  %v9148_v1 = vpop.f32.mrf.mxu1 }
 0x3d5   : > { %v4633_v31 = vsel %vm4605_vm3, %v9148_v1, -inf }
 0x3d6   : > { %v4566_v16 = vpop.f32.mrf.mxu1 }
 0x3d7   : > { %v4630_v20 = vsel %vm4605_vm3, %v4566_v16, -inf }
 0x3d8   : > { %4628 = vmax.xlane.f32.xlu1 %v4627_v14  ;;  %4631 = vmax.xlane.f32.xlu0 %v4630_v20  ;;  %v9153_v47 = vpop.f32.mrf.mxu1 }
 0x3d9   : > { %v4639_v3 = vsel %vm4605_vm3, %v9153_v47, -inf }
 0x3da   : > { %v9155_v55 = vpop.f32.mrf.mxu1 }
 0x3db   : > { %v4636_v38 = vsel %vm4605_vm3, %v9155_v55, -inf }
 0x3dc   : > { %4634 = vmax.xlane.f32.xlu1 %v4633_v31  ;;  %4637 = vmax.xlane.f32.xlu0 %v4636_v38  ;;  %v9161_v60 = vpop.f32.mrf.mxu1 }
 0x3dd   : > { %v4645_v54 = vsel %vm4605_vm3, %v9161_v60, -inf }
 0x3de   : > { %v9163_v42 = vpop.f32.mrf.mxu1 }
 0x3df   : > { %v4642_v63 = vsel %vm4605_vm3, %v9163_v42, -inf }
 0x3e0   : > { %4640 = vmax.xlane.f32.xlu1 %v4639_v3  ;;  %4643 = vmax.xlane.f32.xlu0 %v4642_v63  ;;  %v9169_v53 = vpop.f32.mrf.mxu1 }
 0x3e1   : > { %v4651_v29 = vsel %vm4605_vm3, %v9169_v53, -inf }
 0x3e2   : > { %v9171_v0 = vpop.f32.mrf.mxu1 }
 0x3e3   : > { %v4648_v57 = vsel %vm4605_vm3, %v9171_v0, -inf }
 0x3e4   : > { %4646 = vmax.xlane.f32.xlu1 %v4645_v54  ;;  %4649 = vmax.xlane.f32.xlu0 %v4648_v57 }
 0x3e8   : > { %4652 = vmax.xlane.f32.xlu1 %v4651_v29 }
 0x451   : > { %v4608_v26 = vpop.xlane.xlu0 %4607 }
 0x452   : > { %v4654_v12 = vsub.f32 %v4526_v41, %v4608_v26 }
 0x454   : > { %v4670_v10 = vmul.f32 1.442695, %v4654_v12 }
 0x455   : > { %v4611_v30 = vpop.xlane.xlu0 %4610  ;;  %v4614_v15 = vpop.xlane.xlu1 %4613 }
 0x456   : > { %7273 = vpow2.f32 %v4670_v10  ;;  %v4655_v44 = vsub.f32 %v6858_v48, %v4611_v30  ;;  %v4656_v17 = vsub.f32 %v4536_v5, %v4614_v15 }
 0x458   : > { %v4672_v9 = vmul.f32 1.442695, %v4655_v44  ;;  %v4674_v39 = vmul.f32 1.442695, %v4656_v17 }
 0x459   : > { %v4617_v11 = vpop.xlane.xlu1 %4616  ;;  %v4620_v32 = vpop.xlane.xlu0 %4619 }
 0x45a   : > { %7275 = vpow2.f32 %v4672_v9  ;;  %v4657_v58 = vsub.f32 %v6861_v25, %v4617_v11  ;;  %v4658_v7 = vsub.f32 %v4546_v62, %v4620_v32 }
 0x45b   : > { %7277 = vpow2.f32 %v4674_v39 }
 0x45c   : > { %v4676_v36 = vmul.f32 1.442695, %v4657_v58  ;;  %v4678_v24 = vmul.f32 1.442695, %v4658_v7 }
 0x45d   : > { %v4623_v50 = vpop.xlane.xlu1 %4622  ;;  %v4626_v33 = vpop.xlane.xlu0 %4625 }
 0x45e   : > { %7279 = vpow2.f32 %v4676_v36  ;;  %v4659_v41 = vsub.f32 %v6864_v52, %v4623_v50  ;;  %v4660_v27 = vsub.f32 %v4556_v2, %v4626_v33 }
 0x45f   : > { %7281 = vpow2.f32 %v4678_v24 }
 0x460   : > { %v4680_v43 = vmul.f32 1.442695, %v4659_v41  ;;  %v4682_v49 = vmul.f32 1.442695, %v4660_v27 }
 0x461   : > { %v4629_v48 = vpop.xlane.xlu1 %4628  ;;  %v4632_v5 = vpop.xlane.xlu0 %4631 }
 0x462   : > { %7283 = vpow2.f32 %v4680_v43  ;;  %v4661_v56 = vsub.f32 %v9144_v34, %v4629_v48  ;;  %v4662_v13 = vsub.f32 %v4566_v16, %v4632_v5 }
 0x463   : > { %v9180_v45 = vpop.eup %7273  ;;  %7285 = vpow2.f32 %v4682_v49 }
 0x464   : > { %v4684_v25 = vmul.f32 1.442695, %v4661_v56  ;;  %v4686_v62 = vmul.f32 1.442695, %v4662_v13  ;;  %v4702_v6 = vsel %vm4605_vm3, %v9180_v45, 0.0 }
 0x465   : > { %v4635_v14 = vpop.xlane.xlu1 %4634  ;;  %v4638_v52 = vpop.xlane.xlu0 %4637  ;;  %4703 = vadd.xlane.f32.xlu0 %v4702_v6 }
 0x466   : > { %7287 = vpow2.f32 %v4684_v25  ;;  %v4663_v2 = vsub.f32 %v9148_v1, %v4635_v14  ;;  %v4664_v20 = vsub.f32 %v9155_v55, %v4638_v52  ;;  %v7337_v25 = vld [vmem:[%s9417_s3 + $0x10] sm:$0xf]  ;;  %v7338_v52 = vld [vmem:[%s9417_s3 + $0x8] sm:$0xff] }
 0x467   : > { %v9186_v31 = vpop.eup %7275  ;;  %7289 = vpow2.f32 %v4686_v62  ;;  %6880 = vmatprep.subr.msk.mxu0 %vm4830_vm4, %v7337_v25  ;;  %6966 = vmatprep.subr.msk.mxu1 %vm4830_vm4, %v7337_v25 }
 0x468   : > { %v9188_v34 = vpop.eup %7277  ;;  %v4688_v16 = vmul.f32 1.442695, %v4663_v2  ;;  %v4690_v38 = vmul.f32 1.442695, %v4664_v20  ;;  %v4705_v3 = vsel %vm4605_vm3, %v9186_v31, 0.0  ;;  %6881 = vmatpush3.msk.msra.mxu0 %vm4830_vm4, %v7337_v25  ;;  %6969 = vmatpush3.msk.msra.mxu1 %vm4830_vm4, %v7337_v25  ;;  %v7339_v20 = vld [vmem:[%s9417_s3] sm:$0xff] }
 0x469   : > { %v4641_v63 = vpop.xlane.xlu1 %4640  ;;  %v4644_v54 = vpop.xlane.xlu0 %4643  ;;  %4706 = vadd.xlane.f32.xlu1 %v4705_v3  ;;  %v4708_v57 = vsel %vm4605_vm3, %v9188_v34, 0.0  ;;  %6882 = vmatprep.subr.mxu0 %v7338_v52  ;;  %v4979_v3 = vld [vmem:[#allocation9 + $0x8] sm:$0x3] }
 0x46a   : > { %7291 = vpow2.f32 %v4688_v16  ;;  %v4665_v1 = vsub.f32 %v9153_v47, %v4641_v63  ;;  %v4666_v55 = vsub.f32 %v9163_v42, %v4644_v54  ;;  %4709 = vadd.xlane.f32.xlu0 %v4708_v57  ;;  %6883 = vmatpush3.msra.mxu0 %v7338_v52 }
 0x46b   : > { %v9196_v29 = vpop.eup %7279  ;;  %7293 = vpow2.f32 %v4690_v38  ;;  %6884 = vmatprep.subr.mxu0 %v7339_v20  ;;  %6967 = vmatprep.subr.mxu1 %v7338_v52 }
 0x46c   : > { %v9198_v26 = vpop.eup %7281  ;;  %v4692_v12 = vmul.f32 1.442695, %v4665_v1  ;;  %v4694_v10 = vmul.f32 1.442695, %v4666_v55  ;;  %v4711_v30 = vsel %vm4605_vm3, %v9196_v29, 0.0  ;;  %6885 = vmatpush3.msra.mxu0 %v7339_v20  ;;  %6970 = vmatpush3.msra.mxu1 %v7338_v52 }
 0x46d   : > { %v4647_v15 = vpop.xlane.xlu1 %4646  ;;  %4712 = vadd.xlane.f32.xlu1 %v4711_v30  ;;  %v4714_v44 = vsel %vm4605_vm3, %v9198_v26, 0.0  ;;  %v4650_v17 = vpop.xlane.xlu0 %4649  ;;  %6968 = vmatprep.subr.mxu1 %v7339_v20 }
 0x46e   : > { %7295 = vpow2.f32 %v4692_v12  ;;  %v4667_v47 = vsub.f32 %v9161_v60, %v4647_v15  ;;  %4715 = vadd.xlane.f32.xlu0 %v4714_v44  ;;  %v4668_v42 = vsub.f32 %v9171_v0, %v4650_v17  ;;  %6971 = vmatpush3.msra.mxu1 %v7339_v20 }
 0x46f   : > { %v9206_v9 = vpop.eup %7283  ;;  %7297 = vpow2.f32 %v4694_v10  ;;  %6938 = vmatprep.subr.msk.mxu0 %vm4319_vm0, %v4979_v3 }
 0x470   : > { %v9208_v39 = vpop.eup %7285  ;;  %v4696_v11 = vmul.f32 1.442695, %v4667_v47  ;;  %v4698_v32 = vmul.f32 1.442695, %v4668_v42  ;;  %v4717_v58 = vsel %vm4605_vm3, %v9206_v9, 0.0 }
 0x471   : > { %4718 = vadd.xlane.f32.xlu1 %v4717_v58  ;;  %v4653_v7 = vpop.xlane.xlu1 %4652  ;;  %v4720_v36 = vsel %vm4605_vm3, %v9208_v39, 0.0 }
 0x472   : > { %7299 = vpow2.f32 %v4696_v11  ;;  %v4669_v60 = vsub.f32 %v9169_v53, %v4653_v7  ;;  %4721 = vadd.xlane.f32.xlu0 %v4720_v36  ;;  %v4978_v7 = vld [vmem:[#allocation9] sm:$0xff] }
 0x473   : > { %v9215_v0 = vpop.eup %7287  ;;  %7301 = vpow2.f32 %v4698_v32 }
 0x474   : > { %v9217_v24 = vpop.eup %7289  ;;  %v4700_v50 = vmul.f32 1.442695, %v4669_v60  ;;  %v4723_v33 = vsel %vm4605_vm3, %v9215_v0, 0.0 }
 0x475   : > { %4724 = vadd.xlane.f32.xlu1 %v4723_v33  ;;  %v4726_v41 = vsel %vm4605_vm3, %v9217_v24, 0.0 }
 0x476   : > { %7303 = vpow2.f32 %v4700_v50  ;;  %4727 = vadd.xlane.f32.xlu0 %v4726_v41 }
 0x477   : > { %v9223_v27 = vpop.eup %7291 }
 0x478   : > { %v9225_v43 = vpop.eup %7293  ;;  %v4729_v53 = vsel %vm4605_vm3, %v9223_v27, 0.0 }
 0x479   : > { %4730 = vadd.xlane.f32.xlu1 %v4729_v53  ;;  %v4732_v49 = vsel %vm4605_vm3, %v9225_v43, 0.0 }
 0x47a   : > { %4733 = vadd.xlane.f32.xlu0 %v4732_v49 }
 0x47b   : > { %v9231_v48 = vpop.eup %7295 }
 0x47c   : > { %v9233_v5 = vpop.eup %7297  ;;  %v4735_v56 = vsel %vm4605_vm3, %v9231_v48, 0.0 }
 0x47d   : > { %4736 = vadd.xlane.f32.xlu1 %v4735_v56  ;;  %v4738_v13 = vsel %vm4605_vm3, %v9233_v5, 0.0 }
 0x47e   : > { %4739 = vadd.xlane.f32.xlu0 %v4738_v13 }
 0x47f   : > { %v9242_v62 = vpop.eup %7299 }
 0x480   : > { %v9244_v6 = vpop.eup %7301  ;;  %v4741_v14 = vsel %vm4605_vm3, %v9242_v62, 0.0 }
 0x481   : > { %4742 = vadd.xlane.f32.xlu1 %v4741_v14  ;;  %v4744_v2 = vsel %vm4605_vm3, %v9244_v6, 0.0 }
 0x482   : > { %4745 = vadd.xlane.f32.xlu0 %v4744_v2 }
 0x483   : > { %v9256_v16 = vpop.eup %7303 }
 0x484   : > { %v4747_v38 = vsel %vm4605_vm3, %v9256_v16, 0.0 }
 0x485   : > { %4748 = vadd.xlane.f32.xlu1 %v4747_v38 }
 0x4ee   : > { %v4704_v63 = vpop.xlane.xlu0 %4703 }
 0x4ef   : > { %7305 = vrcp.f32 %v4704_v63 }
 0x4f2   : > { %v4707_v54 = vpop.xlane.xlu1 %4706 }
 0x4f3   : > { %7307 = vrcp.f32 %v4707_v54  ;;  %v4710_v57 = vpop.xlane.xlu0 %4709 }
 0x4f4   : > { %7309 = vrcp.f32 %v4710_v57 }
 0x4f6   : > { %v4713_v1 = vpop.xlane.xlu1 %4712 }
 0x4f7   : > { %7311 = vrcp.f32 %v4713_v1  ;;  %v4716_v55 = vpop.xlane.xlu0 %4715 }
 0x4f8   : > { %7313 = vrcp.f32 %v4716_v55  ;;  %v9441_v55 = vld [vmem:[#allocation17_spill] sm:$0xff] }
 0x4fa   : > { %v4719_v12 = vpop.xlane.xlu1 %4718 }
 0x4fb   : > { %7315 = vrcp.f32 %v4719_v12  ;;  %v4722_v10 = vpop.xlane.xlu0 %4721 }
 0x4fc   : > { %v7306_v30 = vpop.eup %7305  ;;  %7317 = vrcp.f32 %v4722_v10 }
 0x4fd   : > { %v4766_v15 = vmul.f32 %v7306_v30, %v9180_v45 }
 0x4fe   : > { %v4725_v44 = vpop.xlane.xlu1 %4724 }
 0x4ff   : > { %7319 = vrcp.f32 %v4725_v44  ;;  %v4728_v17 = vpop.xlane.xlu0 %4727  ;;  %6886 = vmatprep.mubr.msk.f32.mxu0 %vm4605_vm3, %v4766_v15 }
 0x500   : > { %v7308_v47 = vpop.eup %7307  ;;  %7321 = vrcp.f32 %v4728_v17 }
 0x501   : > { %v7310_v42 = vpop.eup %7309  ;;  %v4767_v11 = vmul.f32 %v7308_v47, %v9186_v31 }
 0x502   : > { %v4731_v32 = vpop.xlane.xlu1 %4730  ;;  %v4768_v58 = vmul.f32 %v7310_v42, %v9188_v34 }
 0x503   : > { %7323 = vrcp.f32 %v4731_v32  ;;  %v4734_v36 = vpop.xlane.xlu0 %4733  ;;  %6887 = vmatmul.mubr.msk.f32.vlgmr.msra.gmra.mxu0 %vm4605_vm3, %v4767_v11  ;;  %v9346_v11 = vld [vmem:[#allocation12] ss:$0 sm:$0xff] }
 0x504   : > { %v7312_v60 = vpop.eup %7311  ;;  %7325 = vrcp.f32 %v4734_v36  ;;  %6889 = vmatprep.mubr.msk.f32.mxu0 %vm4605_vm3, %v4768_v58  ;;  %6939 = vmatpush3.msk.msra.mxu0 %vm4319_vm0, %v4979_v3 }
 0x505   : > { %v7314_v45 = vpop.eup %7313  ;;  %v4769_v50 = vmul.f32 %v7312_v60, %v9196_v29  ;;  %6940 = vmatprep.subr.mxu0 %v4978_v7 }
 0x506   : > { %v4737_v33 = vpop.xlane.xlu1 %4736  ;;  %v4770_v31 = vmul.f32 %v7314_v45, %v9198_v26  ;;  %6941 = vmatpush3.msra.mxu0 %v4978_v7 }
 0x507   : > { %7327 = vrcp.f32 %v4737_v33  ;;  %v4740_v34 = vpop.xlane.xlu0 %4739  ;;  %6890 = vmatmul.mubr.msk.f32.gmra.mxu0 %vm4605_vm3, %v4769_v50 }
 0x508   : > { %v7316_v41 = vpop.eup %7315  ;;  %7329 = vrcp.f32 %v4740_v34  ;;  %6892 = vmatprep.mubr.msk.f32.mxu0 %vm4605_vm3, %v4770_v31 }
 0x509   : > { %v7318_v53 = vpop.eup %7317  ;;  %v4771_v49 = vmul.f32 %v7316_v41, %v9206_v9 }
 0x50a   : > { %v4743_v56 = vpop.xlane.xlu1 %4742  ;;  %v4772_v13 = vmul.f32 %v7318_v53, %v9208_v39 }
 0x50b   : > { %7331 = vrcp.f32 %v4743_v56  ;;  %v4746_v29 = vpop.xlane.xlu0 %4745  ;;  %6893 = vmatmul.mubr.msk.f32.gmra.mxu0 %vm4605_vm3, %v4771_v49 }
 0x50c   : > { %v7320_v26 = vpop.eup %7319  ;;  %7333 = vrcp.f32 %v4746_v29  ;;  %6895 = vmatprep.mubr.msk.f32.mxu0 %vm4605_vm3, %v4772_v13 }
 0x50d   : > { %v7322_v25 = vpop.eup %7321  ;;  %v4773_v14 = vmul.f32 %v7320_v26, %v9215_v0 }
 0x50e   : > { %v4749_v52 = vpop.xlane.xlu1 %4748  ;;  %v4774_v2 = vmul.f32 %v7322_v25, %v9217_v24 }
 0x50f   : > { %7335 = vrcp.f32 %v4749_v52  ;;  %6896 = vmatmul.mubr.msk.f32.gmra.mxu0 %vm4605_vm3, %v4773_v14 }
 0x510   : > { %v7324_v9 = vpop.eup %7323  ;;  %6898 = vmatprep.mubr.msk.f32.mxu0 %vm4605_vm3, %v4774_v2 }
 0x511   : > { %v7326_v39 = vpop.eup %7325  ;;  %v4775_v20 = vmul.f32 %v7324_v9, %v9223_v27 }
 0x512   : > { %v4776_v38 = vmul.f32 %v7326_v39, %v9225_v43 }
 0x513   : > { %6899 = vmatmul.mubr.msk.f32.gmra.mxu0 %vm4605_vm3, %v4775_v20 }
 0x514   : > { %v7328_v3 = vpop.eup %7327  ;;  %6901 = vmatprep.mubr.msk.f32.mxu0 %vm4605_vm3, %v4776_v38 }
 0x515   : > { %v7330_v0 = vpop.eup %7329  ;;  %v4777_v63 = vmul.f32 %v7328_v3, %v9231_v48 }
 0x516   : > { %v4778_v24 = vmul.f32 %v7330_v0, %v9233_v5 }
 0x517   : > { %6902 = vmatmul.mubr.msk.f32.gmra.mxu0 %vm4605_vm3, %v4777_v63 }
 0x518   : > { %v7332_v54 = vpop.eup %7331  ;;  %6904 = vmatprep.mubr.msk.f32.mxu0 %vm4605_vm3, %v4778_v24 }
 0x519   : > { %v7334_v57 = vpop.eup %7333  ;;  %v4779_v27 = vmul.f32 %v7332_v54, %v9242_v62 }
 0x51a   : > { %v4780_v43 = vmul.f32 %v7334_v57, %v9244_v6 }
 0x51b   : > { %6905 = vmatmul.mubr.msk.f32.gmra.mxu0 %vm4605_vm3, %v4779_v27 }
 0x51c   : > { %v7336_v1 = vpop.eup %7335  ;;  %6907 = vmatprep.mubr.msk.f32.mxu1 %vm4605_vm3, %v4780_v43  ;;  %6942 = vmatprep.mubr.msk.f32.mxu0 %vm4309_vm2, %v9441_v55 }
 0x51d   : > { %v4781_v48 = vmul.f32 %v7336_v1, %v9256_v16 }
 0x51f   : > { %6908 = vmatmul.mubr.msk.f32.vlgmr.msra.gmra.mxu1 %vm4605_vm3, %v4781_v48  ;;  %6943 = vmatmul.mubr.msk.f32.vlgmr.msra.gmra.mxu0 %vm4309_vm2, %v9049_v40  ;;  %v4981_v40 = vld [vmem:[#allocation10 + $0x8] sm:$0x3] }
 0x520   : > { %6945 = vmatprep.mubr.msk.f32.mxu0 %vm4309_vm2, %v9054_v51  ;;  %6910 = vmatprep.subr.msk.mxu1 %vm4319_vm0, %v4981_v40  ;;  %v4980_v51 = vld [vmem:[#allocation10] sm:$0xff] }
 0x521   : > { %6911 = vmatpush3.msk.msra.mxu1 %vm4319_vm0, %v4981_v40 }
 0x522   : > { %6912 = vmatprep.subr.mxu1 %v4980_v51 }
 0x523   : > { %6946 = vmatmul.mubr.msk.f32.gmra.mxu0 %vm4309_vm2, %v9063_v59  ;;  %6913 = vmatpush3.msra.mxu1 %v4980_v51 }
 0x524   : > { %6948 = vmatprep.mubr.msk.f32.mxu0 %vm4309_vm2, %v9068_v19 }
 0x527   : > { %6949 = vmatmul.mubr.msk.f32.gmra.mxu0 %vm4309_vm2, %v9075_v35 }
 0x528   : > { %6951 = vmatprep.mubr.msk.f32.mxu0 %vm4309_vm2, %v9078_v61 }
 0x52b   : > { %6952 = vmatmul.mubr.msk.f32.gmra.mxu0 %vm4309_vm2, %v9086_v4 }
 0x52c   : > { %6954 = vmatprep.mubr.msk.f32.mxu0 %vm4309_vm2, %v9091_v21 }
 0x52f   : > { %6955 = vmatmul.mubr.msk.f32.gmra.mxu0 %vm4309_vm2, %v9100_v22 }
 0x530   : > { %6957 = vmatprep.mubr.msk.f32.mxu0 %vm4309_vm2, %v9105_v37 }
 0x533   : > { %6958 = vmatmul.mubr.msk.f32.gmra.mxu0 %vm4309_vm2, %v9114_v23 }
 0x534   : > { %6960 = vmatprep.mubr.msk.f32.mxu0 %vm4309_vm2, %v9119_v28 }
 0x537   : > { %6961 = vmatmul.mubr.msk.f32.gmra.mxu0 %vm4309_vm2, %v9126_v8 }
 0x538   : > { %6963 = vmatprep.mubr.msk.f32.mxu0 %vm4309_vm2, %v9129_v18 }
 0x53b   : > { %6964 = vmatmul.mubr.msk.f32.gmra.mxu0 %vm4309_vm2, %v9135_v46 }
 0x5c3   : > { %v6888_v59 = vpop.f32.mrf.mxu0 }
 0x5c5   : > { %v4899_v19 = vpop.f32.mrf.mxu0 }
 0x5c6   : > { %6914 = vmatprep.mubr.msk.f32.mxu1 %vm4309_vm2, %v4899_v19 }
 0x5c7   : > { %v6891_v35 = vpop.f32.mrf.mxu0  ;;  %6915 = vmatmul.mubr.msk.f32.vlgmr.msra.gmra.mxu1 %vm4309_vm2, %v6888_v59 }
 0x5c9   : > { %v4909_v61 = vpop.f32.mrf.mxu0 }
 0x5ca   : > { %6917 = vmatprep.mubr.msk.f32.mxu1 %vm4309_vm2, %v4909_v61 }
 0x5cb   : > { %v6894_v4 = vpop.f32.mrf.mxu0  ;;  %6918 = vmatmul.mubr.msk.f32.gmra.mxu1 %vm4309_vm2, %v6891_v35 }
 0x5cd   : > { %v4919_v21 = vpop.f32.mrf.mxu0 }
 0x5ce   : > { %6920 = vmatprep.mubr.msk.f32.mxu1 %vm4309_vm2, %v4919_v21 }
 0x5cf   : > { %v6897_v22 = vpop.f32.mrf.mxu0  ;;  %6921 = vmatmul.mubr.msk.f32.gmra.mxu1 %vm4309_vm2, %v6894_v4 }
 0x5d1   : > { %v4929_v37 = vpop.f32.mrf.mxu0 }
 0x5d2   : > { %6923 = vmatprep.mubr.msk.f32.mxu1 %vm4309_vm2, %v4929_v37 }
 0x5d3   : > { %v6900_v23 = vpop.f32.mrf.mxu0  ;;  %6924 = vmatmul.mubr.msk.f32.gmra.mxu1 %vm4309_vm2, %v6897_v22 }
 0x5d5   : > { %v4939_v28 = vpop.f32.mrf.mxu0 }
 0x5d6   : > { %6926 = vmatprep.mubr.msk.f32.mxu1 %vm4309_vm2, %v4939_v28 }
 0x5d7   : > { %v6903_v8 = vpop.f32.mrf.mxu0  ;;  %6927 = vmatmul.mubr.msk.f32.gmra.mxu1 %vm4309_vm2, %v6900_v23 }
 0x5d9   : > { %v4949_v18 = vpop.f32.mrf.mxu0 }
 0x5da   : > { %6929 = vmatprep.mubr.msk.f32.mxu1 %vm4309_vm2, %v4949_v18 }
 0x5db   : > { %v6906_v46 = vpop.f32.mrf.mxu0  ;;  %6930 = vmatmul.mubr.msk.f32.gmra.mxu1 %vm4309_vm2, %v6903_v8 }
 0x5dd   : > { %v4959_v5 = vpop.f32.mrf.mxu0 }
 0x5de   : > { %6932 = vmatprep.mubr.msk.f32.mxu1 %vm4309_vm2, %v4959_v5 }
 0x5df   : > { %v6909_v62 = vpop.f32.mrf.mxu1  ;;  %6933 = vmatmul.mubr.msk.f32.gmra.mxu1 %vm4309_vm2, %v6906_v46  ;;  %v6944_v16 = vpop.f32.mrf.mxu0 }
 0x5e1   : > { %v4969_v6 = vpop.f32.mrf.mxu1  ;;  %v5247_v12 = vpop.f32.mrf.mxu0 }
 0x5e2   : > { %6935 = vmatprep.mubr.msk.f32.mxu1 %vm4309_vm2, %v4969_v6 }
 0x5e3   : > { %6936 = vmatmul.mubr.msk.f32.gmra.mxu1 %vm4309_vm2, %v6909_v62  ;;  %v6947_v10 = vpop.f32.mrf.mxu0 }
 0x5e5   : > { %v5257_v30 = vpop.f32.mrf.mxu0 }
 0x5e7   : > { %v6950_v15 = vpop.f32.mrf.mxu0 }
 0x5e9   : > { %v5267_v44 = vpop.f32.mrf.mxu0 }
 0x5eb   : > { %v6953_v17 = vpop.f32.mrf.mxu0 }
 0x5ed   : > { %v5277_v47 = vpop.f32.mrf.mxu0 }
 0x5ef   : > { %v6956_v58 = vpop.f32.mrf.mxu0 }
 0x5f1   : > { %v5287_v34 = vpop.f32.mrf.mxu0 }
 0x5f3   : > { %v6959_v14 = vpop.f32.mrf.mxu0 }
 0x5f5   : > { %v5297_v63 = vpop.f32.mrf.mxu0 }
 0x5f7   : > { %v6962_v40 = vpop.f32.mrf.mxu0 }
 0x5f9   : > { %v5307_v37 = vpop.f32.mrf.mxu0 }
 0x687   : > { %v6916_v42 = vpop.f32.mrf.mxu1 }
 0x688   : > { %v5253_v32 = vadd.f32 %v6944_v16, %v6916_v42  ;;  %v6965_v16 = vpop.f32.mrf.mxu0 }
 0x689   : > { %v5099_v7 = vpop.f32.mrf.mxu1 }
 0x68a   : > { %v5334_v36 = vadd.f32 %v9346_v11, %v5253_v32  ;;  %v5248_v60 = vadd.f32 %v5247_v12, %v5099_v7  ;;  %v5317_v32 = vpop.f32.mrf.mxu0 }
 0x68b   : > { %v6919_v45 = vpop.f32.mrf.mxu1 }
 0x68c   : > { %v5350_v50 = vmin.f32 %v5334_v36, 15.0  ;;  %v5333_v33 = vadd.f32 %v9346_v11, %v5248_v60  ;;  %v5263_v31 = vadd.f32 %v6947_v10, %v6919_v45 }
 0x68d   : > { %v5109_v41 = vpop.f32.mrf.mxu1 }
 0x68e   : > { %5366 = vst.msk [vmem:[%s9352_s21 + $0x8] sm:$0xff] %vm4309_vm2, %v5350_v50  ;;  %v5349_v53 = vmin.f32 %v5333_v33, 15.0  ;;  %v5336_v49 = vadd.f32 %v9346_v11, %v5263_v31  ;;  %v5258_v56 = vadd.f32 %v5257_v30, %v5109_v41 }
 0x68f   : > { %v6922_v13 = vpop.f32.mrf.mxu1 }
 0x690   : > { %5365 = vst.msk [vmem:[%s9352_s21] sm:$0xff] %vm4309_vm2, %v5349_v53  ;;  %v5352_v29 = vmin.f32 %v5336_v49, 15.0  ;;  %v5335_v26 = vadd.f32 %v9346_v11, %v5258_v56  ;;  %v5273_v25 = vadd.f32 %v6950_v15, %v6922_v13 }
 0x691   : > { %v5119_v52 = vpop.f32.mrf.mxu1 }
 0x692   : > { %5368 = vst.msk [vmem:[%s9352_s21 + $0x18] sm:$0xff] %vm4309_vm2, %v5352_v29  ;;  %v5351_v2 = vmin.f32 %v5335_v26, 15.0  ;;  %v5338_v9 = vadd.f32 %v9346_v11, %v5273_v25  ;;  %v5268_v39 = vadd.f32 %v5267_v44, %v5119_v52 }
 0x693   : > { %v6925_v20 = vpop.f32.mrf.mxu1 }
 0x694   : > { %5367 = vst.msk [vmem:[%s9352_s21 + $0x10] sm:$0xff] %vm4309_vm2, %v5351_v2  ;;  %v5354_v38 = vmin.f32 %v5338_v9, 15.0  ;;  %v5337_v3 = vadd.f32 %v9346_v11, %v5268_v39  ;;  %v5283_v0 = vadd.f32 %v6953_v17, %v6925_v20 }
 0x695   : > { %v5129_v24 = vpop.f32.mrf.mxu1 }
 0x696   : > { %5370 = vst.msk [vmem:[%s9352_s21 + $0x28] sm:$0xff] %vm4309_vm2, %v5354_v38  ;;  %v5353_v54 = vmin.f32 %v5337_v3, 15.0  ;;  %v5340_v57 = vadd.f32 %v9346_v11, %v5283_v0  ;;  %v5278_v27 = vadd.f32 %v5277_v47, %v5129_v24 }
 0x697   : > { %v6928_v43 = vpop.f32.mrf.mxu1 }
 0x698   : > { %5369 = vst.msk [vmem:[%s9352_s21 + $0x20] sm:$0xff] %vm4309_vm2, %v5353_v54  ;;  %v5356_v1 = vmin.f32 %v5340_v57, 15.0  ;;  %v5339_v55 = vadd.f32 %v9346_v11, %v5278_v27  ;;  %v5293_v48 = vadd.f32 %v6956_v58, %v6928_v43 }
 0x699   : > { %v5139_v51 = vpop.f32.mrf.mxu1 }
 0x69a   : > { %5372 = vst.msk [vmem:[%s9352_s21 + $0x38] sm:$0xff] %vm4309_vm2, %v5356_v1  ;;  %v5355_v59 = vmin.f32 %v5339_v55, 15.0  ;;  %v5342_v19 = vadd.f32 %v9346_v11, %v5293_v48  ;;  %v5288_v35 = vadd.f32 %v5287_v34, %v5139_v51 }
 0x69b   : > { %v6931_v61 = vpop.f32.mrf.mxu1 }
 0x69c   : > { %5371 = vst.msk [vmem:[%s9352_s21 + $0x30] sm:$0xff] %vm4309_vm2, %v5355_v59  ;;  %v5358_v4 = vmin.f32 %v5342_v19, 15.0  ;;  %v5341_v21 = vadd.f32 %v9346_v11, %v5288_v35  ;;  %v5303_v22 = vadd.f32 %v6959_v14, %v6931_v61 }
 0x69d   : > { %v5149_v23 = vpop.f32.mrf.mxu1 }
 0x69e   : > { %5374 = vst.msk [vmem:[%s9352_s21 + $0x48] sm:$0xff] %vm4309_vm2, %v5358_v4  ;;  %v5357_v28 = vmin.f32 %v5341_v21, 15.0  ;;  %v5344_v8 = vadd.f32 %v9346_v11, %v5303_v22  ;;  %v5298_v18 = vadd.f32 %v5297_v63, %v5149_v23 }
 0x69f   : > { %v6934_v46 = vpop.f32.mrf.mxu1 }
 0x6a0   : > { %5373 = vst.msk [vmem:[%s9352_s21 + $0x40] sm:$0xff] %vm4309_vm2, %v5357_v28  ;;  %v5360_v5 = vmin.f32 %v5344_v8, 15.0  ;;  %v5343_v62 = vadd.f32 %v9346_v11, %v5298_v18  ;;  %v5313_v6 = vadd.f32 %v6962_v40, %v6934_v46 }
 0x6a1   : > { %v5159_v12 = vpop.f32.mrf.mxu1 }
 0x6a2   : > { %5376 = vst.msk [vmem:[%s9352_s21 + $0x58] sm:$0xff] %vm4309_vm2, %v5360_v5  ;;  %v5359_v10 = vmin.f32 %v5343_v62, 15.0  ;;  %v5346_v30 = vadd.f32 %v9346_v11, %v5313_v6  ;;  %v5308_v15 = vadd.f32 %v5307_v37, %v5159_v12 }
 0x6a3   : > { %v6937_v44 = vpop.f32.mrf.mxu1 }
 0x6a4   : > { %5375 = vst.msk [vmem:[%s9352_s21 + $0x50] sm:$0xff] %vm4309_vm2, %v5359_v10  ;;  %v5362_v17 = vmin.f32 %v5346_v30, 15.0  ;;  %v5345_v47 = vadd.f32 %v9346_v11, %v5308_v15  ;;  %v5323_v42 = vadd.f32 %v6965_v16, %v6937_v44 }
 0x6a5   : > { %v5169_v58 = vpop.f32.mrf.mxu1 }
 0x6a6   : > { %5378 = vst.msk [vmem:[%s9352_s21 + $0x68] sm:$0xff] %vm4309_vm2, %v5362_v17  ;;  %v5361_v7 = vmin.f32 %v5345_v47, 15.0  ;;  %v5348_v36 = vadd.f32 %v9346_v11, %v5323_v42  ;;  %v5318_v60 = vadd.f32 %v5317_v32, %v5169_v58 }
 0x6a8   : > { %5377 = vst.msk [vmem:[%s9352_s21 + $0x60] sm:$0xff] %vm4309_vm2, %v5361_v7  ;;  %v5364_v45 = vmin.f32 %v5348_v36, 15.0  ;;  %v5347_v50 = vadd.f32 %v9346_v11, %v5318_v60 }
 0x6aa   : > { %5380 = vst.msk [vmem:[%s9352_s21 + $0x78] sm:$0xff] %vm4309_vm2, %v5364_v45  ;;  %v5363_v33 = vmin.f32 %v5347_v50, 15.0 }
 0x6ac   : > { %5379 = vst.msk [vmem:[%s9352_s21 + $0x70] sm:$0xff] %vm4309_vm2, %v5363_v33 }
 0x6ad PF: > { %p22_p12 = scmp.ge.s32.totalorder %s7741_s23, 4   ;;  %s9443_s30 = smov %s7562_s10 }
 0x6ae   : > { %s9444_s10 = smov %s7566_s11  ;;  %s9445_s11 = smov %s7753_s24 }
 0x6af   : > { %s9446_s12 = smov %s7741_s23  ;;  %24 = sbr.rel (!%p22_p12) target bundleno = 6 (0x6), region = 120 }
 0x6b4   :  { %5403 = vsyncpa [#allocation3], 1 }
 0x6b5   :  { %5405 = vsyncpa [#allocation3 + $0x1], 1 }
 0x6b6   :  { %5406 = vsyncpa [#allocation5], 1 }
 0x6b7   :  { %5407 = vsyncpa [#allocation8], 1 }
 0x6b8   :  { %5408 = vsyncpa [#allocation11], 1 }

</bundles_post_ra>
